<compile_context>
chip_gen: v5e
topology: v5e:2x2
jax: 0.10.0
libtpu: 0.0.40
codegen_flags: <defaults>
</compile_context>

<pallas_src>
import math

import jax
import jax.numpy as jnp
from jax import lax
from jax.experimental import pallas as pl
from jax.experimental.pallas import tpu as pltpu


_SMALL_N_MAX = 2048   # non-flash position-attention path for N (= H*W) up to this


# -------------- fused 3x3 conv (QKV tokens + yc) + channel attention ----------------

def _conv_chan_kernel(x_ref, w_ref, b_ref, qkv_ref, c_ref, xp_ref):
    """One batch element: im2col conv -> [Q|K|V|yc] slab + channel-attention output.

    x_ref:   (1, H, W, Cin)  f32 NHWC input
    w_ref:   (9*Cin, 4*C)    bf16 im2col weights [WQ/sqrt(C) | WK | WV | Wc]
    b_ref:   (1, 4*C)        f32 folded biases
    qkv_ref: (1, N, 4*C)     bf16 lane-dense token slab [Q | K | V | yc]
    c_ref:   (1, C, N)       f32 channel-attention output (c_out, NCHW-flat)
    xp_ref:  (H+2, W+2, Cin) f32 VMEM scratch (1-pixel zero halo)
    """
    H, W, Cin = x_ref.shape[1], x_ref.shape[2], x_ref.shape[3]
    C = qkv_ref.shape[2] // 4
    N = H * W

    # Zero only the 1-pixel halo; the interior is fully overwritten below.
    zrow = jnp.zeros((1, W + 2, Cin), jnp.float32)
    zcol = jnp.zeros((H, 1, Cin), jnp.float32)
    xp_ref[0:1, :, :] = zrow
    xp_ref[H + 1:H + 2, :, :] = zrow
    xp_ref[1:H + 1, 0:1, :] = zcol
    xp_ref[1:H + 1, W + 1:W + 2, :] = zcol
    xp_ref[1:H + 1, 1:W + 1, :] = x_ref[0]

    # im2col in bf16: one big-K matmul (K = 9*Cin) instead of nine K=Cin matmuls.
    cols = [xp_ref[dy:dy + H, dx:dx + W, :].astype(jnp.bfloat16)
            for dy in range(3) for dx in range(3)]
    patches = jnp.concatenate(cols, axis=-1).reshape(N, 9 * Cin)
    acc = jnp.dot(patches, w_ref[...],
                  preferred_element_type=jnp.float32) + b_ref[...]

    # Single lane-dense (N, 4C) store (4C >= 128 -> unmasked full-width vst).
    qkv_ref[0] = acc.astype(qkv_ref.dtype)

    # Channel attention (SimplifiedScaledDotProductAttention, d_k = N) on yc.
    yc = acc[:, 3 * C:4 * C].astype(jnp.bfloat16).T                    # (C, N)
    g = lax.dot_general(yc, yc, (((1,), (1,)), ((), ())),
                        preferred_element_type=jnp.float32) * (1.0 / math.sqrt(N))
    g = g - jnp.max(g, axis=-1, keepdims=True)
    e = jnp.exp(g)
    att = e * pl.reciprocal(jnp.sum(e, axis=-1, keepdims=True), approx=True)
    c_ref[0] = jnp.dot(att.astype(jnp.bfloat16), yc,
                       preferred_element_type=jnp.float32)             # (C, N)


def fused_conv_chan(x_nhwc, w_all, b_all, C):
    bs, H, W, Cin = x_nhwc.shape
    N = H * W
    return pl.pallas_call(
        _conv_chan_kernel,
        out_shape=(jax.ShapeDtypeStruct((bs, N, 4 * C), jnp.bfloat16),
                   jax.ShapeDtypeStruct((bs, C, N), jnp.float32)),
        grid_spec=pltpu.PrefetchScalarGridSpec(
            num_scalar_prefetch=0,
            grid=(bs,),
            in_specs=[
                pl.BlockSpec((1, H, W, Cin), lambda b: (b, 0, 0, 0)),
                pl.BlockSpec((9 * Cin, 4 * C), lambda b: (0, 0)),
                pl.BlockSpec((1, 4 * C), lambda b: (0, 0)),
            ],
            out_specs=(pl.BlockSpec((1, N, 4 * C), lambda b: (b, 0, 0)),
                       pl.BlockSpec((1, C, N), lambda b: (b, 0, 0))),
            scratch_shapes=[pltpu.VMEM((H + 2, W + 2, Cin), jnp.float32)],
        ),
        compiler_params=pltpu.CompilerParams(
            dimension_semantics=("parallel",)),
    )(x_nhwc, w_all, b_all)


# -------------- position attention (fc_o + residual add fused in epilogue) -----------

def _pos_attn_small_kernel(q_ref, kv_ref, wo_ref, bo_ref, c_ref, o_ref):
    """Non-flash path: whole K/V resident, one full softmax per q-tile.

    q_ref:  (1, TQ, 4C) bf16 slab tile (Q in cols [0,C), pre-scaled by 1/sqrt(C))
    kv_ref: (1, N, 4C)  bf16 full slab (K cols [C,2C), V cols [2C,3C))
    wo_ref: (C, C) bf16 (fc_o weight, transposed)   bo_ref: (1, C) f32
    c_ref:  (1, C, TQ) f32 channel tile             o_ref: (1, C, TQ) f32 out
    """
    C = wo_ref.shape[0]
    q = q_ref[0][:, 0:C]
    k = kv_ref[0][:, C:2 * C]
    v = kv_ref[0][:, 2 * C:3 * C]
    s = lax.dot_general(q, k, (((1,), (1,)), ((), ())),
                        preferred_element_type=jnp.float32)            # (TQ, N)
    s = s - jnp.max(s, axis=-1, keepdims=True)
    p = jnp.exp(s)
    p = p * pl.reciprocal(jnp.sum(p, axis=-1, keepdims=True), approx=True)
    ctx = jnp.dot(p.astype(jnp.bfloat16), v,
                  preferred_element_type=jnp.float32)                   # (TQ, C)
    out = jnp.dot(ctx.astype(jnp.bfloat16), wo_ref[...],
                  preferred_element_type=jnp.float32) + bo_ref[...]
    o_ref[0] = out.T + c_ref[0]                                         # (C, TQ)


def _pos_attn_flash_kernel(q_ref, kv_ref, wo_ref, bo_ref, c_ref, o_ref,
                           m_sc, l_sc, acc_sc):
    """Flash fallback for large N: online softmax over the ki grid axis."""
    ki = pl.program_id(2)
    C = wo_ref.shape[0]

    @pl.when(ki == 0)
    def _():
        m_sc[...] = jnp.full_like(m_sc, -jnp.inf)
        l_sc[...] = jnp.zeros_like(l_sc)
        acc_sc[...] = jnp.zeros_like(acc_sc)

    q = q_ref[0][:, 0:C]                       # 1/sqrt(C) already folded into Q
    k = kv_ref[0][:, C:2 * C]
    v = kv_ref[0][:, 2 * C:3 * C]
    s = lax.dot_general(q, k, (((1,), (1,)), ((), ())),
                        preferred_element_type=jnp.float32)             # (TQ, TK)

    m_prev = m_sc[...]
    m_new = jnp.maximum(m_prev, jnp.max(s, axis=-1, keepdims=True))
    alpha = jnp.exp(m_prev - m_new)
    p = jnp.exp(s - m_new)
    l_sc[...] = alpha * l_sc[...] + jnp.sum(p, axis=-1, keepdims=True)
    acc_sc[...] = alpha * acc_sc[...] + jnp.dot(
        p.astype(jnp.bfloat16), v, preferred_element_type=jnp.float32)
    m_sc[...] = m_new

    @pl.when(ki == pl.num_programs(2) - 1)
    def _():
        ctx = acc_sc[...] * pl.reciprocal(l_sc[...], approx=True)
        out = jnp.dot(ctx.astype(jnp.bfloat16), wo_ref[...],
                      preferred_element_type=jnp.float32) + bo_ref[...]
        o_ref[0] = out.T + c_ref[0]


def _flash_tiles(n):
    # Cap the logits tile: TQ*TK*4B <= 128 KiB (half the vreg file) to avoid spills.
    tq = 256 if n % 256 == 0 else (128 if n % 128 == 0 else n)
    tk = 128 if n % 128 == 0 else (32 if n % 32 == 0 else n)
    # TODO(synk): pad N to a multiple of 128 for awkward H*W at very large scales.
    return tq, tk


def position_attention(qkv_slab, c_cn, wo_t, bo, *, force_flash=False):
    """qkv_slab: (bs,N,4C) bf16, c_cn: (bs,C,N) f32 -> (bs,C,N) f32 (p_out + c_out)."""
    bs, N, C4 = qkv_slab.shape
    C = C4 // 4

    if force_flash or N > _SMALL_N_MAX:
        tq, tk = _flash_tiles(N)
        return pl.pallas_call(
            _pos_attn_flash_kernel,
            out_shape=jax.ShapeDtypeStruct((bs, C, N), jnp.float32),
            grid_spec=pltpu.PrefetchScalarGridSpec(
                num_scalar_prefetch=0,
                grid=(bs, N // tq, N // tk),
                in_specs=[
                    pl.BlockSpec((1, tq, C4), lambda b, qi, ki: (b, qi, 0)),
                    pl.BlockSpec((1, tk, C4), lambda b, qi, ki: (b, ki, 0)),
                    pl.BlockSpec((C, C), lambda b, qi, ki: (0, 0)),
                    pl.BlockSpec((1, C), lambda b, qi, ki: (0, 0)),
                    pl.BlockSpec((1, C, tq), lambda b, qi, ki: (b, 0, qi)),
                ],
                out_specs=pl.BlockSpec((1, C, tq), lambda b, qi, ki: (b, 0, qi)),
                scratch_shapes=[pltpu.VMEM((tq, 1), jnp.float32),
                                pltpu.VMEM((tq, 1), jnp.float32),
                                pltpu.VMEM((tq, C), jnp.float32)],
            ),
            compiler_params=pltpu.CompilerParams(
                dimension_semantics=("parallel", "parallel", "arbitrary")),
        )(qkv_slab, qkv_slab, wo_t, bo, c_cn)

    # Small-N fast path: no online-softmax machinery, K/V stay resident per q-tile.
    tq = 128 if (N % 128 == 0 and N > 128) else N
    return pl.pallas_call(
        _pos_attn_small_kernel,
        out_shape=jax.ShapeDtypeStruct((bs, C, N), jnp.float32),
        grid_spec=pltpu.PrefetchScalarGridSpec(
            num_scalar_prefetch=0,
            grid=(bs, N // tq),
            in_specs=[
                pl.BlockSpec((1, tq, C4), lambda b, qi: (b, qi, 0)),
                pl.BlockSpec((1, N, C4), lambda b, qi: (b, 0, 0)),
                pl.BlockSpec((C, C), lambda b, qi: (0, 0)),
                pl.BlockSpec((1, C), lambda b, qi: (0, 0)),
                pl.BlockSpec((1, C, tq), lambda b, qi: (b, 0, qi)),
            ],
            out_specs=pl.BlockSpec((1, C, tq), lambda b, qi: (b, 0, qi)),
        ),
        compiler_params=pltpu.CompilerParams(
            dimension_semantics=("parallel", "parallel")),
    )(qkv_slab, qkv_slab, wo_t, bo, c_cn)


# ------------------------------ module wrappers --------------------------------------

def self_da_module(x, p, force_flash=False):
    """Forward of SelfDAModule.  x: NCHW (bs, C, H, W) -> NCHW output."""
    bs, C, H, W = x.shape
    inv_sqrt_c = 1.0 / math.sqrt(C)

    # Fold fc_q (with the 1/sqrt(C) attention scale), fc_k, fc_v into the
    # position-branch conv, and stack the channel-branch conv, so one im2col matmul
    # produces everything (free, wrapper-side weight math).
    wp = jnp.transpose(p["cnn_p_w"], (2, 3, 1, 0))     # HWIO (3,3,C,C)
    wc = jnp.transpose(p["cnn_c_w"], (2, 3, 1, 0))
    wq_f = jnp.einsum("hwio,mo->hwim", wp, p["wq"]) * inv_sqrt_c
    wk_f = jnp.einsum("hwio,mo->hwim", wp, p["wk"])
    wv_f = jnp.einsum("hwio,mo->hwim", wp, p["wv"])
    w_all = jnp.concatenate([wq_f, wk_f, wv_f, wc], axis=-1)
    w_all = w_all.reshape(9 * C, 4 * C).astype(jnp.bfloat16)
    b_all = jnp.concatenate([
        (p["wq"] @ p["cnn_p_b"] + p["bq"]) * inv_sqrt_c,
        p["wk"] @ p["cnn_p_b"] + p["bk"],
        p["wv"] @ p["cnn_p_b"] + p["bv"],
        p["cnn_c_b"],
    ]).reshape(1, 4 * C).astype(jnp.float32)

    x_nhwc = jnp.transpose(x, (0, 2, 3, 1))
    qkv_slab, c_cn = fused_conv_chan(x_nhwc, w_all, b_all, C)

    out_cn = position_attention(qkv_slab, c_cn,
                                p["wo"].T.astype(jnp.bfloat16),
                                p["bo"].reshape(1, C).astype(jnp.float32),
                                force_flash=force_flash)
    return out_cn.reshape(bs, C, H, W)


_self_da_jit = jax.jit(self_da_module, static_argnames=("force_flash",))


def self_attention_module(y_list, params_list):
    """Forward of SelfAttentionModule: one SelfDAModule per pyramid scale."""
    return [_self_da_jit(x, p) for x, p in zip(y_list, params_list)]


# -------------------------- deterministic parameters ---------------------------------

def init_selfda_params(key, d_model, k=3):
    """PyTorch-style uniform(-1/sqrt(fan_in), 1/sqrt(fan_in)) init, torch layouts."""
    C = d_model
    ks = jax.random.split(key, 12)

    def u(kk, shape, fan_in):
        b = 1.0 / math.sqrt(fan_in)
        return jax.random.uniform(kk, shape, jnp.float32, -b, b)

    return {
        "cnn_p_w": u(ks[0], (C, C, k, k), C * k * k),   # position-branch conv (OIHW)
        "cnn_p_b": u(ks[1], (C,), C * k * k),
        "cnn_c_w": u(ks[2], (C, C, k, k), C * k * k),   # channel-branch conv (OIHW)
        "cnn_c_b": u(ks[3], (C,), C * k * k),
        "wq": u(ks[4], (C, C), C), "bq": u(ks[5], (C,), C),
        "wk": u(ks[6], (C, C), C), "bk": u(ks[7], (C,), C),
        "wv": u(ks[8], (C, C), C), "bv": u(ks[9], (C,), C),
        "wo": u(ks[10], (C, C), C), "bo": u(ks[11], (C,), C),
    }


# ------------------------------ pure-JAX reference ------------------------------------

def reference_self_da(x, p):
    bs, C, H, W = x.shape
    conv = lambda inp, w, b: jax.lax.conv_general_dilated(
        inp, w, (1, 1), "SAME",
        dimension_numbers=("NCHW", "OIHW", "NCHW")) + b[None, :, None, None]
    # position branch (ScaledDotProductAttention, h=1, d_k=d_v=C)
    y = conv(x, p["cnn_p_w"], p["cnn_p_b"]).reshape(bs, C, -1).transpose(0, 2, 1)
    q = y @ p["wq"].T + p["bq"]
    k = y @ p["wk"].T + p["bk"]
    v = y @ p["wv"].T + p["bv"]
    att = jax.nn.softmax((q @ jnp.swapaxes(k, -1, -2)) / math.sqrt(C), axis=-1)
    p_out = (att @ v) @ p["wo"].T + p["bo"]                         # (bs, N, C)
    # channel branch (SimplifiedScaledDotProductAttention, h=1, d_k=H*W)
    yc = conv(x, p["cnn_c_w"], p["cnn_c_b"]).reshape(bs, C, -1)     # (bs, C, N)
    attc = jax.nn.softmax((yc @ jnp.swapaxes(yc, -1, -2)) / math.sqrt(H * W),
                          axis=-1)
    c_out = attc @ yc
    return (jnp.swapaxes(p_out, 1, 2) + c_out).reshape(bs, C, H, W)


# ----------------------------------- main ----------------------------------------------

if __name__ == "__main__":
    key = jax.random.PRNGKey(0)
    bs = 2
    spat_dims = [(16, 16), (8, 8)]
    channel_list = [32, 64]

    keys = jax.random.split(key, 2 * len(spat_dims))
    y_list, params_list = [], []
    for i, ((H, W), C) in enumerate(zip(spat_dims, channel_list)):
        y_list.append(jax.random.normal(keys[2 * i], (bs, C, H, W), jnp.float32))
        params_list.append(init_selfda_params(keys[2 * i + 1], C))

    outs = self_attention_module(y_list, params_list)
    outs = jax.block_until_ready(outs)

    for ((H, W), C, o) in zip(spat_dims, channel_list, outs):
        assert o.shape == (bs, C, H, W), o.shape

    for x, p, o in zip(y_list, params_list, outs):
        ref = reference_self_da(x, p)
        denom = max(1.0, float(jnp.max(jnp.abs(ref))))
        # bf16 MXU operands with f32 accumulation -> ~1e-3..1e-2 abs deviation.
        err = float(jnp.max(jnp.abs(o - ref)))
        assert err <= 2e-2 * denom, f"small-N path: max abs error {err} (scale {denom})"
        # Also validate the capped flash fallback path (used when N > _SMALL_N_MAX).
        o_flash = jax.block_until_ready(_self_da_jit(x, p, force_flash=True))
        err_f = float(jnp.max(jnp.abs(o_flash - ref)))
        assert err_f <= 2e-2 * denom, f"flash path: max abs error {err_f} (scale {denom})"

    print("KERNEL_OK")
</pallas_src>

<mosaic_0001>
module attributes {stable_mosaic.version = 11 : i64} {
  func.func @_conv_chan_kernel(%arg0: i32, %arg1: memref<1x16x16x32xf32, #tpu.memory_space<vmem>>, %arg2: memref<288x128xbf16, #tpu.memory_space<vmem>>, %arg3: memref<1x128xf32, #tpu.memory_space<vmem>>, %arg4: memref<1x256x128xbf16, #tpu.memory_space<vmem>>, %arg5: memref<1x32x256xf32, #tpu.memory_space<vmem>>, %arg6: memref<18x18x32xf32, #tpu.memory_space<vmem>>) attributes {dimension_semantics = [#tpu.dimension_semantics<parallel>], iteration_bounds = array<i64: 2>, scalar_prefetch = 0 : i64, scratch_operands = 1 : i64, tpu.core_type = #tpu.core_type<tc>, window_params = [{transform_indices = @transform_0, window_bounds = array<i64: 1, 16, 16, 32>}, {pipeline_mode = #tpu.pipeline_mode<synchronous>, transform_indices = @transform_1, window_bounds = array<i64: 288, 128>}, {pipeline_mode = #tpu.pipeline_mode<synchronous>, transform_indices = @transform_2, window_bounds = array<i64: 1, 128>}, {transform_indices = @transform_3, window_bounds = array<i64: 1, 256, 128>}, {transform_indices = @transform_4, window_bounds = array<i64: 1, 32, 256>}]} {
    %cst = arith.constant 0.000000e+00 : f32
    %0 = vector.broadcast %cst : f32 to vector<1x18x32xf32>
    %cst_0 = arith.constant 0.000000e+00 : f32
    %1 = vector.broadcast %cst_0 : f32 to vector<16x1x32xf32>
    %c0 = arith.constant 0 : index
    %c0_1 = arith.constant 0 : index
    %c0_2 = arith.constant 0 : index
    %2 = vector.load %arg6[%c0, %c0_1, %c0_2] : memref<18x18x32xf32, #tpu.memory_space<vmem>>, vector<1x18x32xf32>
    tpu.vector_store %arg6[%c0, %c0_1, %c0_2], %0 {strides = array<i32>} : memref<18x18x32xf32, #tpu.memory_space<vmem>>, vector<1x18x32xf32>,
    %c17 = arith.constant 17 : index
    %c0_3 = arith.constant 0 : index
    %c0_4 = arith.constant 0 : index
    %3 = vector.load %arg6[%c17, %c0_3, %c0_4] : memref<18x18x32xf32, #tpu.memory_space<vmem>>, vector<1x18x32xf32>
    tpu.vector_store %arg6[%c17, %c0_3, %c0_4], %0 {strides = array<i32>} : memref<18x18x32xf32, #tpu.memory_space<vmem>>, vector<1x18x32xf32>,
    %c1 = arith.constant 1 : index
    %c0_5 = arith.constant 0 : index
    %c0_6 = arith.constant 0 : index
    %4 = vector.load %arg6[%c1, %c0_5, %c0_6] : memref<18x18x32xf32, #tpu.memory_space<vmem>>, vector<16x1x32xf32>
    tpu.vector_store %arg6[%c1, %c0_5, %c0_6], %1 {strides = array<i32>} : memref<18x18x32xf32, #tpu.memory_space<vmem>>, vector<16x1x32xf32>,
    %c1_7 = arith.constant 1 : index
    %c17_8 = arith.constant 17 : index
    %c0_9 = arith.constant 0 : index
    %5 = vector.load %arg6[%c1_7, %c17_8, %c0_9] : memref<18x18x32xf32, #tpu.memory_space<vmem>>, vector<16x1x32xf32>
    tpu.vector_store %arg6[%c1_7, %c17_8, %c0_9], %1 {strides = array<i32>} : memref<18x18x32xf32, #tpu.memory_space<vmem>>, vector<16x1x32xf32>,
    %c0_10 = arith.constant 0 : index
    %c0_11 = arith.constant 0 : index
    %c0_12 = arith.constant 0 : index
    %c0_13 = arith.constant 0 : index
    %6 = vector.load %arg1[%c0_10, %c0_11, %c0_12, %c0_13] : memref<1x16x16x32xf32, #tpu.memory_space<vmem>>, vector<1x16x16x32xf32>
    %7 = vector.shape_cast %6 : vector<1x16x16x32xf32> to vector<16x16x32xf32>
    %c1_14 = arith.constant 1 : index
    %c1_15 = arith.constant 1 : index
    %c0_16 = arith.constant 0 : index
    %8 = vector.load %arg6[%c1_14, %c1_15, %c0_16] : memref<18x18x32xf32, #tpu.memory_space<vmem>>, vector<16x16x32xf32>
    tpu.vector_store %arg6[%c1_14, %c1_15, %c0_16], %7 {strides = array<i32>} : memref<18x18x32xf32, #tpu.memory_space<vmem>>, vector<16x16x32xf32>,
    %c0_17 = arith.constant 0 : index
    %c0_18 = arith.constant 0 : index
    %c0_19 = arith.constant 0 : index
    %9 = vector.load %arg6[%c0_17, %c0_18, %c0_19] : memref<18x18x32xf32, #tpu.memory_space<vmem>>, vector<16x16x32xf32>
    %10 = arith.truncf %9 : vector<16x16x32xf32> to vector<16x16x32xbf16>
    %c0_20 = arith.constant 0 : index
    %c1_21 = arith.constant 1 : index
    %c0_22 = arith.constant 0 : index
    %11 = vector.load %arg6[%c0_20, %c1_21, %c0_22] : memref<18x18x32xf32, #tpu.memory_space<vmem>>, vector<16x16x32xf32>
    %12 = arith.truncf %11 : vector<16x16x32xf32> to vector<16x16x32xbf16>
    %c0_23 = arith.constant 0 : index
    %c2 = arith.constant 2 : index
    %c0_24 = arith.constant 0 : index
    %13 = vector.load %arg6[%c0_23, %c2, %c0_24] : memref<18x18x32xf32, #tpu.memory_space<vmem>>, vector<16x16x32xf32>
    %14 = arith.truncf %13 : vector<16x16x32xf32> to vector<16x16x32xbf16>
    %c1_25 = arith.constant 1 : index
    %c0_26 = arith.constant 0 : index
    %c0_27 = arith.constant 0 : index
    %15 = vector.load %arg6[%c1_25, %c0_26, %c0_27] : memref<18x18x32xf32, #tpu.memory_space<vmem>>, vector<16x16x32xf32>
    %16 = arith.truncf %15 : vector<16x16x32xf32> to vector<16x16x32xbf16>
    %c1_28 = arith.constant 1 : index
    %c1_29 = arith.constant 1 : index
    %c0_30 = arith.constant 0 : index
    %17 = vector.load %arg6[%c1_28, %c1_29, %c0_30] : memref<18x18x32xf32, #tpu.memory_space<vmem>>, vector<16x16x32xf32>
    %18 = arith.truncf %17 : vector<16x16x32xf32> to vector<16x16x32xbf16>
    %c1_31 = arith.constant 1 : index
    %c2_32 = arith.constant 2 : index
    %c0_33 = arith.constant 0 : index
    %19 = vector.load %arg6[%c1_31, %c2_32, %c0_33] : memref<18x18x32xf32, #tpu.memory_space<vmem>>, vector<16x16x32xf32>
    %20 = arith.truncf %19 : vector<16x16x32xf32> to vector<16x16x32xbf16>
    %c2_34 = arith.constant 2 : index
    %c0_35 = arith.constant 0 : index
    %c0_36 = arith.constant 0 : index
    %21 = vector.load %arg6[%c2_34, %c0_35, %c0_36] : memref<18x18x32xf32, #tpu.memory_space<vmem>>, vector<16x16x32xf32>
    %22 = arith.truncf %21 : vector<16x16x32xf32> to vector<16x16x32xbf16>
    %c2_37 = arith.constant 2 : index
    %c1_38 = arith.constant 1 : index
    %c0_39 = arith.constant 0 : index
    %23 = vector.load %arg6[%c2_37, %c1_38, %c0_39] : memref<18x18x32xf32, #tpu.memory_space<vmem>>, vector<16x16x32xf32>
    %24 = arith.truncf %23 : vector<16x16x32xf32> to vector<16x16x32xbf16>
    %c2_40 = arith.constant 2 : index
    %c2_41 = arith.constant 2 : index
    %c0_42 = arith.constant 0 : index
    %25 = vector.load %arg6[%c2_40, %c2_41, %c0_42] : memref<18x18x32xf32, #tpu.memory_space<vmem>>, vector<16x16x32xf32>
    %26 = arith.truncf %25 : vector<16x16x32xf32> to vector<16x16x32xbf16>
    %27 = tpu.concatenate %10, %12, %14, %16, %18, %20, %22, %24, %26 in 2 : vector<16x16x32xbf16>, vector<16x16x32xbf16>, vector<16x16x32xbf16>, vector<16x16x32xbf16>, vector<16x16x32xbf16>, vector<16x16x32xbf16>, vector<16x16x32xbf16>, vector<16x16x32xbf16>, vector<16x16x32xbf16> -> vector<16x16x288xbf16>
    %28 = vector.shape_cast %27 : vector<16x16x288xbf16> to vector<256x288xbf16>
    %c0_43 = arith.constant 0 : index
    %c0_44 = arith.constant 0 : index
    %29 = vector.load %arg2[%c0_43, %c0_44] : memref<288x128xbf16, #tpu.memory_space<vmem>>, vector<288x128xbf16>
    %cst_45 = arith.constant dense<0.000000e+00> : vector<256x128xf32>
    %30 = tpu.matmul %28, %29, %cst_45 {dimension_numbers = #tpu.dot_dimension_numbers<[1], [0], [0], [1], [0, 0, 1, 1], [], []>} : vector<256x288xbf16>, vector<288x128xbf16>, vector<256x128xf32> -> vector<256x128xf32>
    %c0_46 = arith.constant 0 : index
    %c0_47 = arith.constant 0 : index
    %31 = vector.load %arg3[%c0_46, %c0_47] : memref<1x128xf32, #tpu.memory_space<vmem>>, vector<1x128xf32>
    %32 = vector.broadcast %31 : vector<1x128xf32> to vector<256x128xf32>
    %33 = arith.addf %30, %32 : vector<256x128xf32>
    %34 = arith.truncf %33 : vector<256x128xf32> to vector<256x128xbf16>
    %c0_48 = arith.constant 0 : index
    %c0_49 = arith.constant 0 : index
    %c0_50 = arith.constant 0 : index
    %35 = vector.load %arg4[%c0_48, %c0_49, %c0_50] : memref<1x256x128xbf16, #tpu.memory_space<vmem>>, vector<1x256x128xbf16>
    %36 = vector.shape_cast %35 : vector<1x256x128xbf16> to vector<256x128xbf16>
    %37 = vector.shape_cast %34 : vector<256x128xbf16> to vector<1x256x128xbf16>
    tpu.vector_store %arg4[%c0_48, %c0_49, %c0_50], %37 {strides = array<i32>} : memref<1x256x128xbf16, #tpu.memory_space<vmem>>, vector<1x256x128xbf16>,
    %38 = vector.extract_strided_slice %33 {offsets = [0, 96], sizes = [256, 32], strides = [1, 1]} : vector<256x128xf32> to vector<256x32xf32>
    %39 = arith.truncf %38 : vector<256x32xf32> to vector<256x32xbf16>
    %40 = tpu.transpose %39, [1, 0] : vector<256x32xbf16> -> vector<32x256xbf16>
    %cst_51 = arith.constant dense<0.000000e+00> : vector<32x32xf32>
    %41 = tpu.matmul %40, %40, %cst_51 {dimension_numbers = #tpu.dot_dimension_numbers<[1], [1], [0], [0], [0, 0, 1, 0], [], []>} : vector<32x256xbf16>, vector<32x256xbf16>, vector<32x32xf32> -> vector<32x32xf32>
    %cst_52 = arith.constant 6.250000e-02 : f32
    %42 = vector.broadcast %cst_52 : f32 to vector<32x32xf32>
    %43 = arith.mulf %41, %42 : vector<32x32xf32>
    %cst_53 = arith.constant dense<0xFF800000> : vector<32xf32>
    %44 = vector.multi_reduction <maximumf>, %43, %cst_53 [1] : vector<32x32xf32> to vector<32xf32>
    %45 = vector.shape_cast %44 : vector<32xf32> to vector<32x1xf32>
    %46 = vector.broadcast %45 : vector<32x1xf32> to vector<32x32xf32>
    %47 = arith.subf %43, %46 : vector<32x32xf32>
    %48 = math.exp %47 : vector<32x32xf32>
    %cst_54 = arith.constant dense<0.000000e+00> : vector<32xf32>
    %49 = vector.multi_reduction <add>, %48, %cst_54 [1] : vector<32x32xf32> to vector<32xf32>
    %50 = vector.shape_cast %49 : vector<32xf32> to vector<32x1xf32>
    %51 = tpu.reciprocal %50 {approx = true} : vector<32x1xf32> -> vector<32x1xf32>
    %52 = vector.broadcast %51 : vector<32x1xf32> to vector<32x32xf32>
    %53 = arith.mulf %48, %52 : vector<32x32xf32>
    %54 = arith.truncf %53 : vector<32x32xf32> to vector<32x32xbf16>
    %cst_55 = arith.constant dense<0.000000e+00> : vector<32x256xf32>
    %55 = tpu.matmul %54, %40, %cst_55 {dimension_numbers = #tpu.dot_dimension_numbers<[1], [0], [0], [1], [0, 0, 1, 1], [], []>} : vector<32x32xbf16>, vector<32x256xbf16>, vector<32x256xf32> -> vector<32x256xf32>
    %c0_56 = arith.constant 0 : index
    %c0_57 = arith.constant 0 : index
    %c0_58 = arith.constant 0 : index
    %56 = vector.load %arg5[%c0_56, %c0_57, %c0_58] : memref<1x32x256xf32, #tpu.memory_space<vmem>>, vector<1x32x256xf32>
    %57 = vector.shape_cast %56 : vector<1x32x256xf32> to vector<32x256xf32>
    %58 = vector.shape_cast %55 : vector<32x256xf32> to vector<1x32x256xf32>
    tpu.vector_store %arg5[%c0_56, %c0_57, %c0_58], %58 {strides = array<i32>} : memref<1x32x256xf32, #tpu.memory_space<vmem>>, vector<1x32x256xf32>,
    return
  }
  func.func @transform_0(%arg0: i32) -> (i32, i32, i32, i32) {
    %c0_i32 = arith.constant 0 : i32
    %c0_i32_0 = arith.constant 0 : i32
    %c0_i32_1 = arith.constant 0 : i32
    %c0_i32_2 = arith.constant 0 : i32
    return %arg0, %c0_i32, %c0_i32_0, %c0_i32_1 : i32, i32, i32, i32
  }
  func.func @transform_1(%arg0: i32) -> (i32, i32) {
    %c0_i32 = arith.constant 0 : i32
    %c0_i32_0 = arith.constant 0 : i32
    %c0_i32_1 = arith.constant 0 : i32
    return %c0_i32, %c0_i32_0 : i32, i32
  }
  func.func @transform_2(%arg0: i32) -> (i32, i32) {
    %c0_i32 = arith.constant 0 : i32
    %c0_i32_0 = arith.constant 0 : i32
    %c0_i32_1 = arith.constant 0 : i32
    return %c0_i32, %c0_i32_0 : i32, i32
  }
  func.func @transform_3(%arg0: i32) -> (i32, i32, i32) {
    %c0_i32 = arith.constant 0 : i32
    %c0_i32_0 = arith.constant 0 : i32
    %c0_i32_1 = arith.constant 0 : i32
    return %arg0, %c0_i32, %c0_i32_0 : i32, i32, i32
  }
  func.func @transform_4(%arg0: i32) -> (i32, i32, i32) {
    %c0_i32 = arith.constant 0 : i32
    %c0_i32_0 = arith.constant 0 : i32
    %c0_i32_1 = arith.constant 0 : i32
    return %arg0, %c0_i32, %c0_i32_0 : i32, i32, i32
  }
}

module attributes {stable_mosaic.version = 11 : i64} {
  func.func @_pos_attn_small_kernel(%arg0: i32, %arg1: i32, %arg2: memref<1x128x128xbf16, #tpu.memory_space<vmem>>, %arg3: memref<1x256x128xbf16, #tpu.memory_space<vmem>>, %arg4: memref<32x32xbf16, #tpu.memory_space<vmem>>, %arg5: memref<1x32xf32, #tpu.memory_space<vmem>>, %arg6: memref<1x32x128xf32, #tpu.memory_space<vmem>>, %arg7: memref<1x32x128xf32, #tpu.memory_space<vmem>>) attributes {dimension_semantics = [#tpu.dimension_semantics<parallel>, #tpu.dimension_semantics<parallel>], iteration_bounds = array<i64: 2, 2>, scalar_prefetch = 0 : i64, scratch_operands = 0 : i64, tpu.core_type = #tpu.core_type<tc>, window_params = [{transform_indices = @transform_0, window_bounds = array<i64: 1, 128, 128>}, {transform_indices = @transform_1, window_bounds = array<i64: 1, 256, 128>}, {pipeline_mode = #tpu.pipeline_mode<synchronous>, transform_indices = @transform_2, window_bounds = array<i64: 32, 32>}, {pipeline_mode = #tpu.pipeline_mode<synchronous>, transform_indices = @transform_3, window_bounds = array<i64: 1, 32>}, {transform_indices = @transform_4, window_bounds = array<i64: 1, 32, 128>}, {transform_indices = @transform_5, window_bounds = array<i64: 1, 32, 128>}]} {
    %c0 = arith.constant 0 : index
    %c0_0 = arith.constant 0 : index
    %c0_1 = arith.constant 0 : index
    %0 = vector.load %arg2[%c0, %c0_0, %c0_1] : memref<1x128x128xbf16, #tpu.memory_space<vmem>>, vector<1x128x128xbf16>
    %1 = vector.shape_cast %0 : vector<1x128x128xbf16> to vector<128x128xbf16>
    %2 = vector.extract_strided_slice %1 {offsets = [0, 0], sizes = [128, 32], strides = [1, 1]} : vector<128x128xbf16> to vector<128x32xbf16>
    %c0_2 = arith.constant 0 : index
    %c0_3 = arith.constant 0 : index
    %c0_4 = arith.constant 0 : index
    %3 = vector.load %arg3[%c0_2, %c0_3, %c0_4] : memref<1x256x128xbf16, #tpu.memory_space<vmem>>, vector<1x256x128xbf16>
    %4 = vector.shape_cast %3 : vector<1x256x128xbf16> to vector<256x128xbf16>
    %5 = vector.extract_strided_slice %4 {offsets = [0, 32], sizes = [256, 32], strides = [1, 1]} : vector<256x128xbf16> to vector<256x32xbf16>
    %c0_5 = arith.constant 0 : index
    %c0_6 = arith.constant 0 : index
    %c0_7 = arith.constant 0 : index
    %6 = vector.load %arg3[%c0_5, %c0_6, %c0_7] : memref<1x256x128xbf16, #tpu.memory_space<vmem>>, vector<1x256x128xbf16>
    %7 = vector.shape_cast %6 : vector<1x256x128xbf16> to vector<256x128xbf16>
    %8 = vector.extract_strided_slice %7 {offsets = [0, 64], sizes = [256, 32], strides = [1, 1]} : vector<256x128xbf16> to vector<256x32xbf16>
    %cst = arith.constant dense<0.000000e+00> : vector<128x256xf32>
    %9 = tpu.matmul %2, %5, %cst {dimension_numbers = #tpu.dot_dimension_numbers<[1], [1], [0], [0], [0, 0, 1, 0], [], []>} : vector<128x32xbf16>, vector<256x32xbf16>, vector<128x256xf32> -> vector<128x256xf32>
    %cst_8 = arith.constant dense<0xFF800000> : vector<128xf32>
    %10 = vector.multi_reduction <maximumf>, %9, %cst_8 [1] : vector<128x256xf32> to vector<128xf32>
    %11 = vector.shape_cast %10 : vector<128xf32> to vector<128x1xf32>
    %12 = vector.broadcast %11 : vector<128x1xf32> to vector<128x256xf32>
    %13 = arith.subf %9, %12 : vector<128x256xf32>
    %14 = math.exp %13 : vector<128x256xf32>
    %cst_9 = arith.constant dense<0.000000e+00> : vector<128xf32>
    %15 = vector.multi_reduction <add>, %14, %cst_9 [1] : vector<128x256xf32> to vector<128xf32>
    %16 = vector.shape_cast %15 : vector<128xf32> to vector<128x1xf32>
    %17 = tpu.reciprocal %16 {approx = true} : vector<128x1xf32> -> vector<128x1xf32>
    %18 = vector.broadcast %17 : vector<128x1xf32> to vector<128x256xf32>
    %19 = arith.mulf %14, %18 : vector<128x256xf32>
    %20 = arith.truncf %19 : vector<128x256xf32> to vector<128x256xbf16>
    %cst_10 = arith.constant dense<0.000000e+00> : vector<128x32xf32>
    %21 = tpu.matmul %20, %8, %cst_10 {dimension_numbers = #tpu.dot_dimension_numbers<[1], [0], [0], [1], [0, 0, 1, 1], [], []>} : vector<128x256xbf16>, vector<256x32xbf16>, vector<128x32xf32> -> vector<128x32xf32>
    %22 = arith.truncf %21 : vector<128x32xf32> to vector<128x32xbf16>
    %c0_11 = arith.constant 0 : index
    %c0_12 = arith.constant 0 : index
    %23 = vector.load %arg4[%c0_11, %c0_12] : memref<32x32xbf16, #tpu.memory_space<vmem>>, vector<32x32xbf16>
    %cst_13 = arith.constant dense<0.000000e+00> : vector<128x32xf32>
    %24 = tpu.matmul %22, %23, %cst_13 {dimension_numbers = #tpu.dot_dimension_numbers<[1], [0], [0], [1], [0, 0, 1, 1], [], []>} : vector<128x32xbf16>, vector<32x32xbf16>, vector<128x32xf32> -> vector<128x32xf32>
    %c0_14 = arith.constant 0 : index
    %c0_15 = arith.constant 0 : index
    %25 = vector.load %arg5[%c0_14, %c0_15] : memref<1x32xf32, #tpu.memory_space<vmem>>, vector<1x32xf32>
    %26 = vector.broadcast %25 : vector<1x32xf32> to vector<128x32xf32>
    %27 = arith.addf %24, %26 : vector<128x32xf32>
    %28 = tpu.transpose %27, [1, 0] : vector<128x32xf32> -> vector<32x128xf32>
    %c0_16 = arith.constant 0 : index
    %c0_17 = arith.constant 0 : index
    %c0_18 = arith.constant 0 : index
    %29 = vector.load %arg6[%c0_16, %c0_17, %c0_18] : memref<1x32x128xf32, #tpu.memory_space<vmem>>, vector<1x32x128xf32>
    %30 = vector.shape_cast %29 : vector<1x32x128xf32> to vector<32x128xf32>
    %31 = arith.addf %28, %30 : vector<32x128xf32>
    %c0_19 = arith.constant 0 : index
    %c0_20 = arith.constant 0 : index
    %c0_21 = arith.constant 0 : index
    %32 = vector.load %arg7[%c0_19, %c0_20, %c0_21] : memref<1x32x128xf32, #tpu.memory_space<vmem>>, vector<1x32x128xf32>
    %33 = vector.shape_cast %32 : vector<1x32x128xf32> to vector<32x128xf32>
    %34 = vector.shape_cast %31 : vector<32x128xf32> to vector<1x32x128xf32>
    tpu.vector_store %arg7[%c0_19, %c0_20, %c0_21], %34 {strides = array<i32>} : memref<1x32x128xf32, #tpu.memory_space<vmem>>, vector<1x32x128xf32>,
    return
  }
  func.func @transform_0(%arg0: i32, %arg1: i32) -> (i32, i32, i32) {
    %c0_i32 = arith.constant 0 : i32
    %c0_i32_0 = arith.constant 0 : i32
    return %arg0, %arg1, %c0_i32 : i32, i32, i32
  }
  func.func @transform_1(%arg0: i32, %arg1: i32) -> (i32, i32, i32) {
    %c0_i32 = arith.constant 0 : i32
    %c0_i32_0 = arith.constant 0 : i32
    %c0_i32_1 = arith.constant 0 : i32
    return %arg0, %c0_i32, %c0_i32_0 : i32, i32, i32
  }
  func.func @transform_2(%arg0: i32, %arg1: i32) -> (i32, i32) {
    %c0_i32 = arith.constant 0 : i32
    %c0_i32_0 = arith.constant 0 : i32
    %c0_i32_1 = arith.constant 0 : i32
    return %c0_i32, %c0_i32_0 : i32, i32
  }
  func.func @transform_3(%arg0: i32, %arg1: i32) -> (i32, i32) {
    %c0_i32 = arith.constant 0 : i32
    %c0_i32_0 = arith.constant 0 : i32
    %c0_i32_1 = arith.constant 0 : i32
    return %c0_i32, %c0_i32_0 : i32, i32
  }
  func.func @transform_4(%arg0: i32, %arg1: i32) -> (i32, i32, i32) {
    %c0_i32 = arith.constant 0 : i32
    %c0_i32_0 = arith.constant 0 : i32
    return %arg0, %c0_i32, %arg1 : i32, i32, i32
  }
  func.func @transform_5(%arg0: i32, %arg1: i32) -> (i32, i32, i32) {
    %c0_i32 = arith.constant 0 : i32
    %c0_i32_0 = arith.constant 0 : i32
    return %arg0, %c0_i32, %arg1 : i32, i32, i32
  }
}

</mosaic_0001>

<bundles_post_ra>
// kernel: self_da_module.3
= control target key start
LH: loop header
LB: loop body
LE: loop exit
PB: predicated region body
PF: predicated region fallthrough
CT: control target
= control target key end

     0   :  { %s1859_s18 = smov 0   ;;  %s1861_s19 = smov 0   ;;  %s2439_s0 = inlined_call_operand.vmem [shape: bf16[2,256,128], index: 0, kind: input, shape index: {}, may-alias: {0,1}]   ;;  %s2440_s1 = inlined_call_operand.vmem [shape: bf16[2,256,128], index: 1, kind: input, shape index: {}, may-alias: {0,1}]   ;;  %s2441_s2 = inlined_call_operand.vmem [shape: bf16[32,32], index: 2, kind: input, shape index: {}]   ;;  %s2442_s3 = inlined_call_operand.vmem [shape: f32[1,32], index: 3, kind: input, shape index: {}]   ;;  %s2443_s4 = inlined_call_operand.vmem [shape: f32[2,32,256], index: 4, kind: input, shape index: {}]   ;;  %s2444_s5 = inlined_call_operand.vmem [shape: f32[2,32,256], index: 5, kind: output, shape index: {}]  }
   0x1   :  { %s1863_s20 = smov 0   ;;  %s1865_s21 = smov 0  }
   0x2   :  { %s1867_s22 = smov 0   ;;  %s1869_s23 = smov 0  }
   0x3   :  { %s1871_s24 = smov 0  }
   0x4 LB: > { %s24_s25 = sadd.s32 1, %s1817_s22  ;;  %s27_s26 = sadd.s32 1, %s1821_s23  ;;  %s1825_s24 = sphi %s1871_s24, %s15_s24   ;;  %s1821_s23 = sphi %s1869_s23, %s2451_s23   ;;  %s1817_s22 = sphi %s1867_s22, %s2450_s22   ;;  %s1813_s21 = sphi %s1865_s21, %s2449_s21   ;;  %s1809_s20 = sphi %s1863_s20, %s2448_s20   ;;  %s1805_s19 = sphi %s1861_s19, %s2447_s19   ;;  %s1801_s18 = sphi %s1859_s18, %s2446_s18  }
   0x5   : > { %p25_p0 = scmp.ge.s32.totalorder %s24_s25, 2  ;;  %s1417_s27 = sadd.s32 4294967295, %s1825_s24  }
   0x6   : > { %p139_p1 = scmp.ne.s32.totalorder %s1805_s19, %s1801_s18  ;;  %p140_p2 = scmp.eq.s32.totalorder %s1825_s24, 0 }
   0x7   : > { %s2453_s25 = smov (%p25_p0, %s24_s25), 0  ;;  %s2455_s26 = smov (!%p25_p0, %s27_s26), %s1821_s23 }
   0x8   : > { %p29_p3 = scmp.ge.s32.totalorder %s2455_s26, 2  ;;  %p171_p4 = scmp.eq.s32.totalorder %s1417_s27, 3 }
   0x9   : > { %s128_s28 = ssub.s32 %s1817_s22, %s2453_s25  ;;  %p141_p5 = por %p140_p2, %p139_p1 }
   0xa   : > { %s2457_s26 = smov (%p29_p3, %s2455_s26), 0  ;;  %p1907_p6 = por %p171_p4, %p139_p1 }
   0xb   : > { %s127_s30 = ssub.s32 %s1821_s23, %s2457_s26  ;;  %s132_s7 = sadd.s32 1, %s1805_s19 }
   0xc   : > { %s129_s6 = sor.u32 %s128_s28, %s127_s30  ;;  %p1420_p8 = scmp.ge.s32.totalorder %s1825_s24, 4 }
   0xd   : > { %p130_p7 = scmp.eq.s32.totalorder %s129_s6, 0 }
   0xe   : > { %199 = sbr.rel (%p1420_p8) target bundleno = 29 (0x1d), region = 24 }
   0xf   : > { %s1915_s8 = scalar_select %p130_p7, %s1805_s19, %s132_s7  }
  0x13   : > { %223 = sbr.rel (!%p141_p5) target bundleno = 29 (0x1d), region = 36  ;;  %s225_s9 = sand.u32 (%p141_p5), 1, %s1805_s19  }
  0x14   : > { %s1422_s10 = sshll.u32 (%p141_p5), %s1821_s23, 3  ;;  %s1421_s11 = sshll.u32 (%p141_p5), %s225_s9, 5 }
  0x15   : > { %s229_s12 = sadd.s32 (%p141_p5), %s1817_s22, %s1422_s10  ;;  %s227_s17 = scalar_lea.vmem (%p141_p5), [#allocation2], %s1421_s11 }
  0x16   : > { %s1423_s13 = sshll.u32 (%p141_p5), %s229_s12, 3 }
  0x17   : > { %s231_s16 = scalar_lea.vmem (%p141_p5), %s2443_s4, %s1423_s13 }
  0x18   : > { %v266_v0 = vld [vmem:[%s231_s16] sm:$0xff]  ;;  %v268_v1 = vld [vmem:[%s231_s16 + $0x10] sm:$0xff] }
  0x19   : > { %v270_v2 = vld [vmem:[%s231_s16 + $0x20] sm:$0xff]  ;;  %267 = vst [vmem:[%s227_s17] sm:$0xff] %v266_v0  ;;  %v272_v3 = vld [vmem:[%s231_s16 + $0x30] sm:$0xff] }
  0x1a   : > { %269 = vst [vmem:[%s227_s17 + $0x8] sm:$0xff] %v268_v1 }
  0x1b   : > { %271 = vst [vmem:[%s227_s17 + $0x10] sm:$0xff] %v270_v2 }
  0x1c   : > { %273 = vst [vmem:[%s227_s17 + $0x18] sm:$0xff] %v272_v3 }
  0x1d PF: > { %p1424_p9 = scmp.ge.s32.totalorder %s1825_s24, 1  ;;  %p278_p10 = scmp.lt.s32.totalorder %s1825_s24, 5 }
  0x1f   : > { %p279_p11 = pnand %p1424_p9, %p278_p10 }
  0x20   : > { %p326_p12 = scmp.lt.s32.totalorder (!%p279_p11), %s1813_s21, 1  ;;  %s1827_s9 = smov (!%p279_p11), 96  }
  0x21   : > { %282 = sbr.rel (%p279_p11) target bundleno = 1371 (0x55b), region = 74  ;;  %s1828_s10 = smov (!%p279_p11), 64  }
  0x22   : > { %s1427_s11 = sshll.u32 (!%p279_p11), %s1809_s20, 4 }
  0x23   : > { %p328_p13 = scmp.lt.s32.totalorder (!%p279_p11), %s1427_s11, 31 }
  0x26   : > { %s1928_s27 = scalar_select %p326_p12, %s1813_s21, 1  ;;  %vm541_vm0 = vcmask 261120  }
  0x27   : > { %s2459_s11 = smov (!%p328_p13, %s1427_s11), 31 }
  0x28   : > { %s1565_s28 = sshll.u32 %s1928_s27, 7  ;;  %s1428_s12 = sshll.u32 %s1928_s27, 5 }
  0x29   : > { %s1934_s7 = scalar_lea.vmem %s2440_s1, %s1565_s28  ;;  %s331_s13 = sadd.s32 %s1428_s12, %s2459_s11 }
  0x2a   : > { %v1581_v4 = vld [vmem:[%s1934_s7 + $0x38] sm:$0xff]  ;;  %v1580_v5 = vld [vmem:[%s1934_s7 + $0x30] sm:$0xff]  ;;  %v1579_v6 = vld [vmem:[%s1934_s7 + $0x28] sm:$0xff]  ;;  %s1429_s14 = sshll.u32 %s331_s13, 2 }
  0x2b   : > { %523 = vrot.lane.b32.xlu0 %v1581_v4, %s1827_s9  ;;  %521 = vrot.lane.b32.xlu1 %v1580_v5, %s1827_s9  ;;  %v1943_v7 = vld [vmem:[%s1934_s7 + $0x78] sm:$0xff]  ;;  %v1946_v8 = vld [vmem:[%s1934_s7 + $0x70] sm:$0xff]  ;;  %s333_s17 = scalar_lea.vmem %s2439_s0, %s1429_s14 }
  0x2c   : > { %519 = vrot.lane.b32.xlu2 %v1579_v6, %s1827_s9  ;;  %v1949_v9 = vld [vmem:[%s1934_s7 + $0x68] sm:$0xff]  ;;  %v1578_v10 = vld [vmem:[%s1934_s7 + $0x20] sm:$0xff]  ;;  %v1577_v12 = vld [vmem:[%s1934_s7 + $0x18] sm:$0xff] }
  0x2d   : > { %v1959_v11 = vld [vmem:[%s1934_s7 + $0x60] sm:$0xff]  ;;  %v1967_v13 = vld [vmem:[%s1934_s7 + $0x58] sm:$0xff]  ;;  %v1576_v14 = vld [vmem:[%s1934_s7 + $0x10] sm:$0xff] }
  0x2e   : > { %v1971_v15 = vld [vmem:[%s1934_s7 + $0x50] sm:$0xff]  ;;  %v1575_v16 = vld [vmem:[%s1934_s7 + $0x8] sm:$0xff]  ;;  %v1574_v18 = vld [vmem:[%s1934_s7] sm:$0xff] }
  0x2f   : > { %v1980_v17 = vld [vmem:[%s1934_s7 + $0x48] sm:$0xff]  ;;  %v1988_v19 = vld [vmem:[%s1934_s7 + $0x40] sm:$0xff]  ;;  %v1568_v54 = vld [vmem:[%s333_s17 + $0x10] sm:$0xff] }
  0x30   : > { %v1566_v51 = vld [vmem:[%s333_s17] sm:$0xff]  ;;  %v1567_v53 = vld [vmem:[%s333_s17 + $0x8] sm:$0xff]  ;;  %v1569_v55 = vld [vmem:[%s333_s17 + $0x18] sm:$0xff] }
  0x31   : > { %v1570_v56 = vld [vmem:[%s333_s17 + $0x20] sm:$0xff]  ;;  %v1571_v57 = vld [vmem:[%s333_s17 + $0x28] sm:$0xff]  ;;  %v1572_v58 = vld [vmem:[%s333_s17 + $0x30] sm:$0xff] }
  0x32   : > { %v1573_v60 = vld [vmem:[%s333_s17 + $0x38] sm:$0xff] }
  0x33   : > { %539 = vrot.lane.b32.xlu0 %v1943_v7, %s1827_s9  ;;  %537 = vrot.lane.b32.xlu1 %v1946_v8, %s1827_s9 }
  0x34   : > { %535 = vrot.lane.b32.xlu2 %v1949_v9, %s1827_s9 }
  0x3b   : > { %517 = vrot.lane.b32.xlu0 %v1578_v10, %s1827_s9  ;;  %533 = vrot.lane.b32.xlu1 %v1959_v11, %s1827_s9 }
  0x3c   : > { %515 = vrot.lane.b32.xlu2 %v1577_v12, %s1827_s9 }
  0x43   : > { %531 = vrot.lane.b32.xlu0 %v1967_v13, %s1827_s9  ;;  %513 = vrot.lane.b32.xlu1 %v1576_v14, %s1827_s9 }
  0x44   : > { %529 = vrot.lane.b32.xlu2 %v1971_v15, %s1827_s9 }
  0x4b   : > { %511 = vrot.lane.b32.xlu0 %v1575_v16, %s1827_s9  ;;  %527 = vrot.lane.b32.xlu1 %v1980_v17, %s1827_s9 }
  0x4c   : > { %509 = vrot.lane.b32.xlu2 %v1574_v18, %s1827_s9 }
  0x53   : > { %525 = vrot.lane.b32.xlu0 %v1988_v19, %s1827_s9  ;;  %980 = vrot.lane.b32.xlu1 %v1580_v5, %s1828_s10 }
  0x54   : > { %978 = vrot.lane.b32.xlu2 %v1579_v6, %s1828_s10 }
  0x5b   : > { %982 = vrot.lane.b32.xlu0 %v1581_v4, %s1828_s10  ;;  %970 = vrot.lane.b32.xlu1 %v1575_v16, %s1828_s10 }
  0x5c   : > { %974 = vrot.lane.b32.xlu2 %v1577_v12, %s1828_s10 }
  0x63   : > { %976 = vrot.lane.b32.xlu0 %v1578_v10, %s1828_s10 }
  0x64   : > { %968 = vrot.lane.b32.xlu2 %v1574_v18, %s1828_s10 }
  0x6b   : > { %972 = vrot.lane.b32.xlu0 %v1576_v14, %s1828_s10 }
  0x6c   : > { %998 = vrot.lane.b32.xlu2 %v1943_v7, %s1828_s10 }
  0x86   : > { %v520_v25 = vpop.permute.xlu2 %519 }
  0x87   : > { %v582_v28 = vsel %vm541_vm0, %v520_v25, 0 }
  0x8e   : > { %v536_v30 = vpop.permute.xlu2 %535 }
  0x8f   : > { %v606_v33 = vsel %vm541_vm0, %v536_v30, 0 }
  0x96   : > { %v516_v35 = vpop.permute.xlu2 %515 }
  0x97   : > { %v576_v36 = vsel %vm541_vm0, %v516_v35, 0 }
  0x9d   : > { %v524_v20 = vpop.permute.xlu0 %523  ;;  %v522_v22 = vpop.permute.xlu1 %521 }
  0x9e   : > { %v588_v21 = vsel %vm541_vm0, %v524_v20, 0  ;;  %v585_v23 = vsel %vm541_vm0, %v522_v22, 0  ;;  %v530_v42 = vpop.permute.xlu2 %529 }
  0x9f   : > { %614 = vmatpush.bf16.xpose.msra.mxu0 %v588_v21  ;;  %v597_v45 = vsel %vm541_vm0, %v530_v42, 0 }
  0xa5   : > { %v540_v24 = vpop.permute.xlu0 %539  ;;  %v538_v27 = vpop.permute.xlu1 %537 }
  0xa6   : > { %v612_v26 = vsel %vm541_vm0, %v540_v24, 0  ;;  %v609_v29 = vsel %vm541_vm0, %v538_v27, 0  ;;  %v510_v47 = vpop.permute.xlu2 %509 }
  0xa7   : > { %615 = vmatpush.bf16.xpose.msra.mxu0 %v585_v23  ;;  %663 = vmatpush.bf16.xpose.msra.mxu1 %v612_v26  ;;  %v567_v48 = vsel %vm541_vm0, %v510_v47, 0 }
  0xad   : > { %v518_v31 = vpop.permute.xlu0 %517  ;;  %v534_v34 = vpop.permute.xlu1 %533 }
  0xae   : > { %v579_v32 = vsel %vm541_vm0, %v518_v31, 0  ;;  %v603_v37 = vsel %vm541_vm0, %v534_v34, 0 }
  0xaf   : > { %616 = vmatpush.bf16.xpose.msra.mxu0 %v582_v28  ;;  %664 = vmatpush.bf16.xpose.msra.mxu1 %v609_v29 }
  0xb5   : > { %v532_v38 = vpop.permute.xlu0 %531  ;;  %v514_v39 = vpop.permute.xlu1 %513 }
  0xb6   : > { %v573_v40 = vsel %vm541_vm0, %v514_v39, 0  ;;  %v600_v41 = vsel %vm541_vm0, %v532_v38, 0 }
  0xb7   : > { %617 = vmatpush.bf16.xpose.msra.mxu0 %v579_v32  ;;  %665 = vmatpush.bf16.xpose.msra.mxu1 %v606_v33  ;;  %v979_v32 = vpop.permute.xlu2 %978 }
  0xbd   : > { %v512_v43 = vpop.permute.xlu0 %511  ;;  %v528_v46 = vpop.permute.xlu1 %527 }
  0xbe   : > { %v570_v44 = vsel %vm541_vm0, %v512_v43, 0  ;;  %v594_v49 = vsel %vm541_vm0, %v528_v46, 0 }
  0xbf   : > { %618 = vmatpush.bf16.xpose.msra.mxu0 %v576_v36  ;;  %666 = vmatpush.bf16.xpose.msra.mxu1 %v603_v37  ;;  %v975_v39 = vpop.permute.xlu2 %974 }
  0xc5   : > { %v526_v50 = vpop.permute.xlu0 %525  ;;  %v981_v29 = vpop.permute.xlu1 %980 }
  0xc6   : > { %v591_v52 = vsel %vm541_vm0, %v526_v50, 0 }
  0xc7   : > { %619 = vmatpush.bf16.xpose.msra.mxu0 %v573_v40  ;;  %667 = vmatpush.bf16.xpose.msra.mxu1 %v600_v41 }
  0xcd   : > { %v983_v28 = vpop.permute.xlu0 %982 }
  0xce   : > { %1593 = vmatpush.bf16.msra.mxu2 %v983_v28  ;;  %1594 = vmatpush.bf16.msra.mxu3 %v983_v28 }
  0xcf   : > { %620 = vmatpush.bf16.xpose.msra.mxu0 %v570_v44  ;;  %668 = vmatpush.bf16.xpose.msra.mxu1 %v597_v45  ;;  %v971_v44 = vpop.permute.xlu1 %970  ;;  %v969_v45 = vpop.permute.xlu2 %968 }
  0xd2   : > { %1596 = vmatpush.bf16.msra.mxu2 %v981_v29  ;;  %1597 = vmatpush.bf16.msra.mxu3 %v981_v29 }
  0xd5   : > { %v977_v35 = vpop.permute.xlu0 %976 }
  0xd6   : > { %1599 = vmatpush.bf16.msra.mxu2 %v979_v32  ;;  %1600 = vmatpush.bf16.msra.mxu3 %v979_v32 }
  0xd7   : > { %621 = vmatpush.bf16.xpose.msra.mxu0 %v567_v48  ;;  %669 = vmatpush.bf16.xpose.msra.mxu1 %v594_v49  ;;  %v999_v46 = vpop.permute.xlu2 %998 }
  0xda   : > { %1602 = vmatpush.bf16.msra.mxu2 %v977_v35  ;;  %1603 = vmatpush.bf16.msra.mxu3 %v977_v35 }
  0xdd   : > { %v973_v40 = vpop.permute.xlu0 %972 }
  0xde   : > { %1528 = vmatmul.msk.bf16.vlgmr.msra.gmra.mxu0 %vm541_vm0, %v1566_v51  ;;  %1605 = vmatpush.bf16.msra.mxu2 %v975_v39 }
  0xdf   : > { %670 = vmatpush.bf16.xpose.msra.mxu1 %v591_v52  ;;  %1016 = vmatpush.bf16.msrb.mxu0 %v983_v28 }
  0xe0   : > { %1606 = vmatpush.bf16.msra.mxu3 %v975_v39 }
  0xe2   : > { %1608 = vmatpush.bf16.msra.mxu2 %v973_v40 }
  0xe3   : > { %1017 = vmatpush.bf16.msrb.mxu0 %v981_v29 }
  0xe4   : > { %1609 = vmatpush.bf16.msra.mxu3 %v973_v40 }
  0xe6   : > { %1536 = vmatmul.msk.bf16.vlgmr.msra.gmra.mxu1 %vm541_vm0, %v1566_v51  ;;  %1611 = vmatpush.bf16.msra.mxu2 %v971_v44 }
  0xe7   : > { %1592 = vmatpush.bf16.msrb.mxu1 %v983_v28  ;;  %1018 = vmatpush.bf16.msrb.mxu0 %v979_v32 }
  0xe8   : > { %1612 = vmatpush.bf16.msra.mxu3 %v971_v44 }
  0xea   : > { %1614 = vmatpush.bf16.msra.mxu2 %v969_v45 }
  0xeb   : > { %1595 = vmatpush.bf16.msrb.mxu1 %v981_v29  ;;  %1019 = vmatpush.bf16.msrb.mxu0 %v977_v35 }
  0xec   : > { %1615 = vmatpush.bf16.msra.mxu3 %v969_v45 }
  0xee   : > { %1529 = vmatmul.msk.bf16.gmra.mxu0 %vm541_vm0, %v1567_v53 }
  0xef   : > { %1598 = vmatpush.bf16.msrb.mxu1 %v979_v32  ;;  %1020 = vmatpush.bf16.msrb.mxu0 %v975_v39 }
  0xf0   : > { %1065 = vmatpush.bf16.msrb.mxu3 %v999_v46 }
  0xf3   : > { %1601 = vmatpush.bf16.msrb.mxu1 %v977_v35  ;;  %1021 = vmatpush.bf16.msrb.mxu0 %v973_v40 }
  0xf6   : > { %1537 = vmatmul.msk.bf16.gmra.mxu1 %vm541_vm0, %v1567_v53 }
  0xf7   : > { %1604 = vmatpush.bf16.msrb.mxu1 %v975_v39  ;;  %1022 = vmatpush.bf16.msrb.mxu0 %v971_v44 }
  0xfb   : > { %1607 = vmatpush.bf16.msrb.mxu1 %v973_v40  ;;  %1023 = vmatpush.bf16.msrb.mxu0 %v969_v45 }
  0xfe   : > { %1530 = vmatmul.msk.bf16.gmra.mxu0 %vm541_vm0, %v1568_v54 }
  0xff   : > { %1610 = vmatpush.bf16.msrb.mxu1 %v971_v44 }
 0x103   : > { %1613 = vmatpush.bf16.msrb.mxu1 %v969_v45 }
 0x106   : > { %1538 = vmatmul.msk.bf16.gmra.mxu1 %vm541_vm0, %v1568_v54 }
 0x10e   : > { %1531 = vmatmul.msk.bf16.gmra.mxu0 %vm541_vm0, %v1569_v55 }
 0x116   : > { %1539 = vmatmul.msk.bf16.gmra.mxu1 %vm541_vm0, %v1569_v55 }
 0x11e   : > { %1532 = vmatmul.msk.bf16.gmra.mxu0 %vm541_vm0, %v1570_v56 }
 0x126   : > { %1540 = vmatmul.msk.bf16.gmra.mxu1 %vm541_vm0, %v1570_v56 }
 0x12e   : > { %1533 = vmatmul.msk.bf16.gmra.mxu0 %vm541_vm0, %v1571_v57 }
 0x136   : > { %1541 = vmatmul.msk.bf16.gmra.mxu1 %vm541_vm0, %v1571_v57 }
 0x13e   : > { %1534 = vmatmul.msk.bf16.gmra.mxu0 %vm541_vm0, %v1572_v58 }
 0x146   : > { %1542 = vmatmul.msk.bf16.gmra.mxu1 %vm541_vm0, %v1572_v58 }
 0x14e   : > { %1535 = vmatmul.msk.bf16.gmra.mxu0 %vm541_vm0, %v1573_v60 }
 0x156   : > { %1543 = vmatmul.msk.bf16.gmra.mxu1 %vm541_vm0, %v1573_v60 }
 0x15b   : > { %v2037_v59 = vpop.f32.mrf.mxu0 }
 0x163   : > { %v2041_v61 = vpop.f32.mrf.mxu0  ;;  %v2043_v62 = vpop.f32.mrf.mxu1 }
 0x164   : > { %v712_v63 = vmax.f32 %v2037_v59, %v2043_v62 }
 0x166   : > { %713 = vmax.xlane.f32.xlu1 %v712_v63 }
 0x16b   : > { %v2047_v0 = vpop.f32.mrf.mxu0  ;;  %v2049_v1 = vpop.f32.mrf.mxu1 }
 0x16c   : > { %v715_v2 = vmax.f32 %v2041_v61, %v2049_v1 }
 0x16e   : > { %716 = vmax.xlane.f32.xlu0 %v715_v2 }
 0x173   : > { %v2053_v3 = vpop.f32.mrf.mxu0  ;;  %v2055_v4 = vpop.f32.mrf.mxu1 }
 0x174   : > { %v718_v5 = vmax.f32 %v2047_v0, %v2055_v4 }
 0x176   : > { %719 = vmax.xlane.f32.xlu0 %v718_v5 }
 0x17b   : > { %v2059_v6 = vpop.f32.mrf.mxu0  ;;  %v2061_v7 = vpop.f32.mrf.mxu1 }
 0x17c   : > { %v721_v10 = vmax.f32 %v2053_v3, %v2061_v7 }
 0x17e   : > { %722 = vmax.xlane.f32.xlu1 %v721_v10 }
 0x183   : > { %v2065_v12 = vpop.f32.mrf.mxu0  ;;  %v2067_v14 = vpop.f32.mrf.mxu1 }
 0x184   : > { %v724_v16 = vmax.f32 %v2059_v6, %v2067_v14 }
 0x186   : > { %725 = vmax.xlane.f32.xlu0 %v724_v16 }
 0x18b   : > { %v2071_v18 = vpop.f32.mrf.mxu0  ;;  %v2073_v20 = vpop.f32.mrf.mxu1 }
 0x18c   : > { %v727_v21 = vmax.f32 %v2065_v12, %v2073_v20 }
 0x18e   : > { %728 = vmax.xlane.f32.xlu1 %v727_v21 }
 0x193   : > { %v2077_v22 = vpop.f32.mrf.mxu0  ;;  %v2079_v23 = vpop.f32.mrf.mxu1 }
 0x19b   : > { %v2081_v24 = vpop.f32.mrf.mxu0  ;;  %v2083_v25 = vpop.f32.mrf.mxu1 }
 0x1a3   : > { %v2085_v26 = vpop.f32.mrf.mxu1  ;;  %v2087_v27 = vpop.f32.mrf.mxu0 }
 0x1ab   : > { %v2089_v30 = vpop.f32.mrf.mxu1  ;;  %v2091_v31 = vpop.f32.mrf.mxu0 }
 0x1b3   : > { %v2093_v33 = vpop.f32.mrf.mxu1  ;;  %v2097_v36 = vpop.f32.mrf.mxu0 }
 0x1b4   : > { %v742_v34 = vmax.f32 %v2091_v31, %v2093_v33 }
 0x1b6   : > { %743 = vmax.xlane.f32.xlu1 %v742_v34 }
 0x1bb   : > { %v2099_v37 = vpop.f32.mrf.mxu1  ;;  %v2103_v41 = vpop.f32.mrf.mxu0 }
 0x1bc   : > { %v745_v38 = vmax.f32 %v2097_v36, %v2099_v37 }
 0x1be   : > { %746 = vmax.xlane.f32.xlu2 %v745_v38 }
 0x1c3   : > { %v2105_v42 = vpop.f32.mrf.mxu1  ;;  %v2117_v47 = vpop.f32.mrf.mxu0 }
 0x1c4   : > { %v748_v43 = vmax.f32 %v2103_v41, %v2105_v42 }
 0x1c6   : > { %749 = vmax.xlane.f32.xlu0 %v748_v43 }
 0x1cb   : > { %v2119_v49 = vpop.f32.mrf.mxu1  ;;  %v2125_v55 = vpop.f32.mrf.mxu0 }
 0x1cc   : > { %v751_v57 = vmax.f32 %v2117_v47, %v2119_v49 }
 0x1cf   : > { %994 = vrot.lane.b32.xlu1 %v1949_v9, %s1828_s10 }
 0x1d3   : > { %v2149_v10 = vpop.f32.mrf.mxu0 }
 0x1d6   : > { %992 = vrot.lane.b32.xlu2 %v1959_v11, %s1828_s10 }
 0x1d7   : > { %990 = vrot.lane.b32.xlu1 %v1967_v13, %s1828_s10 }
 0x1d9   : > { %v714_v48 = vpop.xlane.xlu1 %713 }
 0x1da   : > { %996 = vrot.lane.b32.xlu0 %v1946_v8, %s1828_s10  ;;  %v760_v50 = vsub.f32 %v2037_v59, %v714_v48  ;;  %v761_v9 = vsub.f32 %v2043_v62, %v714_v48  ;;  %v2127_v8 = vpop.f32.mrf.mxu1  ;;  %v730_v59 = vmax.f32 %v2071_v18, %v2079_v23  ;;  %v733_v62 = vmax.f32 %v2077_v22, %v2083_v25 }
 0x1db   : > { %v754_v58 = vmax.f32 %v2125_v55, %v2127_v8 }
 0x1dc   : > { %v792_v53 = vmul.f32 1.442695, %v760_v50  ;;  %v794_v54 = vmul.f32 1.442695, %v761_v9 }
 0x1de   : > { %1675 = vpow2.f32 %v792_v53 }
 0x1df   : > { %1677 = vpow2.f32 %v794_v54 }
 0x1e1   : > { %v717_v51 = vpop.xlane.xlu0 %716 }
 0x1e2   : > { %v762_v52 = vsub.f32 %v2041_v61, %v717_v51  ;;  %v763_v11 = vsub.f32 %v2049_v1, %v717_v51  ;;  %v2147_v5 = vpop.f32.mrf.mxu1 }
 0x1e3   : > { %v757_v21 = vmax.f32 %v2149_v10, %v2147_v5 }
 0x1e4   : > { %v796_v13 = vmul.f32 1.442695, %v762_v52  ;;  %v798_v56 = vmul.f32 1.442695, %v763_v11  ;;  %v2135_v60 = vpop.eup %1675 }
 0x1e5   : > { %v2137_v61 = vpop.eup %1677 }
 0x1e6   : > { %1679 = vpow2.f32 %v796_v13  ;;  %v856_v2 = vadd.f32 %v2137_v61, %v2135_v60 }
 0x1e7   : > { %1681 = vpow2.f32 %v798_v56 }
 0x1e9   : > { %v2159_v32 = vpop.xlane.xlu0 %719 }
 0x1ec   : > { %v2141_v63 = vpop.eup %1679 }
 0x1ed   : > { %v2143_v1 = vpop.eup %1681 }
 0x1ee   : > { %v859_v16 = vadd.f32 %v2143_v1, %v2141_v63 }
 0x1f1   : > { %v2155_v28 = vpop.xlane.xlu1 %722 }
 0x1f9   : > { %v2163_v43 = vpop.xlane.xlu0 %725 }
 0x1ff   : > { %752 = vmax.xlane.f32.xlu2 %v751_v57 }
 0x201   : > { %755 = vmax.xlane.f32.xlu1 %v754_v58  ;;  %v2157_v29 = vpop.xlane.xlu1 %728 }
 0x204   : > { %731 = vmax.xlane.f32.xlu0 %v730_v59 }
 0x207   : > { %734 = vmax.xlane.f32.xlu2 %v733_v62 }
 0x209   : > { %857 = vadd.xlane.f32.xlu1 %v856_v2 }
 0x20c   : > { %860 = vadd.xlane.f32.xlu0 %v859_v16 }
 0x20f   : > { %758 = vmax.xlane.f32.xlu2 %v757_v21 }
 0x229   : > { %v744_v34 = vpop.xlane.xlu1 %743 }
 0x22a   : > { %v780_v35 = vsub.f32 %v2091_v31, %v744_v34  ;;  %v781_v38 = vsub.f32 %v2093_v33, %v744_v34 }
 0x22c   : > { %v832_v39 = vmul.f32 1.442695, %v780_v35  ;;  %v834_v40 = vmul.f32 1.442695, %v781_v38 }
 0x22e   : > { %1683 = vpow2.f32 %v832_v39 }
 0x22f   : > { %1685 = vpow2.f32 %v834_v40 }
 0x231   : > { %v747_v44 = vpop.xlane.xlu2 %746 }
 0x232   : > { %v782_v45 = vsub.f32 %v2097_v36, %v747_v44  ;;  %v783_v46 = vsub.f32 %v2099_v37, %v747_v44 }
 0x234   : > { %v2167_v48 = vpop.eup %1683  ;;  %v836_v50 = vmul.f32 1.442695, %v782_v45  ;;  %v838_v51 = vmul.f32 1.442695, %v783_v46 }
 0x235   : > { %v2169_v9 = vpop.eup %1685 }
 0x236   : > { %1687 = vpow2.f32 %v836_v50  ;;  %v886_v31 = vadd.f32 %v2169_v9, %v2167_v48 }
 0x237   : > { %1689 = vpow2.f32 %v838_v51 }
 0x238   : > { %887 = vadd.xlane.f32.xlu2 %v886_v31 }
 0x239   : > { %v750_v33 = vpop.xlane.xlu0 %749  ;;  %v993_v59 = vpop.permute.xlu2 %992 }
 0x23a   : > { %v784_v52 = vsub.f32 %v2103_v41, %v750_v33  ;;  %v785_v53 = vsub.f32 %v2105_v42, %v750_v33 }
 0x23c   : > { %v2175_v36 = vpop.eup %1687  ;;  %v840_v37 = vmul.f32 1.442695, %v784_v52  ;;  %v842_v11 = vmul.f32 1.442695, %v785_v53 }
 0x23d   : > { %v2177_v54 = vpop.eup %1689 }
 0x23e   : > { %1691 = vpow2.f32 %v840_v37  ;;  %v889_v13 = vadd.f32 %v2177_v54, %v2175_v36 }
 0x23f   : > { %1693 = vpow2.f32 %v842_v11 }
 0x240   : > { %890 = vadd.xlane.f32.xlu1 %v889_v13 }
 0x241   : > { %v995_v58 = vpop.permute.xlu1 %994 }
 0x244   : > { %v2181_v56 = vpop.eup %1691 }
 0x245   : > { %v2183_v57 = vpop.eup %1693 }
 0x246   : > { %v892_v41 = vadd.f32 %v2183_v57, %v2181_v56 }
 0x248   : > { %893 = vadd.xlane.f32.xlu2 %v892_v41 }
 0x249   : > { %v991_v62 = vpop.permute.xlu1 %990 }
 0x24c   : > { %v997_v42 = vpop.permute.xlu0 %996 }
 0x24d   : > { %1066 = vmatpush.bf16.msrb.mxu3 %v997_v42 }
 0x251   : > { %1067 = vmatpush.bf16.msrb.mxu3 %v995_v58  ;;  %v771_v58 = vsub.f32 %v2073_v20, %v2157_v29 }
 0x255   : > { %1068 = vmatpush.bf16.msrb.mxu3 %v993_v59 }
 0x259   : > { %1069 = vmatpush.bf16.msrb.mxu3 %v991_v62 }
 0x260   : > { %988 = vrot.lane.b32.xlu2 %v1971_v15, %s1828_s10 }
 0x272   : > { %v753_v2 = vpop.xlane.xlu2 %752 }
 0x273   : > { %v786_v16 = vsub.f32 %v2117_v47, %v753_v2  ;;  %v787_v21 = vsub.f32 %v2119_v49, %v753_v2  ;;  %v766_v47 = vsub.f32 %v2053_v3, %v2155_v28 }
 0x274   : > { %v756_v34 = vpop.xlane.xlu1 %755 }
 0x275   : > { %v844_v35 = vmul.f32 1.442695, %v786_v16  ;;  %v846_v38 = vmul.f32 1.442695, %v787_v21  ;;  %v788_v39 = vsub.f32 %v2125_v55, %v756_v34  ;;  %v789_v40 = vsub.f32 %v2127_v8, %v756_v34 }
 0x276   : > { %v767_v55 = vsub.f32 %v2061_v7, %v2155_v28  ;;  %v804_v33 = vmul.f32 1.442695, %v766_v47  ;;  %v770_v7 = vsub.f32 %v2065_v12, %v2157_v29  ;;  %v814_v29 = vmul.f32 1.442695, %v771_v58 }
 0x277   : > { %1695 = vpow2.f32 %v844_v35  ;;  %v2193_v44 = vpop.xlane.xlu0 %731  ;;  %v848_v45 = vmul.f32 1.442695, %v788_v39  ;;  %v850_v46 = vmul.f32 1.442695, %v789_v40  ;;  %v739_v58 = vmax.f32 %v2087_v27, %v2089_v30 }
 0x278   : > { %1697 = vpow2.f32 %v846_v38  ;;  %v806_v53 = vmul.f32 1.442695, %v767_v55  ;;  %v812_v20 = vmul.f32 1.442695, %v770_v7 }
 0x279   : > { %1699 = vpow2.f32 %v848_v45 }
 0x27a   : > { %v735_v50 = vpop.xlane.xlu2 %734  ;;  %1701 = vpow2.f32 %v850_v46 }
 0x27b   : > { %v775_v38 = vsub.f32 %v2083_v25, %v735_v50 }
 0x27c   : > { %v858_v15 = vpop.xlane.xlu1 %857 }
 0x27d   : > { %v2195_v51 = vpop.eup %1695  ;;  %1703 = vrcp.f32 %v858_v15  ;;  %v822_v46 = vmul.f32 1.442695, %v775_v38 }
 0x27e   : > { %v2199_v49 = vpop.eup %1697 }
 0x27f   : > { %v861_v8 = vpop.xlane.xlu0 %860  ;;  %v895_v31 = vadd.f32 %v2199_v49, %v2195_v51  ;;  %v2205_v52 = vpop.eup %1699 }
 0x280   : > { %1705 = vrcp.f32 %v861_v8  ;;  %v2207_v11 = vpop.eup %1701 }
 0x281   : > { %896 = vadd.xlane.f32.xlu0 %v895_v31  ;;  %1707 = vpow2.f32 %v804_v33  ;;  %v898_v62 = vadd.f32 %v2207_v11, %v2205_v52 }
 0x282   : > { %v759_v37 = vpop.xlane.xlu2 %758  ;;  %1709 = vpow2.f32 %v806_v53 }
 0x283   : > { %v790_v3 = vsub.f32 %v2149_v10, %v759_v37  ;;  %v791_v13 = vsub.f32 %v2147_v5, %v759_v37  ;;  %v1704_v41 = vpop.eup %1703  ;;  %v736_v10 = vmax.f32 %v2081_v24, %v2085_v26  ;;  %v768_v37 = vsub.f32 %v2059_v6, %v2163_v43 }
 0x284   : > { %v920_v5 = vmul.f32 %v1704_v41, %v2135_v60  ;;  %v2222_v12 = vmul.f32 %v1704_v41, %v2137_v61  ;;  %v774_v61 = vsub.f32 %v2077_v22, %v735_v50  ;;  %v764_v6 = vsub.f32 %v2047_v0, %v2159_v32 }
 0x285   : > { %v852_v28 = vmul.f32 1.442695, %v790_v3  ;;  %v854_v42 = vmul.f32 1.442695, %v791_v13 }
 0x286   : > { %v1706_v59 = vpop.eup %1705  ;;  %v820_v45 = vmul.f32 1.442695, %v774_v61 }
 0x287   : > { %1711 = vpow2.f32 %v852_v28  ;;  %v922_v2 = vmul.f32 %v1706_v59, %v2141_v63  ;;  %v2225_v16 = vmul.f32 %v1706_v59, %v2143_v1  ;;  %v2229_v35 = vpop.eup %1707 }
 0x288   : > { %1713 = vpow2.f32 %v854_v42  ;;  %v2231_v60 = vpop.eup %1709  ;;  %v808_v42 = vmul.f32 1.442695, %v768_v37 }
 0x289   : > { %899 = vadd.xlane.f32.xlu0 %v898_v62  ;;  %737 = vmax.xlane.f32.xlu2 %v736_v10  ;;  %v952_v21 = vpack.c.bf16 %v922_v2, %v920_v5  ;;  %v953_v34 = vpack.c.bf16 %v2225_v16, %v2222_v12  ;;  %1715 = vpow2.f32 %v812_v20  ;;  %v865_v39 = vadd.f32 %v2231_v60, %v2229_v35 }
 0x28a   : > { %1717 = vpow2.f32 %v814_v29 }
 0x28b   : > { %1024 = vmatmul.bf16.vlgmr.msrb.gmra.mxu0 %v952_v21  ;;  %1719 = vpow2.f32 %v820_v45 }
 0x28c   : > { %1721 = vpow2.f32 %v822_v46 }
 0x28d   : > { %v2233_v63 = vpop.eup %1711 }
 0x28e   : > { %v2236_v1 = vpop.eup %1713 }
 0x28f   : > { %v901_v40 = vadd.f32 %v2236_v1, %v2233_v63  ;;  %v2243_v15 = vpop.eup %1715 }
 0x290   : > { %v2245_v47 = vpop.eup %1717 }
 0x291   : > { %866 = vadd.xlane.f32.xlu2 %v865_v39  ;;  %902 = vadd.xlane.f32.xlu1 %v901_v40  ;;  %v871_v22 = vadd.f32 %v2245_v47, %v2243_v15  ;;  %v2249_v25 = vpop.eup %1719 }
 0x292   : > { %v2251_v50 = vpop.eup %1721 }
 0x293   : > { %v877_v55 = vadd.f32 %v2251_v50, %v2249_v25 }
 0x299   : > { %872 = vadd.xlane.f32.xlu2 %v871_v22 }
 0x29d   : > { %986 = vrot.lane.b32.xlu0 %v1980_v17, %s1828_s10 }
 0x2a1   : > { %878 = vadd.xlane.f32.xlu2 %v877_v55 }
 0x2aa   : > { %984 = vrot.lane.b32.xlu1 %v1988_v19, %s1828_s10  ;;  %v769_v19 = vsub.f32 %v2067_v14, %v2163_v43  ;;  %v773_v14 = vsub.f32 %v2079_v23, %v2193_v44  ;;  %s285_s10 = sand.u32 1, %s1801_s18   ;;  %s1561_s18 = sshll.u32 (%p1907_p6), %s1813_s21, 3 }
 0x2ab   : > { %v888_v8 = vpop.xlane.xlu2 %887  ;;  %s1425_s11 = sshll.u32 %s285_s10, 5  ;;  %s1267_s14 = sadd.s32 (%p1907_p6), %s1809_s20, %s1561_s18 }
 0x2ac   : > { %1723 = vrcp.f32 %v888_v8  ;;  %v818_v0 = vmul.f32 1.442695, %v773_v14  ;;  %s287_s12 = scalar_lea.vmem [#allocation2], %s1425_s11  ;;  %s324_s13 = scalar_lea.vmem [#allocation3], %s1425_s11 }
 0x2ad   : > { %s1562_s15 = sshll.u32 (%p1907_p6), %s1267_s14, 3 }
 0x2ae   : > { %s1269_s27 = scalar_lea.vmem (%p1907_p6), %s2444_s5, %s1562_s15 }
 0x2b2   : > { %v1724_v33 = vpop.eup %1723 }
 0x2b3   : > { %v891_v31 = vpop.xlane.xlu1 %890  ;;  %v940_v3 = vmul.f32 %v1724_v33, %v2167_v48  ;;  %v2264_v13 = vmul.f32 %v1724_v33, %v2169_v9  ;;  %v810_v48 = vmul.f32 1.442695, %v769_v19  ;;  %v765_v9 = vsub.f32 %v2055_v4, %v2159_v32 }
 0x2b4   : > { %1725 = vrcp.f32 %v891_v31 }
 0x2b5   : > { %1727 = vpow2.f32 %v808_v42  ;;  %v802_v43 = vmul.f32 1.442695, %v765_v9 }
 0x2b6   : > { %1729 = vpow2.f32 %v810_v48 }
 0x2ba   : > { %v1726_v53 = vpop.eup %1725 }
 0x2bb   : > { %v942_v17 = vmul.f32 %v1726_v53, %v2175_v36  ;;  %v2267_v41 = vmul.f32 %v1726_v53, %v2177_v54  ;;  %v772_v36 = vsub.f32 %v2071_v18, %v2193_v44  ;;  %v800_v54 = vmul.f32 1.442695, %v764_v6  ;;  %v2283_v62 = vpop.eup %1727  ;;  %v894_v18 = vpop.xlane.xlu2 %893 }
 0x2bc   : > { %v2285_v4 = vpop.eup %1729 }
 0x2bd   : > { %v962_v7 = vpack.c.bf16 %v942_v17, %v940_v3  ;;  %v963_v28 = vpack.c.bf16 %v2267_v41, %v2264_v13  ;;  %v816_v59 = vmul.f32 1.442695, %v772_v36  ;;  %1731 = vpow2.f32 %v800_v54 }
 0x2be   : > { %1733 = vpow2.f32 %v802_v43  ;;  %v868_v32 = vadd.f32 %v2285_v4, %v2283_v62 }
 0x2bf   : > { %1049 = vmatmul.bf16.vlgmr.msra.gmra.mxu3 %v962_v7  ;;  %1735 = vpow2.f32 %v816_v59 }
 0x2c0   : > { %1737 = vpow2.f32 %v818_v0 }
 0x2c1   : > { %1739 = vrcp.f32 %v894_v18 }
 0x2c3   : > { %v2289_v23 = vpop.eup %1731  ;;  %v989_v20 = vpop.permute.xlu2 %988 }
 0x2c4   : > { %v2291_v44 = vpop.eup %1733  ;;  %1070 = vmatpush.bf16.msrb.mxu3 %v989_v20 }
 0x2c5   : > { %v2293_v10 = vpop.eup %1735  ;;  %v862_v2 = vadd.f32 %v2291_v44, %v2289_v23 }
 0x2c6   : > { %v2295_v5 = vpop.eup %1737 }
 0x2c7   : > { %740 = vmax.xlane.f32.xlu0 %v739_v58  ;;  %v874_v29 = vadd.f32 %v2295_v5, %v2293_v10  ;;  %v1740_v61 = vpop.eup %1739 }
 0x2c8   : > { %v944_v40 = vmul.f32 %v1740_v61, %v2181_v56  ;;  %v2304_v46 = vmul.f32 %v1740_v61, %v2183_v57 }
 0x2cf   : > { %869 = vadd.xlane.f32.xlu0 %v868_v32 }
 0x2d4   : > { %863 = vadd.xlane.f32.xlu1 %v862_v2 }
 0x2d7   : > { %875 = vadd.xlane.f32.xlu0 %v874_v29 }
 0x2f4   : > { %v897_v21 = vpop.xlane.xlu0 %896 }
 0x2f5   : > { %1741 = vrcp.f32 %v897_v21 }
 0x2fb   : > { %v1742_v38 = vpop.eup %1741 }
 0x2fc   : > { %v738_v39 = vpop.xlane.xlu2 %737  ;;  %v946_v45 = vmul.f32 %v1742_v38, %v2195_v51  ;;  %v2307_v22 = vmul.f32 %v1742_v38, %v2199_v49  ;;  %v900_v3 = vpop.xlane.xlu0 %899 }
 0x2fd   : > { %v776_v55 = vsub.f32 %v2081_v24, %v738_v39  ;;  %v777_v8 = vsub.f32 %v2085_v26, %v738_v39 }
 0x2fe   : > { %v964_v31 = vpack.c.bf16 %v946_v45, %v944_v40  ;;  %v965_v33 = vpack.c.bf16 %v2307_v22, %v2304_v46 }
 0x2ff   : > { %v824_v53 = vmul.f32 1.442695, %v776_v55  ;;  %v826_v37 = vmul.f32 1.442695, %v777_v8 }
 0x300   : > { %1054 = vmatmul.bf16.gmra.mxu3 %v964_v31 }
 0x301   : > { %1743 = vpow2.f32 %v824_v53 }
 0x302   : > { %1745 = vpow2.f32 %v826_v37 }
 0x303   : > { %1747 = vrcp.f32 %v900_v3 }
 0x304   : > { %v903_v56 = vpop.xlane.xlu1 %902 }
 0x305   : > { %1749 = vrcp.f32 %v903_v56 }
 0x307   : > { %v2313_v57 = vpop.eup %1743 }
 0x308   : > { %v2315_v51 = vpop.eup %1745 }
 0x309   : > { %v1748_v24 = vpop.eup %1747  ;;  %v880_v26 = vadd.f32 %v2315_v51, %v2313_v57 }
 0x30a   : > { %v948_v17 = vmul.f32 %v1748_v24, %v2205_v52  ;;  %v2322_v7 = vmul.f32 %v1748_v24, %v2207_v11  ;;  %v867_v52 = vpop.xlane.xlu2 %866 }
 0x30b   : > { %v1750_v49 = vpop.eup %1749  ;;  %881 = vadd.xlane.f32.xlu1 %v880_v26 }
 0x30c   : > { %v950_v19 = vmul.f32 %v1750_v49, %v2233_v63  ;;  %v2325_v42 = vmul.f32 %v1750_v49, %v2236_v1 }
 0x30e   : > { %v966_v6 = vpack.c.bf16 %v950_v19, %v948_v17  ;;  %v967_v48 = vpack.c.bf16 %v2325_v42, %v2322_v7  ;;  %v2383_v7 = vld [vmem:[%s2442_s3] ss:$0 sm:$0xff] }
 0x30f   : > { %v987_v9 = vpop.permute.xlu0 %986 }
 0x310   : > { %1059 = vmatmul.bf16.gmra.mxu3 %v966_v6 }
 0x311   : > { %1071 = vmatpush.bf16.msrb.mxu3 %v987_v9 }
 0x312   : > { %v873_v43 = vpop.xlane.xlu2 %872 }
 0x31a   : > { %v879_v21 = vpop.xlane.xlu2 %878 }
 0x31c   : > { %v985_v36 = vpop.permute.xlu1 %984 }
 0x31d   : > { %1072 = vmatpush.bf16.msrb.mxu3 %v985_v36 }
 0x320   : > { %1073 = vmatmul.bf16.vlgmr.msrb.gmra.mxu3 %v953_v34 }
 0x33a   : > { %v741_v63 = vpop.xlane.xlu0 %740 }
 0x33b   : > { %v778_v11 = vsub.f32 %v2087_v27, %v741_v63  ;;  %v779_v1 = vsub.f32 %v2089_v30, %v741_v63 }
 0x33d   : > { %v828_v54 = vmul.f32 1.442695, %v778_v11  ;;  %v830_v14 = vmul.f32 1.442695, %v779_v1 }
 0x33f   : > { %1751 = vpow2.f32 %v828_v54  ;;  %v1025_v54 = vpop.f32.mrf.mxu0 }
 0x340   : > { %1753 = vpow2.f32 %v830_v14 }
 0x341   : > { %1755 = vrcp.f32 %v873_v43 }
 0x342   : > { %v870_v58 = vpop.xlane.xlu0 %869  ;;  %v2346_v56 = vpop.f32.mrf.mxu3 }
 0x343   : > { %1757 = vrcp.f32 %v870_v58 }
 0x344   : > { %1759 = vrcp.f32 %v867_v52 }
 0x345   : > { %v1752_v59 = vpop.eup %1751 }
 0x346   : > { %v1754_v0 = vpop.eup %1753 }
 0x347   : > { %v1756_v18 = vpop.eup %1755  ;;  %v864_v12 = vpop.xlane.xlu1 %863  ;;  %v883_v16 = vadd.f32 %v1754_v0, %v1752_v59 }
 0x348   : > { %1761 = vrcp.f32 %v864_v12  ;;  %v930_v30 = vmul.f32 %v1756_v18, %v2243_v15  ;;  %v1027_v43 = vpop.f32.mrf.mxu0 }
 0x349   : > { %v1758_v34 = vpop.eup %1757  ;;  %884 = vadd.xlane.f32.xlu0 %v883_v16 }
 0x34a   : > { %v928_v27 = vmul.f32 %v1758_v34, %v2283_v62  ;;  %v1760_v32 = vpop.eup %1759  ;;  %v876_v2 = vpop.xlane.xlu0 %875 }
 0x34b   : > { %v926_v61 = vmul.f32 %v1760_v32, %v2229_v35  ;;  %1763 = vrcp.f32 %v876_v2  ;;  %v927_v40 = vmul.f32 %v1760_v32, %v2231_v60  ;;  %v929_v35 = vmul.f32 %v1758_v34, %v2285_v4  ;;  %v2348_v24 = vpop.f32.mrf.mxu3 }
 0x34c   : > { %v956_v20 = vpack.c.bf16 %v930_v30, %v928_v27  ;;  %1765 = vrcp.f32 %v879_v21 }
 0x34e   : > { %v1762_v29 = vpop.eup %1761  ;;  %1034 = vmatmul.bf16.vlgmr.msra.gmra.mxu2 %v956_v20 }
 0x34f   : > { %v924_v38 = vmul.f32 %v1762_v29, %v2289_v23  ;;  %v925_v39 = vmul.f32 %v1762_v29, %v2291_v44  ;;  %v931_v23 = vmul.f32 %v1756_v18, %v2245_v47  ;;  %v1591_v47 = vld [vmem:[%s2441_s2 + $0x8] sm:$0xff] }
 0x350   : > { %1172 = vmatpush.bf16.msrb.mxu2 %v1591_v47 }
 0x351   : > { %v954_v45 = vpack.c.bf16 %v926_v61, %v924_v38  ;;  %v955_v62 = vpack.c.bf16 %v927_v40, %v925_v39  ;;  %v1764_v15 = vpop.eup %1763  ;;  %v957_v44 = vpack.c.bf16 %v931_v23, %v929_v35 }
 0x352   : > { %v1766_v55 = vpop.eup %1765  ;;  %v932_v8 = vmul.f32 %v1764_v15, %v2293_v10  ;;  %v933_v60 = vmul.f32 %v1764_v15, %v2295_v5 }
 0x353   : > { %1029 = vmatmul.bf16.vlgmr.msrb.gmra.mxu1 %v954_v45  ;;  %1078 = vmatmul.bf16.gmra.mxu3 %v955_v62  ;;  %v934_v31 = vmul.f32 %v1766_v55, %v2249_v25  ;;  %v935_v37 = vmul.f32 %v1766_v55, %v2251_v50  ;;  %v1590_v50 = vld [vmem:[%s2441_s2] sm:$0xff] }
 0x354   : > { %1173 = vmatpush.bf16.msrb.mxu2 %v1590_v50 }
 0x355   : > { %v958_v53 = vpack.c.bf16 %v934_v31, %v932_v8  ;;  %v959_v3 = vpack.c.bf16 %v935_v37, %v933_v60 }
 0x35e   : > { %1039 = vmatmul.bf16.gmra.mxu2 %v958_v53 }
 0x363   : > { %1083 = vmatmul.bf16.gmra.mxu3 %v957_v44 }
 0x373   : > { %1088 = vmatmul.bf16.gmra.mxu3 %v959_v3 }
 0x37e   : > { %v882_v5 = vpop.xlane.xlu1 %881 }
 0x37f   : > { %1767 = vrcp.f32 %v882_v5 }
 0x383   : > { %v2350_v10 = vpop.f32.mrf.mxu3 }
 0x385   : > { %v1768_v17 = vpop.eup %1767 }
 0x386   : > { %v936_v9 = vmul.f32 %v1768_v17, %v2313_v57  ;;  %v937_v52 = vmul.f32 %v1768_v17, %v2315_v51 }
 0x38b   : > { %v2352_v25 = vpop.f32.mrf.mxu3 }
 0x393   : > { %v2357_v4 = vpop.f32.mrf.mxu3 }
 0x39b   : > { %v2362_v26 = vpop.f32.mrf.mxu3 }
 0x3a3   : > { %v1074_v6 = vpop.f32.mrf.mxu3 }
 0x3a4   : > { %v1075_v18 = vadd.f32 %v1074_v6, %v1025_v54 }
 0x3ab   : > { %v1076_v14 = vpop.f32.mrf.mxu3 }
 0x3ac   : > { %v1077_v58 = vadd.f32 %v1076_v14, %v1027_v43 }
 0x3ae   : > { %v1114_v12 = vpack.c.bf16 %v1077_v58, %v1075_v18 }
 0x3bc   : > { %v885_v49 = vpop.xlane.xlu0 %884 }
 0x3bd   : > { %1769 = vrcp.f32 %v885_v49 }
 0x3c3   : > { %v1770_v19 = vpop.eup %1769 }
 0x3c4   : > { %v938_v36 = vmul.f32 %v1770_v19, %v1752_v59  ;;  %v939_v63 = vmul.f32 %v1770_v19, %v1754_v0 }
 0x3c6   : > { %v960_v11 = vpack.c.bf16 %v938_v36, %v936_v9  ;;  %v961_v1 = vpack.c.bf16 %v939_v63, %v937_v52 }
 0x3c8   : > { %1044 = vmatmul.bf16.gmra.mxu2 %v960_v11  ;;  %1093 = vmatmul.bf16.gmra.mxu3 %v961_v1 }
 0x3d0   : > { %v1030_v34 = vpop.f32.mrf.mxu1 }
 0x3d1   : > { %v1035_v0 = vpop.f32.mrf.mxu2 }
 0x3d6   : > { %v1079_v16 = vpop.f32.mrf.mxu3 }
 0x3d7   : > { %v1080_v27 = vadd.f32 %v1079_v16, %v1030_v34 }
 0x3d8   : > { %1098 = vmatmul.bf16.gmra.mxu3 %v963_v28  ;;  %1552 = vmatmul.msk.bf16.vlgmr.msrb.gmra.mxu2 %vm541_vm0, %v1114_v12  ;;  %v1032_v51 = vpop.f32.mrf.mxu1 }
 0x3d9   : > { %v1037_v2 = vpop.f32.mrf.mxu2 }
 0x3de   : > { %v1081_v57 = vpop.f32.mrf.mxu3 }
 0x3df   : > { %v1082_v59 = vadd.f32 %v1081_v57, %v1032_v51 }
 0x3e1   : > { %v1115_v30 = vpack.c.bf16 %v1082_v59, %v1080_v27  ;;  %v1040_v21 = vpop.f32.mrf.mxu2 }
 0x3e6   : > { %v1084_v32 = vpop.f32.mrf.mxu3 }
 0x3e7   : > { %v1085_v13 = vadd.f32 %v1084_v32, %v1035_v0 }
 0x3e8   : > { %1103 = vmatmul.bf16.gmra.mxu3 %v965_v33  ;;  %1553 = vmatmul.msk.bf16.gmra.mxu2 %vm541_vm0, %v1115_v30 }
 0x3e9   : > { %v1042_v38 = vpop.f32.mrf.mxu2 }
 0x3ee   : > { %v1086_v20 = vpop.f32.mrf.mxu3 }
 0x3ef   : > { %v1087_v29 = vadd.f32 %v1086_v20, %v1037_v2 }
 0x3f1   : > { %v1116_v41 = vpack.c.bf16 %v1087_v29, %v1085_v13  ;;  %v1247_v13 = vld [vmem:[%s287_s12] sm:$0xff] }
 0x3f6   : > { %v1089_v28 = vpop.f32.mrf.mxu3 }
 0x3f7   : > { %v1090_v46 = vadd.f32 %v1089_v28, %v1040_v21  ;;  %v1248_v21 = vld [vmem:[%s287_s12 + $0x8] sm:$0xff] }
 0x3f8   : > { %1108 = vmatmul.bf16.gmra.mxu3 %v967_v48  ;;  %1554 = vmatmul.msk.bf16.gmra.mxu2 %vm541_vm0, %v1116_v41 }
 0x3fe   : > { %v1091_v61 = vpop.f32.mrf.mxu3 }
 0x3ff   : > { %v1092_v39 = vadd.f32 %v1091_v61, %v1042_v38 }
 0x401   : > { %v1117_v22 = vpack.c.bf16 %v1092_v39, %v1090_v46  ;;  %v1249_v39 = vld [vmem:[%s287_s12 + $0x10] sm:$0xff] }
 0x408   : > { %1555 = vmatmul.msk.bf16.gmra.mxu2 %vm541_vm0, %v1117_v22 }
 0x44b   : > { %v1045_v33 = vpop.f32.mrf.mxu2  ;;  %v1094_v40 = vpop.f32.mrf.mxu3 }
 0x44c   : > { %v1095_v15 = vadd.f32 %v1094_v40, %v1045_v33  ;;  %v1250_v33 = vld [vmem:[%s287_s12 + $0x18] sm:$0xff] }
 0x453   : > { %v1047_v45 = vpop.f32.mrf.mxu2  ;;  %v1096_v62 = vpop.f32.mrf.mxu3 }
 0x454   : > { %v1097_v55 = vadd.f32 %v1096_v62, %v1047_v45 }
 0x456   : > { %v1118_v8 = vpack.c.bf16 %v1097_v55, %v1095_v15 }
 0x458   : > { %1556 = vmatmul.msk.bf16.gmra.mxu2 %vm541_vm0, %v1118_v8 }
 0x45b   : > { %v1099_v42 = vpop.f32.mrf.mxu3  ;;  %v1175_v48 = vpop.f32.mrf.mxu2 }
 0x45c   : > { %v1176_v31 = vadd.f32 %v2383_v7, %v1175_v48  ;;  %v1100_v23 = vadd.f32 %v1099_v42, %v2346_v56 }
 0x45e   : > { %1215 = vxpose.xlu2.b32.start [1/16] (narrow) %v1176_v31, 32 }
 0x463   : > { %v1101_v53 = vpop.f32.mrf.mxu3  ;;  %v1177_v35 = vpop.f32.mrf.mxu2 }
 0x464   : > { %v1102_v44 = vadd.f32 %v1101_v53, %v2348_v24  ;;  %v1178_v60 = vadd.f32 %v2383_v7, %v1177_v35 }
 0x466   : > { %v1119_v37 = vpack.c.bf16 %v1102_v44, %v1100_v23  ;;  %1216 = vxpose.xlu2.b32.cont [2/16] (narrow) %v1178_v60, 32 }
 0x468   : > { %1557 = vmatmul.msk.bf16.gmra.mxu2 %vm541_vm0, %v1119_v37 }
 0x46b   : > { %v1104_v3 = vpop.f32.mrf.mxu3  ;;  %v1180_v47 = vpop.f32.mrf.mxu2 }
 0x46c   : > { %v1181_v50 = vadd.f32 %v2383_v7, %v1180_v47  ;;  %v1105_v17 = vadd.f32 %v1104_v3, %v2350_v10 }
 0x46e   : > { %1217 = vxpose.xlu2.b32.cont [3/16] (narrow) %v1181_v50, 32 }
 0x473   : > { %v1106_v5 = vpop.f32.mrf.mxu3  ;;  %v1182_v49 = vpop.f32.mrf.mxu2 }
 0x474   : > { %v1107_v19 = vadd.f32 %v1106_v5, %v2352_v25  ;;  %v1183_v56 = vadd.f32 %v2383_v7, %v1182_v49 }
 0x476   : > { %v1120_v24 = vpack.c.bf16 %v1107_v19, %v1105_v17  ;;  %1218 = vxpose.xlu2.b32.cont [4/16] (narrow) %v1183_v56, 32 }
 0x478   : > { %1558 = vmatmul.msk.bf16.gmra.mxu2 %vm541_vm0, %v1120_v24 }
 0x47b   : > { %v1109_v6 = vpop.f32.mrf.mxu3  ;;  %v1185_v9 = vpop.f32.mrf.mxu2 }
 0x47c   : > { %v1186_v36 = vadd.f32 %v2383_v7, %v1185_v9  ;;  %v1110_v11 = vadd.f32 %v1109_v6, %v2357_v4 }
 0x47e   : > { %1219 = vxpose.xlu2.b32.cont [5/16] (narrow) %v1186_v36, 32 }
 0x483   : > { %v1111_v52 = vpop.f32.mrf.mxu3  ;;  %v1187_v63 = vpop.f32.mrf.mxu2 }
 0x484   : > { %v1112_v1 = vadd.f32 %v1111_v52, %v2362_v26  ;;  %v1188_v10 = vadd.f32 %v2383_v7, %v1187_v63 }
 0x486   : > { %v1121_v25 = vpack.c.bf16 %v1112_v1, %v1110_v11  ;;  %1220 = vxpose.xlu2.b32.cont [6/16] (narrow) %v1188_v10, 32 }
 0x488   : > { %1559 = vmatmul.msk.bf16.gmra.mxu2 %vm541_vm0, %v1121_v25 }
 0x48b   : > { %v1190_v54 = vpop.f32.mrf.mxu2 }
 0x48c   : > { %v1191_v14 = vadd.f32 %v2383_v7, %v1190_v54 }
 0x48e   : > { %1221 = vxpose.xlu2.b32.cont [7/16] (narrow) %v1191_v14, 32 }
 0x493   : > { %v1192_v43 = vpop.f32.mrf.mxu2 }
 0x494   : > { %v1193_v58 = vadd.f32 %v2383_v7, %v1192_v43 }
 0x496   : > { %1222 = vxpose.xlu2.b32.cont [8/16] (narrow) %v1193_v58, 32 }
 0x4db   : > { %v1195_v18 = vpop.f32.mrf.mxu2 }
 0x4dc   : > { %v1196_v12 = vadd.f32 %v2383_v7, %v1195_v18 }
 0x4de   : > { %1223 = vxpose.xlu2.b32.cont [9/16] (narrow) %v1196_v12, 32 }
 0x4e3   : > { %v1197_v4 = vpop.f32.mrf.mxu2 }
 0x4e4   : > { %v1198_v26 = vadd.f32 %v2383_v7, %v1197_v4 }
 0x4e6   : > { %1224 = vxpose.xlu2.b32.cont [10/16] (narrow) %v1198_v26, 32 }
 0x4eb   : > { %v1200_v16 = vpop.f32.mrf.mxu2 }
 0x4ec   : > { %v1201_v34 = vadd.f32 %v2383_v7, %v1200_v16 }
 0x4ee   : > { %1225 = vxpose.xlu2.b32.cont [11/16] (narrow) %v1201_v34, 32 }
 0x4f3   : > { %v1202_v57 = vpop.f32.mrf.mxu2 }
 0x4f4   : > { %v1203_v51 = vadd.f32 %v2383_v7, %v1202_v57 }
 0x4f6   : > { %1226 = vxpose.xlu2.b32.cont [12/16] (narrow) %v1203_v51, 32 }
 0x4fb   : > { %v1205_v59 = vpop.f32.mrf.mxu2 }
 0x4fc   : > { %v1206_v0 = vadd.f32 %v2383_v7, %v1205_v59 }
 0x4fe   : > { %1227 = vxpose.xlu2.b32.cont [13/16] (narrow) %v1206_v0, 32 }
 0x503   : > { %v1207_v27 = vpop.f32.mrf.mxu2 }
 0x504   : > { %v1208_v30 = vadd.f32 %v2383_v7, %v1207_v27 }
 0x506   : > { %1228 = vxpose.xlu2.b32.cont [14/16] (narrow) %v1208_v30, 32 }
 0x50b   : > { %v1210_v32 = vpop.f32.mrf.mxu2 }
 0x50c   : > { %v1211_v2 = vadd.f32 %v2383_v7, %v1210_v32 }
 0x50e   : > { %1229 = vxpose.xlu2.b32.cont [15/16] (narrow) %v1211_v2, 32 }
 0x513   : > { %v1212_v20 = vpop.f32.mrf.mxu2 }
 0x514   : > { %v1213_v29 = vadd.f32 %v2383_v7, %v1212_v20 }
 0x516   : > { %1230 = vxpose.xlu2.b32.end [16/16] (narrow) %v1213_v29, 32 }
 0x537   : > { %v1231_v41 = vpop.trf.xlu2 }
 0x538   : > { %v1251_v28 = vadd.f32 %v1247_v13, %v1231_v41 }
 0x53a   : > { %1255 = vst [vmem:[%s324_s13] sm:$0xff] %v1251_v28 }
 0x53f   : > { %v1232_v61 = vpop.trf.xlu2 }
 0x540   : > { %v1252_v38 = vadd.f32 %v1248_v21, %v1232_v61 }
 0x541   : > { %v1304_v62 = vld [vmem:[%s324_s13] sm:$0xff] (%p1907_p6) }
 0x542   : > { %1256 = vst [vmem:[%s324_s13 + $0x8] sm:$0xff] %v1252_v38 }
 0x543   : > { %1305 = vst [vmem:[%s1269_s27] sm:$0xff] (%p1907_p6), %v1304_v62 }
 0x547   : > { %v1233_v46 = vpop.trf.xlu2 }
 0x548   : > { %v1253_v22 = vadd.f32 %v1249_v39, %v1233_v46 }
 0x549   : > { %v1306_v15 = vld [vmem:[%s324_s13 + $0x8] sm:$0xff] (%p1907_p6) }
 0x54a   : > { %1257 = vst [vmem:[%s324_s13 + $0x10] sm:$0xff] %v1253_v22 }
 0x54b   : > { %1307 = vst [vmem:[%s1269_s27 + $0x10] sm:$0xff] (%p1907_p6), %v1306_v15 }
 0x54e   : > { %1265 = sbr.rel (!%p1907_p6) target bundleno = 1371 (0x55b), region = 82 }
 0x54f   : > { %v1234_v40 = vpop.trf.xlu2 }
 0x550   : > { %v1254_v45 = vadd.f32 %v1250_v33, %v1234_v40 }
 0x551   : > { %v1308_v55 = vld [vmem:[%s324_s13 + $0x10] sm:$0xff] (%p1907_p6) }
 0x552   : > { %1258 = vst [vmem:[%s324_s13 + $0x18] sm:$0xff] %v1254_v45 }
 0x553   : > { %1309 = vst [vmem:[%s1269_s27 + $0x20] sm:$0xff] %v1308_v55 }
 0x559   : > { %v1310_v8 = vld [vmem:[%s324_s13 + $0x18] sm:$0xff] }
 0x55a   : > { %1311 = vst [vmem:[%s1269_s27 + $0x30] sm:$0xff] %v1310_v8 }
 0x55b PF: > { %s15_s24 = sadd.s32 1, %s1825_s24   ;;  %s2446_s18 = smov %s1805_s19 }
 0x55c   : > { %p12_p0 = scmp.ge.s32.totalorder %s15_s24, 6   ;;  %s2447_s19 = smov %s1915_s8 }
 0x55d   : > { %s2448_s20 = smov %s1817_s22  ;;  %s2449_s21 = smov %s1821_s23 }
 0x55e   : > { %s2450_s22 = smov %s2453_s25  ;;  %s2451_s23 = smov %s2457_s26 }
 0x55f   :  { %14 = sbr.rel (!%p12_p0) target bundleno = 4 (0x4), region = 157 }

// kernel: self_da_module.2
= control target key start
LH: loop header
LB: loop body
LE: loop exit
PB: predicated region body
PF: predicated region fallthrough
CT: control target
= control target key end

     0   :  { %s3248_s15 = smov 0   ;;  %s3961_s0 = inlined_call_operand.vmem [shape: f32[2,16,16,32], index: 0, kind: input, shape index: {}]   ;;  %s3962_s1 = inlined_call_operand.vmem [shape: bf16[288,128], index: 1, kind: input, shape index: {}]   ;;  %s3963_s2 = inlined_call_operand.vmem [shape: f32[1,128], index: 2, kind: input, shape index: {}]   ;;  %s3964_s3 = inlined_call_operand.vmem [shape: bf16[2,256,128], index: 3, kind: output, shape index: {0}]   ;;  %s3965_s4 = inlined_call_operand.vmem [shape: f32[2,32,256], index: 4, kind: output, shape index: {1}]  }
   0x1 LB: > { %s2933_s16 = sadd.s32 4294967295, %s3217_s15   ;;  %p2937_p0 = scmp.ge.s32.totalorder %s3217_s15, 1  ;;  %s3217_s15 = sphi %s3248_s15, %s15_s15  }
   0x2   : > { %p165_p1 = scmp.lt.s32.totalorder %s3217_s15, 3 }
   0x4   : > { %p166_p2 = pnand %p2937_p0, %p165_p1 }
   0x5   : > { %p196_p3 = scmp.lt.s32.totalorder (!%p166_p2), %s2933_s16, 1  ;;  %s3220_s21 = smov (!%p166_p2), 32  }
   0x6   : > { %169 = sbr.rel (%p166_p2) target bundleno = 1421 (0x58d), region = 32  ;;  %s3221_s22 = smov (!%p166_p2), 96  }
   0x7   : > { %s3222_s23 = smov (!%p166_p2), 64  }
   0xb   : > { %vm212_vm0 = vcmask 261120   ;;  %vm215_vm1 = vcmask 254976   ;;  %v3219_v0 = vmov 0.0   ;;  %s3967_s16 = smov (!%p196_p3, %s2933_s16), 1  ;;  %vm222_vm2 = vcmask 253952  }
   0xc   : > { %213 = vst.msk [vmem:[#allocation2] sm:$0xff] %vm212_vm0, %v3219_v0  ;;  %s3038_s17 = sshll.u32 %s3967_s16, 8  ;;  %vm1856_vm3 = vcmask 523264   ;;  %vm1889_vm4 = vcmask 785408  }
   0xd   : > { %214 = vst.msk [vmem:[#allocation2 + $0x8] sm:$0xff] %vm212_vm0, %v3219_v0  ;;  %s3270_s20 = scalar_lea.vmem %s3961_s0, %s3038_s17 }
   0xe   : > { %216 = vst.msk [vmem:[#allocation2 + $0x10] sm:$0x3] %vm215_vm1, %v3219_v0  ;;  %v255_v1 = vld [vmem:[%s3270_s20] sm:$0xff]  ;;  %v256_v2 = vld [vmem:[%s3270_s20 + $0x8] sm:$0xff]  ;;  %v257_v38 = vld [vmem:[%s3270_s20 + $0x10] sm:$0xff] }
   0xf   : > { %220 = vst.msk [vmem:[#allocation2 + $0x1a8] sm:$0x3] %vm215_vm1, %v3219_v0  ;;  %v258_v39 = vld [vmem:[%s3270_s20 + $0x18] sm:$0xff]  ;;  %v259_v40 = vld [vmem:[%s3270_s20 + $0x20] sm:$0xff]  ;;  %v260_v41 = vld [vmem:[%s3270_s20 + $0x28] sm:$0xff] }
  0x10   : > { %218 = vst.msk [vmem:[#allocation2 + $0x198] sm:$0xff] %vm212_vm0, %v3219_v0  ;;  %v261_v42 = vld [vmem:[%s3270_s20 + $0x30] sm:$0xff]  ;;  %v262_v43 = vld [vmem:[%s3270_s20 + $0x38] sm:$0xff]  ;;  %v263_v44 = vld [vmem:[%s3270_s20 + $0x40] sm:$0xff] }
  0x11   : > { %219 = vst.msk [vmem:[#allocation2 + $0x1a0] sm:$0xff] %vm212_vm0, %v3219_v0  ;;  %v264_v45 = vld [vmem:[%s3270_s20 + $0x48] sm:$0xff] }
  0x12   : > { %223 = vst.msk [vmem:[#allocation2 + $0x18] sm:$0x1] %vm222_vm2, %v3219_v0 }
  0x13   : > { %287 = vst.msk [vmem:[#allocation2 + $0x19] sm:$0xff] %vm212_vm0, %v255_v1 }
  0x14   : > { %v383_v3 = vld [vmem:[#allocation2 + $0x1] sm:$0xff]  ;;  %288 = vst.msk [vmem:[#allocation2 + $0x21] sm:$0xff] %vm212_vm0, %v256_v2 }
  0x15   : > { %v384_v4 = vld [vmem:[#allocation2 + $0x9] sm:$0xff]  ;;  %v415_v5 = vpack.c.bf16 %v383_v3, %v383_v3  ;;  %224 = vst.msk [vmem:[#allocation2 + $0x30] sm:$0x1] %vm222_vm2, %v3219_v0 }
  0x16   : > { %v447_v6 = vld [vmem:[#allocation2 + $0x2] sm:$0xff]  ;;  %v448_v7 = vld [vmem:[#allocation2 + $0xa] sm:$0xff]  ;;  %v416_v8 = vpack.c.bf16 %v384_v4, %v384_v4  ;;  %225 = vst.msk [vmem:[#allocation2 + $0x48] sm:$0x1] %vm222_vm2, %v3219_v0 }
  0x17   : > { %v1008_v9 = vunpack.c.l.b16 %v415_v5  ;;  %226 = vst.msk [vmem:[#allocation2 + $0x60] sm:$0x1] %vm222_vm2, %v3219_v0  ;;  %v479_v11 = vpack.c.bf16 %v447_v6, %v447_v6  ;;  %v480_v12 = vpack.c.bf16 %v448_v7, %v448_v7 }
  0x18   : > { %v1009_v10 = vunpack.c.l.b16 %v416_v8  ;;  %227 = vst.msk [vmem:[#allocation2 + $0x78] sm:$0x1] %vm222_vm2, %v3219_v0 }
  0x19   : > { %228 = vst.msk [vmem:[#allocation2 + $0x90] sm:$0x1] %vm222_vm2, %v3219_v0  ;;  %v1120_v18 = vunpack.c.l.b16 %v479_v11  ;;  %v1121_v19 = vunpack.c.l.b16 %v480_v12 }
  0x1a   : > { %v1040_v13 = vpack.c.b16 %v1009_v10, %v1008_v9  ;;  %v511_v14 = vld [vmem:[#allocation2 + $0x18] sm:$0xff]  ;;  %229 = vst.msk [vmem:[#allocation2 + $0xa8] sm:$0x1] %vm222_vm2, %v3219_v0 }
  0x1b   : > { %v512_v15 = vld [vmem:[#allocation2 + $0x20] sm:$0xff]  ;;  %v543_v16 = vpack.c.bf16 %v511_v14, %v511_v14  ;;  %230 = vst.msk [vmem:[#allocation2 + $0xc0] sm:$0x1] %vm222_vm2, %v3219_v0  ;;  %v1152_v25 = vpack.c.b16 %v1121_v19, %v1120_v18  ;;  %v266_v14 = vld [vmem:[%s3270_s20 + $0x58] sm:$0xff] }
  0x1c   : > { %1056 = vrot.lane.b32.xlu0 %v1040_v13, %s3220_s21  ;;  %v544_v17 = vpack.c.bf16 %v512_v15, %v512_v15  ;;  %231 = vst.msk [vmem:[#allocation2 + $0xd8] sm:$0x1] %vm222_vm2, %v3219_v0  ;;  %v385_v21 = vld [vmem:[#allocation2 + $0x19] sm:$0xff]  ;;  %v386_v22 = vld [vmem:[#allocation2 + $0x21] sm:$0xff]  ;;  %v265_v13 = vld [vmem:[%s3270_s20 + $0x50] sm:$0xff] }
  0x1d   : > { %v1232_v20 = vunpack.c.l.b16 %v543_v16  ;;  %232 = vst.msk [vmem:[#allocation2 + $0xf0] sm:$0x1] %vm222_vm2, %v3219_v0  ;;  %v417_v26 = vpack.c.bf16 %v385_v21, %v385_v21  ;;  %v418_v27 = vpack.c.bf16 %v386_v22, %v386_v22  ;;  %v639_v30 = vld [vmem:[#allocation2 + $0x1a] sm:$0xff] }
  0x1e   : > { %v1233_v23 = vunpack.c.l.b16 %v544_v17  ;;  %233 = vst.msk [vmem:[#allocation2 + $0x108] sm:$0x1] %vm222_vm2, %v3219_v0  ;;  %v671_v31 = vpack.c.bf16 %v639_v30, %v639_v30 }
  0x1f   : > { %234 = vst.msk [vmem:[#allocation2 + $0x120] sm:$0x1] %vm222_vm2, %v3219_v0  ;;  %v1010_v28 = vunpack.c.l.b16 %v417_v26  ;;  %v1011_v29 = vunpack.c.l.b16 %v418_v27 }
  0x20   : > { %v1264_v24 = vpack.c.b16 %v1233_v23, %v1232_v20  ;;  %235 = vst.msk [vmem:[#allocation2 + $0x138] sm:$0x1] %vm222_vm2, %v3219_v0  ;;  %v1424_v35 = vunpack.c.l.b16 %v671_v31 }
  0x21   : > { %236 = vst.msk [vmem:[#allocation2 + $0x150] sm:$0x1] %vm222_vm2, %v3219_v0  ;;  %v3323_v32 = vpack.c.b16 %v1011_v29, %v1010_v28 }
  0x22   : > { %1280 = vrot.lane.b32.xlu1 %v1264_v24, %s3221_s22  ;;  %237 = vst.msk [vmem:[#allocation2 + $0x168] sm:$0x1] %vm222_vm2, %v3219_v0 }
  0x23   : > { %238 = vst.msk [vmem:[#allocation2 + $0x180] sm:$0x1] %vm222_vm2, %v3219_v0 }
  0x24   : > { %239 = vst.msk [vmem:[#allocation2 + $0x29] sm:$0x1] %vm222_vm2, %v3219_v0  ;;  %1168 = vrot.lane.b32.xlu0 %v1152_v25, %s3222_s23 }
  0x25   : > { %240 = vst.msk [vmem:[#allocation2 + $0x41] sm:$0x1] %vm222_vm2, %v3219_v0 }
  0x26   : > { %241 = vst.msk [vmem:[#allocation2 + $0x59] sm:$0x1] %vm222_vm2, %v3219_v0 }
  0x27   : > { %242 = vst.msk [vmem:[#allocation2 + $0x71] sm:$0x1] %vm222_vm2, %v3219_v0 }
  0x28   : > { %243 = vst.msk [vmem:[#allocation2 + $0x89] sm:$0x1] %vm222_vm2, %v3219_v0 }
  0x29   : > { %244 = vst.msk [vmem:[#allocation2 + $0xa1] sm:$0x1] %vm222_vm2, %v3219_v0 }
  0x2a   : > { %245 = vst.msk [vmem:[#allocation2 + $0xb9] sm:$0x1] %vm222_vm2, %v3219_v0 }
  0x2b   : > { %246 = vst.msk [vmem:[#allocation2 + $0xd1] sm:$0x1] %vm222_vm2, %v3219_v0  ;;  %v640_v33 = vld [vmem:[#allocation2 + $0x22] sm:$0xff] }
  0x2c   : > { %247 = vst.msk [vmem:[#allocation2 + $0xe9] sm:$0x1] %vm222_vm2, %v3219_v0  ;;  %v672_v34 = vpack.c.bf16 %v640_v33, %v640_v33  ;;  %1058 = vrot.lane.b32.xlu0 %v3323_v32, %s3220_s21 }
  0x2d   : > { %248 = vst.msk [vmem:[#allocation2 + $0x101] sm:$0x1] %vm222_vm2, %v3219_v0 }
  0x2e   : > { %249 = vst.msk [vmem:[#allocation2 + $0x119] sm:$0x1] %vm222_vm2, %v3219_v0  ;;  %v1425_v36 = vunpack.c.l.b16 %v672_v34 }
  0x2f   : > { %250 = vst.msk [vmem:[#allocation2 + $0x131] sm:$0x1] %vm222_vm2, %v3219_v0 }
  0x30   : > { %251 = vst.msk [vmem:[#allocation2 + $0x149] sm:$0x1] %vm222_vm2, %v3219_v0  ;;  %v1456_v37 = vpack.c.b16 %v1425_v36, %v1424_v35 }
  0x31   : > { %252 = vst.msk [vmem:[#allocation2 + $0x161] sm:$0x1] %vm222_vm2, %v3219_v0 }
  0x32   : > { %253 = vst.msk [vmem:[#allocation2 + $0x179] sm:$0x1] %vm222_vm2, %v3219_v0  ;;  %1472 = vrot.lane.b32.xlu1 %v1456_v37, %s3220_s21 }
  0x33   : > { %254 = vst.msk [vmem:[#allocation2 + $0x191] sm:$0x1] %vm222_vm2, %v3219_v0 }
  0x34   : > { %289 = vst.msk [vmem:[#allocation2 + $0x31] sm:$0xff] %vm212_vm0, %v257_v38  ;;  %v268_v38 = vld [vmem:[%s3270_s20 + $0x68] sm:$0xff] }
  0x35   : > { %290 = vst.msk [vmem:[#allocation2 + $0x39] sm:$0xff] %vm212_vm0, %v258_v39 }
  0x36   : > { %291 = vst.msk [vmem:[#allocation2 + $0x49] sm:$0xff] %vm212_vm0, %v259_v40 }
  0x37   : > { %292 = vst.msk [vmem:[#allocation2 + $0x51] sm:$0xff] %vm212_vm0, %v260_v41 }
  0x38   : > { %293 = vst.msk [vmem:[#allocation2 + $0x61] sm:$0xff] %vm212_vm0, %v261_v42 }
  0x39   : > { %294 = vst.msk [vmem:[#allocation2 + $0x69] sm:$0xff] %vm212_vm0, %v262_v43 }
  0x3a   : > { %1170 = vrot.lane.b32.xlu1 %v1456_v37, %s3222_s23  ;;  %295 = vst.msk [vmem:[#allocation2 + $0x79] sm:$0xff] %vm212_vm0, %v263_v44  ;;  %v267_v37 = vld [vmem:[%s3270_s20 + $0x60] sm:$0xff] }
  0x3b   : > { %v704_v46 = vld [vmem:[#allocation2 + $0x30] sm:$0xff]  ;;  %296 = vst.msk [vmem:[#allocation2 + $0x81] sm:$0xff] %vm212_vm0, %v264_v45 }
  0x3c   : > { %v387_v47 = vld [vmem:[#allocation2 + $0x31] sm:$0xff]  ;;  %v642_v49 = vld [vmem:[#allocation2 + $0x3a] sm:$0xff]  ;;  %v736_v51 = vpack.c.bf16 %v704_v46, %v704_v46  ;;  %297 = vst.msk [vmem:[#allocation2 + $0x91] sm:$0xff] %vm212_vm0, %v265_v13 }
  0x3d   : > { %v641_v48 = vld [vmem:[#allocation2 + $0x32] sm:$0xff]  ;;  %v674_v53 = vpack.c.bf16 %v642_v49, %v642_v49  ;;  %v706_v54 = vld [vmem:[#allocation2 + $0x48] sm:$0xff]  ;;  %v419_v60 = vpack.c.bf16 %v387_v47, %v387_v47  ;;  %298 = vst.msk [vmem:[#allocation2 + $0x99] sm:$0xff] %vm212_vm0, %v266_v14 }
  0x3e   : > { %v705_v50 = vld [vmem:[#allocation2 + $0x38] sm:$0xff]  ;;  %v673_v52 = vpack.c.bf16 %v641_v48, %v641_v48  ;;  %v707_v57 = vld [vmem:[#allocation2 + $0x50] sm:$0xff]  ;;  %v738_v58 = vpack.c.bf16 %v706_v54, %v706_v54  ;;  %v1536_v59 = vunpack.c.l.b16 %v736_v51  ;;  %299 = vst.msk [vmem:[#allocation2 + $0xa9] sm:$0xff] %vm212_vm0, %v267_v37  ;;  %v272_v37 = vld [vmem:[%s3270_s20 + $0x88] sm:$0xff] }
  0x3f   : > { %v737_v55 = vpack.c.bf16 %v705_v50, %v705_v50  ;;  %v388_v56 = vld [vmem:[#allocation2 + $0x39] sm:$0xff]  ;;  %v1427_v63 = vunpack.c.l.b16 %v674_v53  ;;  %v739_v0 = vpack.c.bf16 %v707_v57, %v707_v57  ;;  %v1012_v7 = vunpack.c.l.b16 %v419_v60  ;;  %v643_v9 = vld [vmem:[#allocation2 + $0x4a] sm:$0xff]  ;;  %300 = vst.msk [vmem:[#allocation2 + $0xb1] sm:$0xff] %vm212_vm0, %v268_v38  ;;  %v391_v46 = vld [vmem:[#allocation2 + $0x61] sm:$0xff] }
  0x40   : > { %v420_v61 = vpack.c.bf16 %v388_v56, %v388_v56  ;;  %v1426_v62 = vunpack.c.l.b16 %v673_v52  ;;  %v1538_v2 = vunpack.c.l.b16 %v738_v58  ;;  %v644_v10 = vld [vmem:[#allocation2 + $0x52] sm:$0xff]  ;;  %v708_v11 = vld [vmem:[#allocation2 + $0x60] sm:$0xff]  ;;  %v709_v12 = vld [vmem:[#allocation2 + $0x68] sm:$0xff]  ;;  %v675_v16 = vpack.c.bf16 %v643_v9, %v643_v9  ;;  %304 = vst.msk [vmem:[#allocation2 + $0xe1] sm:$0xff] %vm212_vm0, %v272_v37 }
  0x41   : > { %v1537_v1 = vunpack.c.l.b16 %v737_v55  ;;  %v1539_v4 = vunpack.c.l.b16 %v739_v0  ;;  %v676_v17 = vpack.c.bf16 %v644_v10, %v644_v10  ;;  %v740_v18 = vpack.c.bf16 %v708_v11, %v708_v11  ;;  %v389_v22 = vld [vmem:[#allocation2 + $0x49] sm:$0xff]  ;;  %v390_v23 = vld [vmem:[#allocation2 + $0x51] sm:$0xff]  ;;  %v393_v10 = vld [vmem:[#allocation2 + $0x79] sm:$0xff] }
  0x42   : > { %v3367_v3 = vpack.c.b16 %v1427_v63, %v1426_v62  ;;  %v1013_v8 = vunpack.c.l.b16 %v420_v61  ;;  %v741_v19 = vpack.c.bf16 %v709_v12, %v709_v12  ;;  %v1428_v20 = vunpack.c.l.b16 %v675_v16  ;;  %v645_v33 = vld [vmem:[#allocation2 + $0x62] sm:$0xff]  ;;  %v646_v34 = vld [vmem:[#allocation2 + $0x6a] sm:$0xff]  ;;  %v710_v35 = vld [vmem:[#allocation2 + $0x78] sm:$0xff] }
  0x43   : > { %v1568_v5 = vpack.c.b16 %v1537_v1, %v1536_v59  ;;  %v1569_v6 = vpack.c.b16 %v1539_v4, %v1538_v2  ;;  %v1429_v21 = vunpack.c.l.b16 %v676_v17  ;;  %v1540_v24 = vunpack.c.l.b16 %v740_v18  ;;  %v711_v36 = vld [vmem:[#allocation2 + $0x80] sm:$0xff]  ;;  %v392_v47 = vld [vmem:[#allocation2 + $0x69] sm:$0xff]  ;;  %v3048_v56 = vld [vmem:[%s3962_s1 + $0x38] sm:$0xff] }
  0x44   : > { %1474 = vrot.lane.b32.xlu0 %v3367_v3, %s3220_s21  ;;  %v3375_v15 = vpack.c.b16 %v1013_v8, %v1012_v7  ;;  %v1541_v25 = vunpack.c.l.b16 %v741_v19  ;;  %v421_v27 = vpack.c.bf16 %v389_v22, %v389_v22  ;;  %v422_v28 = vpack.c.bf16 %v390_v23, %v390_v23  ;;  %v647_v57 = vld [vmem:[#allocation2 + $0x7a] sm:$0xff]  ;;  %v648_v58 = vld [vmem:[#allocation2 + $0x82] sm:$0xff]  ;;  %v712_v59 = vld [vmem:[#allocation2 + $0x90] sm:$0xff]  ;;  %2262 = vmatpush.bf16.msra.mxu0 %v3048_v56 }
  0x45   : > { %1584 = vrot.lane.b32.xlu2 %v1568_v5, %s3222_s23  ;;  %1586 = vrot.lane.b32.xlu1 %v1569_v6, %s3222_s23  ;;  %v3385_v26 = vpack.c.b16 %v1429_v21, %v1428_v20  ;;  %v677_v40 = vpack.c.bf16 %v645_v33, %v645_v33  ;;  %v678_v41 = vpack.c.bf16 %v646_v34, %v646_v34  ;;  %v3047_v60 = vld [vmem:[%s3962_s1 + $0x30] sm:$0xff]  ;;  %v3420_v61 = vld [vmem:[%s3962_s1 + $0x78] sm:$0xff]  ;;  %v394_v11 = vld [vmem:[#allocation2 + $0x81] sm:$0xff] }
  0x46   : > { %v3387_v29 = vpack.c.b16 %v1541_v25, %v1540_v24  ;;  %v1014_v30 = vunpack.c.l.b16 %v421_v27  ;;  %v1015_v31 = vunpack.c.l.b16 %v422_v28  ;;  %v742_v42 = vpack.c.bf16 %v710_v35, %v710_v35  ;;  %v713_v62 = vld [vmem:[#allocation2 + $0x98] sm:$0xff]  ;;  %v269_v63 = vld [vmem:[%s3270_s20 + $0x70] sm:$0xff]  ;;  %3154 = vmatpush.bf16.msra.mxu3 %v3048_v56  ;;  %2351 = vmatpush.bf16.msra.mxu1 %v3420_v61  ;;  %v3046_v9 = vld [vmem:[%s3962_s1 + $0x28] sm:$0xff] }
  0x47   : > { %v743_v43 = vpack.c.bf16 %v711_v36, %v711_v36  ;;  %v1430_v44 = vunpack.c.l.b16 %v677_v40  ;;  %v1431_v45 = vunpack.c.l.b16 %v678_v41  ;;  %v423_v51 = vpack.c.bf16 %v391_v46, %v391_v46  ;;  %v270_v0 = vld [vmem:[%s3270_s20 + $0x78] sm:$0xff]  ;;  %301 = vst.msk [vmem:[#allocation2 + $0xc1] sm:$0xff] %vm212_vm0, %v269_v63  ;;  %v3437_v14 = vld [vmem:[%s3962_s1 + $0x70] sm:$0xff]  ;;  %v3045_v16 = vld [vmem:[%s3962_s1 + $0x20] sm:$0xff] }
  0x48   : > { %v1043_v39 = vpack.c.b16 %v1015_v31, %v1014_v30  ;;  %v1542_v48 = vunpack.c.l.b16 %v742_v42  ;;  %v424_v52 = vpack.c.bf16 %v392_v47, %v392_v47  ;;  %v679_v2 = vpack.c.bf16 %v647_v57, %v647_v57  ;;  %302 = vst.msk [vmem:[#allocation2 + $0xc9] sm:$0xff] %vm212_vm0, %v270_v0  ;;  %2263 = vmatpush.bf16.msra.mxu0 %v3047_v60  ;;  %v3448_v20 = vld [vmem:[%s3962_s1 + $0x68] sm:$0xff]  ;;  %v3044_v24 = vld [vmem:[%s3962_s1 + $0x18] sm:$0xff]  ;;  %v3465_v28 = vld [vmem:[%s3962_s1 + $0x60] sm:$0xff] }
  0x49   : > { %v1543_v49 = vunpack.c.l.b16 %v743_v43  ;;  %v3402_v50 = vpack.c.b16 %v1431_v45, %v1430_v44  ;;  %v1016_v54 = vunpack.c.l.b16 %v423_v51  ;;  %v680_v4 = vpack.c.bf16 %v648_v58, %v648_v58  ;;  %v649_v25 = vld [vmem:[#allocation2 + $0x92] sm:$0xff]  ;;  %v650_v27 = vld [vmem:[#allocation2 + $0x9a] sm:$0xff]  ;;  %v714_v30 = vld [vmem:[#allocation2 + $0xa8] sm:$0xff] }
  0x4a   : > { %v1017_v55 = vunpack.c.l.b16 %v424_v52  ;;  %3155 = vmatpush.bf16.msra.mxu3 %v3047_v60  ;;  %v1432_v7 = vunpack.c.l.b16 %v679_v2  ;;  %v425_v18 = vpack.c.bf16 %v393_v10, %v393_v10  ;;  %v426_v19 = vpack.c.bf16 %v394_v11, %v394_v11  ;;  %2352 = vmatpush.bf16.msra.mxu1 %v3437_v14  ;;  %v715_v31 = vld [vmem:[#allocation2 + $0xb0] sm:$0xff]  ;;  %v271_v36 = vld [vmem:[%s3270_s20 + $0x80] sm:$0xff]  ;;  %v3476_v38 = vld [vmem:[%s3962_s1 + $0x58] sm:$0xff] }
  0x4b   : > { %v3404_v53 = vpack.c.b16 %v1543_v49, %v1542_v48  ;;  %v1433_v8 = vunpack.c.l.b16 %v680_v4  ;;  %v681_v34 = vpack.c.bf16 %v649_v25, %v649_v25  ;;  %v682_v35 = vpack.c.bf16 %v650_v27, %v650_v27  ;;  %303 = vst.msk [vmem:[#allocation2 + $0xd9] sm:$0xff] %vm212_vm0, %v271_v36  ;;  %v3042_v43 = vld [vmem:[%s3962_s1 + $0x8] sm:$0xff]  ;;  %v395_v45 = vld [vmem:[#allocation2 + $0x91] sm:$0xff]  ;;  %v396_v46 = vld [vmem:[#allocation2 + $0x99] sm:$0xff] }
  0x4c   : > { %1060 = vrot.lane.b32.xlu0 %v3375_v15, %s3220_s21  ;;  %v1044_v1 = vpack.c.b16 %v1017_v55, %v1016_v54  ;;  %2264 = vmatpush.bf16.msra.mxu0 %v3046_v9  ;;  %v1018_v22 = vunpack.c.l.b16 %v425_v18  ;;  %v1019_v23 = vunpack.c.l.b16 %v426_v19  ;;  %v747_v40 = vpack.c.bf16 %v715_v31, %v715_v31  ;;  %v3058_v44 = vld [vmem:[%s3962_s1 + $0x88] sm:$0xff]  ;;  %v3494_v49 = vld [vmem:[%s3962_s1 + $0x50] sm:$0xff]  ;;  %v3041_v51 = vld [vmem:[%s3962_s1] sm:$0xff] }
  0x4d   : > { %1696 = vrot.lane.b32.xlu2 %v3375_v15, %s3221_s22  ;;  %1172 = vrot.lane.b32.xlu1 %v3367_v3, %s3222_s23  ;;  %v3442_v17 = vpack.c.b16 %v1433_v8, %v1432_v7  ;;  %v1434_v41 = vunpack.c.l.b16 %v681_v34  ;;  %v1435_v42 = vunpack.c.l.b16 %v682_v35  ;;  %v3057_v52 = vld [vmem:[%s3962_s1 + $0x80] sm:$0xff]  ;;  %v427_v55 = vpack.c.bf16 %v395_v45, %v395_v45  ;;  %v3506_v57 = vld [vmem:[%s3962_s1 + $0x48] sm:$0xff]  ;;  %v652_v63 = vld [vmem:[#allocation2 + $0xb2] sm:$0xff] }
  0x4e   : > { %3156 = vmatpush.bf16.msra.mxu3 %v3046_v9  ;;  %2353 = vmatpush.bf16.msra.mxu1 %v3448_v20  ;;  %v1045_v33 = vpack.c.b16 %v1019_v23, %v1018_v22  ;;  %v1547_v48 = vunpack.c.l.b16 %v747_v40  ;;  %v428_v56 = vpack.c.bf16 %v396_v46, %v396_v46  ;;  %v716_v0 = vld [vmem:[#allocation2 + $0xc0] sm:$0xff]  ;;  %v273_v2 = vld [vmem:[%s3270_s20 + $0x90] sm:$0xff]  ;;  %v274_v4 = vld [vmem:[%s3270_s20 + $0x98] sm:$0xff]  ;;  %v684_v7 = vpack.c.bf16 %v652_v63, %v652_v63 }
  0x4f   : > { %2446 = vmatpush.bf16.msra.mxu2 %v3058_v44  ;;  %v1461_v54 = vpack.c.b16 %v1435_v42, %v1434_v41  ;;  %v320_v8 = vld [vmem:[#allocation2 + $0x8] sm:$0xff]  ;;  %305 = vst.msk [vmem:[#allocation2 + $0xf1] sm:$0xff] %vm212_vm0, %v273_v2  ;;  %v398_v18 = vld [vmem:[#allocation2 + $0xb1] sm:$0xff] }
  0x50   : > { %2265 = vmatpush.bf16.msra.mxu0 %v3045_v16  ;;  %v1021_v60 = vunpack.c.l.b16 %v428_v56  ;;  %306 = vst.msk [vmem:[#allocation2 + $0xf9] sm:$0xff] %vm212_vm0, %v274_v4  ;;  %v352_v10 = vpack.c.bf16 %v320_v8, %v320_v8  ;;  %v653_v34 = vld [vmem:[#allocation2 + $0xc2] sm:$0xff]  ;;  %v654_v35 = vld [vmem:[#allocation2 + $0xca] sm:$0xff] }
  0x51   : > { %v276_v40 = vld [vmem:[%s3270_s20 + $0xa8] sm:$0xff]  ;;  %v685_v44 = vpack.c.bf16 %v653_v34, %v653_v34 }
  0x52   : > { %3157 = vmatpush.bf16.msra.mxu3 %v3045_v16  ;;  %2354 = vmatpush.bf16.msra.mxu1 %v3465_v28  ;;  %v397_v16 = vld [vmem:[#allocation2 + $0xa9] sm:$0xff]  ;;  %v929_v23 = vunpack.c.l.b16 %v352_v10  ;;  %308 = vst.msk [vmem:[#allocation2 + $0x111] sm:$0xff] %vm212_vm0, %v276_v40  ;;  %v655_v8 = vld [vmem:[#allocation2 + $0xda] sm:$0xff] }
  0x53   : > { %2447 = vmatpush.bf16.msra.mxu2 %v3057_v52  ;;  %v429_v27 = vpack.c.bf16 %v397_v16, %v397_v16  ;;  %v322_v52 = vld [vmem:[#allocation2 + $0x20] sm:$0xff] }
  0x54   : > { %1476 = vrot.lane.b32.xlu0 %v3385_v26, %s3220_s21  ;;  %2266 = vmatpush.bf16.msra.mxu0 %v3044_v24 }
  0x55   : > { %1282 = vrot.lane.b32.xlu2 %v1568_v5, %s3221_s22  ;;  %1588 = vrot.lane.b32.xlu1 %v3387_v29, %s3222_s23  ;;  %v744_v5 = vpack.c.bf16 %v712_v59, %v712_v59  ;;  %v1020_v59 = vunpack.c.l.b16 %v427_v55  ;;  %v400_v55 = vld [vmem:[#allocation2 + $0xc9] sm:$0xff] }
  0x56   : > { %3158 = vmatpush.bf16.msra.mxu3 %v3044_v24  ;;  %2355 = vmatpush.bf16.msra.mxu1 %v3476_v38 }
  0x57   : > { %v1544_v12 = vunpack.c.l.b16 %v744_v5  ;;  %3016 = vmatmul.msk.bf16.vlgmr.msra.gmra.mxu2 %vm212_vm0, %v3367_v3  ;;  %v1046_v5 = vpack.c.b16 %v1021_v60, %v1020_v59  ;;  %v748_v3 = vpack.c.bf16 %v716_v0, %v716_v0 }
  0x59   : > { %v1548_v19 = vunpack.c.l.b16 %v748_v3 }
  0x5a   : > { %2356 = vmatpush.bf16.msra.mxu1 %v3494_v49 }
  0x5c   : > { %1062 = vrot.lane.b32.xlu0 %v1043_v39, %s3220_s21 }
  0x5d   : > { %1698 = vrot.lane.b32.xlu2 %v1043_v39, %s3221_s22  ;;  %1174 = vrot.lane.b32.xlu1 %v3385_v26, %s3222_s23  ;;  %v746_v39 = vpack.c.bf16 %v714_v30, %v714_v30 }
  0x5e   : > { %2357 = vmatpush.bf16.msra.mxu1 %v3506_v57 }
  0x5f   : > { %v1546_v47 = vunpack.c.l.b16 %v746_v39  ;;  %v719_v39 = vld [vmem:[#allocation2 + $0xe0] sm:$0xff] }
  0x60   : > { %v751_v46 = vpack.c.bf16 %v719_v39, %v719_v39 }
  0x61   : > { %v3508_v58 = vpack.c.b16 %v1547_v48, %v1546_v47  ;;  %v1438_v47 = vunpack.c.l.b16 %v685_v44 }
  0x64   : > { %1478 = vrot.lane.b32.xlu0 %v3402_v50, %s3220_s21 }
  0x65   : > { %1284 = vrot.lane.b32.xlu2 %v1569_v6, %s3221_s22  ;;  %1590 = vrot.lane.b32.xlu1 %v3404_v53, %s3222_s23  ;;  %v745_v6 = vpack.c.bf16 %v713_v62, %v713_v62  ;;  %v651_v62 = vld [vmem:[#allocation2 + $0xaa] sm:$0xff] }
  0x67   : > { %v1545_v13 = vunpack.c.l.b16 %v745_v6  ;;  %v683_v6 = vpack.c.bf16 %v651_v62, %v651_v62  ;;  %3017 = vmatmul.msk.bf16.gmra.mxu2 %vm212_vm0, %v3385_v26  ;;  %v354_v62 = vpack.c.bf16 %v322_v52, %v322_v52 }
  0x69   : > { %v3450_v21 = vpack.c.b16 %v1545_v13, %v1544_v12  ;;  %v1436_v12 = vunpack.c.l.b16 %v683_v6  ;;  %v1437_v13 = vunpack.c.l.b16 %v684_v7 }
  0x6b   : > { %v1462_v25 = vpack.c.b16 %v1437_v13, %v1436_v12  ;;  %v277_v12 = vld [vmem:[%s3270_s20 + $0xb0] sm:$0xff]  ;;  %v278_v13 = vld [vmem:[%s3270_s20 + $0xb8] sm:$0xff] }
  0x6c   : > { %1064 = vrot.lane.b32.xlu0 %v1044_v1, %s3220_s21  ;;  %309 = vst.msk [vmem:[#allocation2 + $0x121] sm:$0xff] %vm212_vm0, %v277_v12  ;;  %v840_v12 = vld [vmem:[#allocation2 + $0x92] sm:$0xff] }
  0x6d   : > { %1700 = vrot.lane.b32.xlu2 %v1044_v1, %s3221_s22  ;;  %1176 = vrot.lane.b32.xlu1 %v3402_v50, %s3222_s23  ;;  %v3522_v1 = vld [vmem:[%s3962_s1 + $0x40] sm:$0xff]  ;;  %310 = vst.msk [vmem:[#allocation2 + $0x129] sm:$0xff] %vm212_vm0, %v278_v13 }
  0x6e   : > { %2358 = vmatpush.bf16.msra.mxu1 %v3522_v1  ;;  %v841_v13 = vld [vmem:[#allocation2 + $0x9a] sm:$0xff] }
  0x74   : > { %1480 = vrot.lane.b32.xlu0 %v3442_v17, %s3220_s21 }
  0x75   : > { %1286 = vrot.lane.b32.xlu2 %v3387_v29, %s3221_s22  ;;  %1592 = vrot.lane.b32.xlu1 %v3450_v21, %s3222_s23  ;;  %v3043_v29 = vld [vmem:[%s3962_s1 + $0x10] sm:$0xff] }
  0x76   : > { %2267 = vmatpush.bf16.msra.mxu0 %v3043_v29  ;;  %3159 = vmatpush.bf16.msra.mxu3 %v3043_v29  ;;  %v430_v29 = vpack.c.bf16 %v398_v18, %v398_v18 }
  0x77   : > { %3018 = vmatmul.msk.bf16.gmra.mxu2 %vm212_vm0, %v3402_v50 }
  0x7a   : > { %2268 = vmatpush.bf16.msra.mxu0 %v3042_v43  ;;  %3160 = vmatpush.bf16.msra.mxu3 %v3042_v43 }
  0x7c   : > { %1066 = vrot.lane.b32.xlu0 %v1045_v33, %s3220_s21 }
  0x7d   : > { %1702 = vrot.lane.b32.xlu2 %v1045_v33, %s3221_s22  ;;  %1178 = vrot.lane.b32.xlu1 %v3442_v17, %s3222_s23  ;;  %v1023_v33 = vunpack.c.l.b16 %v430_v29  ;;  %v401_v29 = vld [vmem:[#allocation2 + $0xd9] sm:$0xff] }
  0x7e   : > { %2269 = vmatpush.bf16.msra.mxu0 %v3041_v51  ;;  %3161 = vmatpush.bf16.msra.mxu3 %v3041_v51  ;;  %v321_v51 = vld [vmem:[#allocation2 + $0x18] sm:$0xff] }
  0x7f   : > { %v353_v60 = vpack.c.bf16 %v321_v51, %v321_v51 }
  0x81   : > { %v930_v4 = vunpack.c.l.b16 %v353_v60 }
  0x82   : > { %3162 = vmatpush.bf16.msrb.mxu3 %v3420_v61  ;;  %v319_v61 = vld [vmem:[#allocation2] sm:$0xff] }
  0x83   : > { %v351_v11 = vpack.c.bf16 %v319_v61, %v319_v61  ;;  %v656_v61 = vld [vmem:[#allocation2 + $0xe2] sm:$0xff] }
  0x84   : > { %1482 = vrot.lane.b32.xlu0 %v1461_v54, %s3220_s21 }
  0x85   : > { %1288 = vrot.lane.b32.xlu2 %v3404_v53, %s3221_s22  ;;  %1594 = vrot.lane.b32.xlu1 %v3508_v58, %s3222_s23  ;;  %v717_v53 = vld [vmem:[#allocation2 + $0xc8] sm:$0xff]  ;;  %v928_v24 = vunpack.c.l.b16 %v351_v11 }
  0x86   : > { %3163 = vmatpush.bf16.msrb.mxu3 %v3437_v14  ;;  %v749_v9 = vpack.c.bf16 %v717_v53, %v717_v53  ;;  %v432_v53 = vpack.c.bf16 %v400_v55, %v400_v55 }
  0x87   : > { %v960_v31 = vpack.c.b16 %v929_v23, %v928_v24  ;;  %v688_v23 = vpack.c.bf16 %v656_v61, %v656_v61  ;;  %3019 = vmatmul.msk.bf16.gmra.mxu2 %vm212_vm0, %v3442_v17  ;;  %v403_v61 = vld [vmem:[#allocation2 + $0xf1] sm:$0xff] }
  0x88   : > { %v1549_v22 = vunpack.c.l.b16 %v749_v9  ;;  %v1025_v6 = vunpack.c.l.b16 %v432_v53  ;;  %v720_v9 = vld [vmem:[#allocation2 + $0xf0] sm:$0xff] }
  0x8a   : > { %3164 = vmatpush.bf16.msrb.mxu3 %v3448_v20  ;;  %v3535_v30 = vpack.c.b16 %v1549_v22, %v1548_v19  ;;  %v1022_v20 = vunpack.c.l.b16 %v429_v27  ;;  %v687_v22 = vpack.c.bf16 %v655_v8, %v655_v8 }
  0x8c   : > { %1068 = vrot.lane.b32.xlu0 %v1046_v5, %s3220_s21  ;;  %v1047_v41 = vpack.c.b16 %v1023_v33, %v1022_v20  ;;  %v1440_v24 = vunpack.c.l.b16 %v687_v22  ;;  %v873_v22 = vpack.c.bf16 %v841_v13, %v841_v13 }
  0x8d   : > { %1704 = vrot.lane.b32.xlu2 %v1046_v5, %s3221_s22  ;;  %1180 = vrot.lane.b32.xlu1 %v1461_v54, %s3222_s23  ;;  %v399_v54 = vld [vmem:[#allocation2 + $0xc1] sm:$0xff]  ;;  %v931_v5 = vunpack.c.l.b16 %v354_v62 }
  0x8e   : > { %v1057_v14 = vpop.permute.xlu0 %1056  ;;  %3165 = vmatpush.bf16.msrb.mxu3 %v3465_v28  ;;  %v718_v28 = vld [vmem:[#allocation2 + $0xd8] sm:$0xff]  ;;  %v431_v0 = vpack.c.bf16 %v399_v54, %v399_v54 }
  0x8f   : > { %v1810_v36 = vsel %vm212_vm0, %v960_v31, %v1057_v14  ;;  %v750_v26 = vpack.c.bf16 %v718_v28, %v718_v28  ;;  %v961_v11 = vpack.c.b16 %v931_v5, %v930_v4  ;;  %v402_v31 = vld [vmem:[#allocation2 + $0xe1] sm:$0xff]  ;;  %v281_v28 = vld [vmem:[%s3270_s20 + $0xd0] sm:$0xff] }
  0x90   : > { %313 = vst.msk [vmem:[#allocation2 + $0x151] sm:$0xff] %vm212_vm0, %v281_v28  ;;  %v434_v40 = vpack.c.bf16 %v402_v31, %v402_v31 }
  0x91   : > { %v1550_v59 = vunpack.c.l.b16 %v750_v26 }
  0x92   : > { %3166 = vmatpush.bf16.msrb.mxu3 %v3476_v38  ;;  %v686_v38 = vpack.c.bf16 %v654_v35, %v654_v35  ;;  %v1027_v26 = vunpack.c.l.b16 %v434_v40 }
  0x94   : > { %1484 = vrot.lane.b32.xlu0 %v1462_v25, %s3220_s21  ;;  %v1281_v42 = vpop.permute.xlu1 %1280  ;;  %v1439_v48 = vunpack.c.l.b16 %v686_v38 }
  0x95   : > { %1290 = vrot.lane.b32.xlu2 %v3450_v21, %s3221_s22  ;;  %1596 = vrot.lane.b32.xlu1 %v3535_v30, %s3222_s23  ;;  %v275_v21 = vld [vmem:[%s3270_s20 + $0xa0] sm:$0xff] }
  0x96   : > { %v1169_v37 = vpop.permute.xlu0 %1168  ;;  %307 = vst.msk [vmem:[#allocation2 + $0x109] sm:$0xff] %vm212_vm0, %v275_v21  ;;  %3167 = vmatpush.bf16.msrb.mxu3 %v3494_v49  ;;  %v1551_v49 = vunpack.c.l.b16 %v751_v46  ;;  %v1463_v63 = vpack.c.b16 %v1439_v48, %v1438_v47  ;;  %v433_v21 = vpack.c.bf16 %v401_v29, %v401_v29  ;;  %v657_v46 = vld [vmem:[#allocation2 + $0xf2] sm:$0xff]  ;;  %v658_v47 = vld [vmem:[#allocation2 + $0xfa] sm:$0xff] }
  0x97   : > { %v1858_v43 = vsel %vm1856_vm3, %v1810_v36, %v1169_v37  ;;  %v282_v37 = vld [vmem:[%s3270_s20 + $0xd8] sm:$0xff]  ;;  %v689_v62 = vpack.c.bf16 %v657_v46, %v657_v46  ;;  %v326_v29 = vld [vmem:[#allocation2 + $0x50] sm:$0xff]  ;;  %v724_v46 = vld [vmem:[#allocation2 + $0x120] sm:$0xff] }
  0x98   : > { %v1891_v45 = vsel %vm1889_vm4, %v1858_v43, %v1281_v42  ;;  %v3558_v2 = vpack.c.b16 %v1551_v49, %v1550_v59  ;;  %v324_v42 = vld [vmem:[#allocation2 + $0x38] sm:$0xff]  ;;  %314 = vst.msk [vmem:[#allocation2 + $0x159] sm:$0xff] %vm212_vm0, %v282_v37 }
  0x99   : > { %2270 = vmatmul.bf16.vlgmr.msra.gmra.mxu0 %v1891_v45  ;;  %v356_v38 = vpack.c.bf16 %v324_v42, %v324_v42  ;;  %v1026_v45 = vunpack.c.l.b16 %v433_v21  ;;  %v660_v21 = vld [vmem:[#allocation2 + $0x112] sm:$0xff] }
  0x9a   : > { %3168 = vmatpush.bf16.msrb.mxu3 %v3506_v57  ;;  %v1024_v57 = vunpack.c.l.b16 %v431_v0  ;;  %v580_v0 = vld [vmem:[#allocation2 + $0x51] sm:$0xff] }
  0x9b   : > { %v933_v55 = vunpack.c.l.b16 %v356_v38  ;;  %v1049_v60 = vpack.c.b16 %v1027_v26, %v1026_v45  ;;  %v692_v26 = vpack.c.bf16 %v660_v21, %v660_v21 }
  0x9c   : > { %1070 = vrot.lane.b32.xlu0 %v1047_v41, %s3220_s21  ;;  %v1048_v18 = vpack.c.b16 %v1025_v6, %v1024_v57 }
  0x9d   : > { %1706 = vrot.lane.b32.xlu2 %v1047_v41, %s3221_s22  ;;  %1182 = vrot.lane.b32.xlu1 %v1462_v25, %s3222_s23  ;;  %v1441_v25 = vunpack.c.l.b16 %v688_v23  ;;  %v323_v41 = vld [vmem:[#allocation2 + $0x30] sm:$0xff]  ;;  %v279_v23 = vld [vmem:[%s3270_s20 + $0xc0] sm:$0xff] }
  0x9e   : > { %3169 = vmatpush.bf16.msrb.mxu3 %v3522_v1  ;;  %v1059_v19 = vpop.permute.xlu0 %1058  ;;  %v355_v44 = vpack.c.bf16 %v323_v41, %v323_v41  ;;  %v723_v59 = vld [vmem:[#allocation2 + $0x110] sm:$0xff]  ;;  %311 = vst.msk [vmem:[#allocation2 + $0x139] sm:$0xff] %vm212_vm0, %v279_v23 }
  0x9f   : > { %v1585_v56 = vpop.permute.xlu2 %1584  ;;  %v1813_v14 = vsel %vm212_vm0, %v961_v11, %v1059_v19  ;;  %v1464_v39 = vpack.c.b16 %v1441_v25, %v1440_v24  ;;  %v755_v57 = vpack.c.bf16 %v723_v59, %v723_v59  ;;  %v872_v19 = vpack.c.bf16 %v840_v12, %v840_v12  ;;  %v659_v28 = vld [vmem:[#allocation2 + $0x10a] sm:$0xff] }
  0xa0   : > { %v932_v54 = vunpack.c.l.b16 %v355_v44  ;;  %v435_v24 = vpack.c.bf16 %v403_v61, %v403_v61  ;;  %v691_v44 = vpack.c.bf16 %v659_v28, %v659_v28 }
  0xa1   : > { %v1555_v11 = vunpack.c.l.b16 %v755_v57 }
  0xa2   : > { %v962_v6 = vpack.c.b16 %v933_v55, %v932_v54  ;;  %v1028_v41 = vunpack.c.l.b16 %v435_v24  ;;  %v725_v54 = vld [vmem:[#allocation2 + $0x128] sm:$0xff] }
  0xa3   : > { %v284_v55 = vld [vmem:[%s3270_s20 + $0xe8] sm:$0xff] }
  0xa4   : > { %1486 = vrot.lane.b32.xlu0 %v1463_v63, %s3220_s21  ;;  %v1473_v7 = vpop.permute.xlu1 %1472  ;;  %316 = vst.msk [vmem:[#allocation2 + $0x171] sm:$0xff] %vm212_vm0, %v284_v55 }
  0xa5   : > { %1292 = vrot.lane.b32.xlu2 %v3508_v58, %s3221_s22  ;;  %1598 = vrot.lane.b32.xlu1 %v3558_v2, %s3222_s23  ;;  %v1940_v1 = vsel %vm212_vm0, %v3323_v32, %v1473_v7  ;;  %v721_v58 = vld [vmem:[#allocation2 + $0xf8] sm:$0xff]  ;;  %v752_v32 = vpack.c.bf16 %v720_v9, %v720_v9  ;;  %v1442_v7 = vunpack.c.l.b16 %v689_v62  ;;  %v756_v62 = vpack.c.bf16 %v724_v46, %v724_v46 }
  0xa6   : > { %v1987_v10 = vsel %vm1856_vm3, %v1940_v1, %v1585_v56  ;;  %v753_v50 = vpack.c.bf16 %v721_v58, %v721_v58  ;;  %v722_v56 = vld [vmem:[#allocation2 + $0x108] sm:$0xff]  ;;  %v404_v1 = vld [vmem:[#allocation2 + $0xf9] sm:$0xff] }
  0xa7   : > { %v1697_v3 = vpop.permute.xlu2 %1696  ;;  %v1552_v34 = vunpack.c.l.b16 %v752_v32  ;;  %v754_v5 = vpack.c.bf16 %v722_v56, %v722_v56  ;;  %v280_v32 = vld [vmem:[%s3270_s20 + $0xc8] sm:$0xff]  ;;  %v436_v25 = vpack.c.bf16 %v404_v1, %v404_v1 }
  0xa8   : > { %v2019_v16 = vsel %vm1889_vm4, %v1987_v10, %v1697_v3  ;;  %v1553_v35 = vunpack.c.l.b16 %v753_v50  ;;  %312 = vst.msk [vmem:[#allocation2 + $0x141] sm:$0xff] %vm212_vm0, %v280_v32 }
  0xa9   : > { %2359 = vmatmul.bf16.vlgmr.msra.gmra.mxu1 %v2019_v16  ;;  %v1554_v10 = vunpack.c.l.b16 %v754_v5  ;;  %v1029_v42 = vunpack.c.l.b16 %v436_v25  ;;  %v327_v25 = vld [vmem:[#allocation2 + $0x60] sm:$0xff] }
  0xaa   : > { %v3585_v43 = vpack.c.b16 %v1553_v35, %v1552_v34 }
  0xab   : > { %v3608_v35 = vpack.c.b16 %v1555_v11, %v1554_v10  ;;  %v1050_v59 = vpack.c.b16 %v1029_v42, %v1028_v41  ;;  %v842_v11 = vld [vmem:[#allocation2 + $0xaa] sm:$0xff] }
  0xac   : > { %1072 = vrot.lane.b32.xlu0 %v1048_v18, %s3220_s21  ;;  %v1171_v27 = vpop.permute.xlu1 %1170 }
  0xad   : > { %1708 = vrot.lane.b32.xlu2 %v1048_v18, %s3221_s22  ;;  %1184 = vrot.lane.b32.xlu1 %v1463_v63, %s3222_s23  ;;  %v1860_v20 = vsel %vm1856_vm3, %v1813_v14, %v1171_v27  ;;  %v690_v63 = vpack.c.bf16 %v658_v47, %v658_v47  ;;  %v325_v27 = vld [vmem:[#allocation2 + $0x48] sm:$0xff]  ;;  %v283_v47 = vld [vmem:[%s3270_s20 + $0xe0] sm:$0xff] }
  0xae   : > { %v357_v37 = vpack.c.bf16 %v325_v27, %v325_v27  ;;  %315 = vst.msk [vmem:[#allocation2 + $0x169] sm:$0xff] %vm212_vm0, %v283_v47  ;;  %v328_v27 = vld [vmem:[#allocation2 + $0x68] sm:$0xff] }
  0xaf   : > { %v1283_v33 = vpop.permute.xlu2 %1282  ;;  %v1443_v8 = vunpack.c.l.b16 %v690_v63  ;;  %v360_v21 = vpack.c.bf16 %v328_v27, %v328_v27 }
  0xb0   : > { %v1894_v36 = vsel %vm1889_vm4, %v1860_v20, %v1283_v33  ;;  %v1768_v20 = vunpack.c.l.b16 %v872_v19  ;;  %v1769_v33 = vunpack.c.l.b16 %v873_v22  ;;  %v874_v19 = vpack.c.bf16 %v842_v11, %v842_v11  ;;  %v845_v11 = vld [vmem:[#allocation2 + $0xca] sm:$0xff] }
  0xb1   : > { %2275 = vmatmul.bf16.gmra.mxu0 %v1894_v36  ;;  %v1465_v14 = vpack.c.b16 %v1443_v8, %v1442_v7  ;;  %v787_v7 = vld [vmem:[#allocation2 + $0x111] sm:$0xff] }
  0xb2   : > { %v1796_v40 = vpack.c.b16 %v1769_v33, %v1768_v20  ;;  %v819_v24 = vpack.c.bf16 %v787_v7, %v787_v7 }
  0xb4   : > { %1488 = vrot.lane.b32.xlu0 %v1464_v39, %s3220_s21  ;;  %3020 = vmatmul.msk.bf16.gmra.mxu2 %vm212_vm0, %v1796_v40 }
  0xb5   : > { %1294 = vrot.lane.b32.xlu2 %v3535_v30, %s3221_s22  ;;  %1600 = vrot.lane.b32.xlu1 %v3585_v43, %s3222_s23  ;;  %v579_v30 = vld [vmem:[#allocation2 + $0x49] sm:$0xff] }
  0xb6   : > { %v1475_v48 = vpop.permute.xlu0 %1474  ;;  %v611_v17 = vpack.c.bf16 %v579_v30, %v579_v30  ;;  %v582_v30 = vld [vmem:[#allocation2 + $0x69] sm:$0xff] }
  0xb7   : > { %v1699_v51 = vpop.permute.xlu2 %1698  ;;  %v1943_v52 = vsel %vm212_vm0, %v3375_v15, %v1475_v48  ;;  %v1587_v49 = vpop.permute.xlu1 %1586  ;;  %v612_v15 = vpack.c.bf16 %v580_v0, %v580_v0  ;;  %v1445_v0 = vunpack.c.l.b16 %v692_v26  ;;  %v614_v57 = vpack.c.bf16 %v582_v30, %v582_v30  ;;  %v584_v26 = vld [vmem:[#allocation2 + $0x81] sm:$0xff] }
  0xb8   : > { %v1989_v53 = vsel %vm1856_vm3, %v1943_v52, %v1587_v49  ;;  %v1348_v58 = vunpack.c.l.b16 %v611_v17  ;;  %v411_v17 = vld [vmem:[#allocation2 + $0x151] sm:$0xff]  ;;  %v616_v30 = vpack.c.bf16 %v584_v26, %v584_v26 }
  0xb9   : > { %v2022_v4 = vsel %vm1889_vm4, %v1989_v53, %v1699_v51  ;;  %v1349_v18 = vunpack.c.l.b16 %v612_v15  ;;  %v934_v51 = vunpack.c.l.b16 %v357_v37  ;;  %v757_v53 = vpack.c.bf16 %v725_v54, %v725_v54  ;;  %v786_v15 = vld [vmem:[#allocation2 + $0x109] sm:$0xff] }
  0xba   : > { %2364 = vmatmul.bf16.gmra.mxu1 %v2022_v4  ;;  %v1351_v13 = vunpack.c.l.b16 %v614_v57  ;;  %v443_v32 = vpack.c.bf16 %v411_v17, %v411_v17  ;;  %v1353_v57 = vunpack.c.l.b16 %v616_v30  ;;  %v789_v17 = vld [vmem:[#allocation2 + $0x129] sm:$0xff] }
  0xbb   : > { %v1378_v36 = vpack.c.b16 %v1349_v18, %v1348_v58  ;;  %v843_v58 = vld [vmem:[#allocation2 + $0xb2] sm:$0xff]  ;;  %v476_v18 = vld [vmem:[#allocation2 + $0x15a] sm:$0xff] }
  0xbc   : > { %1074 = vrot.lane.b32.xlu0 %v1049_v60, %s3220_s21  ;;  %v875_v22 = vpack.c.bf16 %v843_v58, %v843_v58  ;;  %v1036_v41 = vunpack.c.l.b16 %v443_v32  ;;  %v330_v32 = vld [vmem:[#allocation2 + $0x80] sm:$0xff] }
  0xbd   : > { %1710 = vrot.lane.b32.xlu2 %v1049_v60, %s3221_s22  ;;  %1186 = vrot.lane.b32.xlu1 %v1464_v39, %s3222_s23  ;;  %v358_v39 = vpack.c.bf16 %v326_v29, %v326_v29  ;;  %v1444_v60 = vunpack.c.l.b16 %v691_v44 }
  0xbe   : > { %v1061_v3 = vpop.permute.xlu0 %1060  ;;  %v1771_v20 = vunpack.c.l.b16 %v875_v22 }
  0xbf   : > { %v1285_v9 = vpop.permute.xlu2 %1284  ;;  %v1816_v16 = vsel %vm212_vm0, %v962_v6, %v1061_v3  ;;  %v1173_v50 = vpop.permute.xlu1 %1172  ;;  %v935_v52 = vunpack.c.l.b16 %v358_v39  ;;  %v412_v6 = vld [vmem:[#allocation2 + $0x159] sm:$0xff]  ;;  %v3626_v1 = vpack.c.b16 %v1445_v0, %v1444_v60  ;;  %v1556_v3 = vunpack.c.l.b16 %v756_v62  ;;  %v661_v0 = vld [vmem:[#allocation2 + $0x122] sm:$0xff] }
  0xc0   : > { %v1862_v31 = vsel %vm1856_vm3, %v1816_v16, %v1173_v50  ;;  %v475_v16 = vld [vmem:[#allocation2 + $0x152] sm:$0xff]  ;;  %v444_v50 = vpack.c.bf16 %v412_v6, %v412_v6  ;;  %v359_v39 = vpack.c.bf16 %v327_v25, %v327_v25 }
  0xc1   : > { %v1897_v34 = vsel %vm1889_vm4, %v1862_v31, %v1285_v9  ;;  %v963_v5 = vpack.c.b16 %v935_v52, %v934_v51  ;;  %v1557_v9 = vunpack.c.l.b16 %v757_v53  ;;  %v1770_v31 = vunpack.c.l.b16 %v874_v19  ;;  %v662_v53 = vld [vmem:[#allocation2 + $0x12a] sm:$0xff]  ;;  %v726_v6 = vld [vmem:[#allocation2 + $0x138] sm:$0xff] }
  0xc2   : > { %2280 = vmatmul.bf16.gmra.mxu0 %v1897_v34  ;;  %v507_v28 = vpack.c.bf16 %v475_v16, %v475_v16  ;;  %v1037_v42 = vunpack.c.l.b16 %v444_v50  ;;  %v936_v54 = vunpack.c.l.b16 %v359_v39  ;;  %v285_v50 = vld [vmem:[%s3270_s20 + $0xf0] sm:$0xff]  ;;  %v362_v39 = vpack.c.bf16 %v330_v32, %v330_v32 }
  0xc3   : > { %v3631_v34 = vpack.c.b16 %v1557_v9, %v1556_v3  ;;  %v1797_v40 = vpack.c.b16 %v1771_v20, %v1770_v31  ;;  %v727_v3 = vld [vmem:[#allocation2 + $0x140] sm:$0xff]  ;;  %317 = vst.msk [vmem:[#allocation2 + $0x181] sm:$0xff] %vm212_vm0, %v285_v50 }
  0xc4   : > { %1490 = vrot.lane.b32.xlu0 %v1465_v14, %s3220_s21  ;;  %v3641_v55 = vpack.c.b16 %v1037_v42, %v1036_v41 }
  0xc5   : > { %1296 = vrot.lane.b32.xlu2 %v3558_v2, %s3221_s22  ;;  %1602 = vrot.lane.b32.xlu1 %v3608_v35, %s3222_s23  ;;  %v581_v2 = vld [vmem:[#allocation2 + $0x61] sm:$0xff] }
  0xc6   : > { %v1477_v38 = vpop.permute.xlu0 %1476  ;;  %v613_v4 = vpack.c.bf16 %v581_v2, %v581_v2  ;;  %3021 = vmatmul.msk.bf16.gmra.mxu2 %vm212_vm0, %v1797_v40  ;;  %v937_v2 = vunpack.c.l.b16 %v360_v21  ;;  %v413_v40 = vld [vmem:[#allocation2 + $0x169] sm:$0xff] }
  0xc7   : > { %v1701_v45 = vpop.permute.xlu2 %1700  ;;  %v1946_v48 = vsel %vm212_vm0, %v1378_v36, %v1477_v38  ;;  %v1589_v56 = vpop.permute.xlu1 %1588  ;;  %v508_v36 = vpack.c.bf16 %v476_v18, %v476_v18  ;;  %v1667_v38 = vunpack.c.l.b16 %v819_v24  ;;  %v877_v18 = vpack.c.bf16 %v845_v11, %v845_v11 }
  0xc8   : > { %v1991_v49 = vsel %vm1856_vm3, %v1946_v48, %v1589_v56  ;;  %v1350_v10 = vunpack.c.l.b16 %v613_v4  ;;  %v1148_v48 = vunpack.c.l.b16 %v507_v28  ;;  %v788_v4 = vld [vmem:[#allocation2 + $0x121] sm:$0xff]  ;;  %v759_v24 = vpack.c.bf16 %v727_v3, %v727_v3 }
  0xc9   : > { %v2025_v63 = vsel %vm1889_vm4, %v1991_v49, %v1701_v45  ;;  %v583_v45 = vld [vmem:[#allocation2 + $0x79] sm:$0xff]  ;;  %v1149_v51 = vunpack.c.l.b16 %v508_v36  ;;  %v820_v9 = vpack.c.bf16 %v788_v4, %v788_v4  ;;  %v1773_v27 = vunpack.c.l.b16 %v877_v18 }
  0xca   : > { %2369 = vmatmul.bf16.gmra.mxu1 %v2025_v63  ;;  %v1379_v37 = vpack.c.b16 %v1351_v13, %v1350_v10  ;;  %v964_v63 = vpack.c.b16 %v937_v2, %v936_v54  ;;  %v844_v10 = vld [vmem:[#allocation2 + $0xc2] sm:$0xff]  ;;  %v329_v13 = vld [vmem:[#allocation2 + $0x78] sm:$0xff]  ;;  %v1559_v42 = vunpack.c.l.b16 %v759_v24  ;;  %v477_v54 = vld [vmem:[#allocation2 + $0x16a] sm:$0xff] }
  0xcb   : > { %v3645_v62 = vpack.c.b16 %v1149_v51, %v1148_v48  ;;  %v876_v16 = vpack.c.bf16 %v844_v10, %v844_v10  ;;  %v361_v28 = vpack.c.bf16 %v329_v13, %v329_v13  ;;  %v1668_v36 = vunpack.c.l.b16 %v820_v9  ;;  %v478_v2 = vld [vmem:[#allocation2 + $0x172] sm:$0xff]  ;;  %v847_v13 = vld [vmem:[#allocation2 + $0xe2] sm:$0xff] }
  0xcc   : > { %1076 = vrot.lane.b32.xlu0 %v1050_v59, %s3220_s21  ;;  %v509_v4 = vpack.c.bf16 %v477_v54, %v477_v54  ;;  %v332_v24 = vld [vmem:[#allocation2 + $0x98] sm:$0xff] }
  0xcd   : > { %1712 = vrot.lane.b32.xlu2 %v1050_v59, %s3221_s22  ;;  %1188 = vrot.lane.b32.xlu1 %v1465_v14, %s3222_s23  ;;  %v818_v14 = vpack.c.bf16 %v786_v15, %v786_v15  ;;  %v615_v59 = vpack.c.bf16 %v583_v45, %v583_v45  ;;  %v1772_v25 = vunpack.c.l.b16 %v876_v16  ;;  %v540_v45 = vld [vmem:[#allocation2 + $0x170] sm:$0xff] }
  0xce   : > { %v1063_v8 = vpop.permute.xlu0 %1062  ;;  %v1150_v10 = vunpack.c.l.b16 %v509_v4 }
  0xcf   : > { %v1287_v61 = vpop.permute.xlu2 %1286  ;;  %v1819_v12 = vsel %vm212_vm0, %v963_v5, %v1063_v8  ;;  %v1175_v23 = vpop.permute.xlu1 %1174  ;;  %v1666_v44 = vunpack.c.l.b16 %v818_v14  ;;  %v1352_v5 = vunpack.c.l.b16 %v615_v59  ;;  %v693_v8 = vpack.c.bf16 %v661_v0, %v661_v0 }
  0xd0   : > { %v1864_v29 = vsel %vm1856_vm3, %v1819_v12, %v1175_v23  ;;  %v821_v12 = vpack.c.bf16 %v789_v17, %v789_v17  ;;  %v758_v23 = vpack.c.bf16 %v726_v6, %v726_v6  ;;  %v1798_v21 = vpack.c.b16 %v1773_v27, %v1772_v25 }
  0xd1   : > { %v1900_v33 = vsel %vm1889_vm4, %v1864_v29, %v1287_v61  ;;  %v1689_v56 = vpack.c.b16 %v1667_v38, %v1666_v44  ;;  %v694_v61 = vpack.c.bf16 %v662_v53, %v662_v53  ;;  %v1380_v22 = vpack.c.b16 %v1353_v57, %v1352_v5  ;;  %v286_v29 = vld [vmem:[%s3270_s20 + $0xf8] sm:$0xff]  ;;  %v539_v38 = vld [vmem:[#allocation2 + $0x168] sm:$0xff] }
  0xd2   : > { %2285 = vmatmul.bf16.gmra.mxu0 %v1900_v33  ;;  %v1446_v20 = vunpack.c.l.b16 %v693_v8  ;;  %318 = vst.msk [vmem:[#allocation2 + $0x189] sm:$0xff] %vm212_vm0, %v286_v29  ;;  %v1558_v41 = vunpack.c.l.b16 %v758_v23  ;;  %v414_v44 = vld [vmem:[#allocation2 + $0x171] sm:$0xff]  ;;  %v445_v59 = vpack.c.bf16 %v413_v40, %v413_v40  ;;  %v510_v5 = vpack.c.bf16 %v478_v2, %v478_v2  ;;  %v790_v40 = vld [vmem:[#allocation2 + $0x139] sm:$0xff] }
  0xd3   : > { %v1447_v33 = vunpack.c.l.b16 %v694_v61  ;;  %v446_v30 = vpack.c.bf16 %v414_v44, %v414_v44 }
  0xd4   : > { %1492 = vrot.lane.b32.xlu0 %v3626_v1, %s3220_s21  ;;  %v3671_v0 = vpack.c.b16 %v1559_v42, %v1558_v41  ;;  %v1151_v11 = vunpack.c.l.b16 %v510_v5  ;;  %v791_v41 = vld [vmem:[#allocation2 + $0x141] sm:$0xff] }
  0xd5   : > { %1298 = vrot.lane.b32.xlu2 %v3585_v43, %s3221_s22  ;;  %1604 = vrot.lane.b32.xlu1 %v3631_v34, %s3222_s23 }
  0xd6   : > { %v1479_v46 = vpop.permute.xlu0 %1478  ;;  %3022 = vmatmul.msk.bf16.gmra.mxu2 %vm212_vm0, %v1798_v21  ;;  %v664_v21 = vld [vmem:[#allocation2 + $0x142] sm:$0xff] }
  0xd7   : > { %v1703_v47 = vpop.permute.xlu2 %1702  ;;  %v1949_v52 = vsel %vm212_vm0, %v1379_v37, %v1479_v46  ;;  %v1591_v43 = vpop.permute.xlu1 %1590  ;;  %v1669_v37 = vunpack.c.l.b16 %v821_v12  ;;  %v846_v12 = vld [vmem:[#allocation2 + $0xda] sm:$0xff]  ;;  %v696_v2 = vpack.c.bf16 %v664_v21, %v664_v21 }
  0xd8   : > { %v1993_v49 = vsel %vm1856_vm3, %v1949_v52, %v1591_v43  ;;  %v939_v52 = vunpack.c.l.b16 %v362_v39  ;;  %v585_v43 = vld [vmem:[#allocation2 + $0x91] sm:$0xff]  ;;  %v663_v39 = vld [vmem:[#allocation2 + $0x13a] sm:$0xff] }
  0xd9   : > { %v2028_v60 = vsel %vm1889_vm4, %v1993_v49, %v1703_v47  ;;  %v3664_v47 = vpack.c.b16 %v1447_v33, %v1446_v20  ;;  %v3668_v51 = vpack.c.b16 %v1669_v37, %v1668_v36  ;;  %v571_v49 = vpack.c.bf16 %v539_v38, %v539_v38 }
  0xda   : > { %2374 = vmatmul.bf16.gmra.mxu1 %v2028_v60  ;;  %v586_v60 = vld [vmem:[#allocation2 + $0x99] sm:$0xff]  ;;  %v617_v57 = vpack.c.bf16 %v585_v43, %v585_v43  ;;  %v3687_v20 = vpack.c.b16 %v1151_v11, %v1150_v10  ;;  %v364_v36 = vpack.c.bf16 %v332_v24, %v332_v24  ;;  %v695_v54 = vpack.c.bf16 %v663_v39, %v663_v39  ;;  %v334_v24 = vld [vmem:[#allocation2 + $0xb0] sm:$0xff] }
  0xdb   : > { %v618_v6 = vpack.c.bf16 %v586_v60, %v586_v60  ;;  %v1260_v8 = vunpack.c.l.b16 %v571_v49  ;;  %v822_v43 = vpack.c.bf16 %v790_v40, %v790_v40  ;;  %v848_v11 = vld [vmem:[#allocation2 + $0xf2] sm:$0xff] }
  0xdc   : > { %1084 = vrot.lane.b32.xlu0 %v3641_v55, %s3220_s21  ;;  %v1448_v5 = vunpack.c.l.b16 %v695_v54  ;;  %v3723_v54 = vpop.f32.mrf.mxu2 }
  0xdd   : > { %1714 = vrot.lane.b32.xlu2 %v1689_v56, %s3221_s22  ;;  %1196 = vrot.lane.b32.xlu1 %v3645_v62, %s3222_s23  ;;  %v1355_v18 = vunpack.c.l.b16 %v618_v6 }
  0xde   : > { %v1065_v15 = vpop.permute.xlu0 %1064 }
  0xdf   : > { %v1289_v7 = vpop.permute.xlu2 %1288  ;;  %v1822_v58 = vsel %vm212_vm0, %v964_v63, %v1065_v15  ;;  %v1177_v19 = vpop.permute.xlu1 %1176  ;;  %v1038_v15 = vunpack.c.l.b16 %v445_v59  ;;  %v588_v59 = vld [vmem:[#allocation2 + $0xb1] sm:$0xff] }
  0xe0   : > { %v1866_v14 = vsel %vm1856_vm3, %v1822_v58, %v1177_v19  ;;  %v1354_v58 = vunpack.c.l.b16 %v617_v57  ;;  %v878_v19 = vpack.c.bf16 %v846_v12, %v846_v12  ;;  %v620_v4 = vpack.c.bf16 %v588_v59, %v588_v59 }
  0xe1   : > { %v1903_v31 = vsel %vm1889_vm4, %v1866_v14, %v1289_v7  ;;  %v1039_v7 = vunpack.c.l.b16 %v446_v30  ;;  %v331_v14 = vld [vmem:[#allocation2 + $0x90] sm:$0xff]  ;;  %v1449_v57 = vunpack.c.l.b16 %v696_v2 }
  0xe2   : > { %2290 = vmatmul.bf16.gmra.mxu0 %v1903_v31  ;;  %v1774_v27 = vunpack.c.l.b16 %v878_v19  ;;  %v1381_v33 = vpack.c.b16 %v1355_v18, %v1354_v58  ;;  %v849_v58 = vld [vmem:[#allocation2 + $0xfa] sm:$0xff]  ;;  %v1357_v12 = vunpack.c.l.b16 %v620_v4 }
  0xe3   : > { %v3681_v32 = vpack.c.b16 %v1039_v7, %v1038_v15  ;;  %v732_v15 = vld [vmem:[#allocation2 + $0x180] sm:$0xff]  ;;  %v733_v7 = vld [vmem:[#allocation2 + $0x188] sm:$0xff]  ;;  %v3706_v18 = vpack.c.b16 %v1449_v57, %v1448_v5 }
  0xe4   : > { %1078 = vrot.lane.b32.xlu0 %v1689_v56, %s3220_s21 }
  0xe5   : > { %1300 = vrot.lane.b32.xlu2 %v3608_v35, %s3221_s22  ;;  %1190 = vrot.lane.b32.xlu1 %v3626_v1, %s3222_s23  ;;  %v938_v35 = vunpack.c.l.b16 %v361_v28  ;;  %v572_v1 = vpack.c.bf16 %v540_v45, %v540_v45  ;;  %v363_v28 = vpack.c.bf16 %v331_v14, %v331_v14  ;;  %v333_v14 = vld [vmem:[#allocation2 + $0xa8] sm:$0xff] }
  0xe6   : > { %v1481_v26 = vpop.permute.xlu0 %1480 }
  0xe7   : > { %v1705_v46 = vpop.permute.xlu2 %1704  ;;  %v1952_v48 = vsel %vm212_vm0, %v1380_v22, %v1481_v26  ;;  %v1593_v56 = vpop.permute.xlu1 %1592  ;;  %v965_v17 = vpack.c.b16 %v939_v52, %v938_v35  ;;  %v1261_v61 = vunpack.c.l.b16 %v572_v1  ;;  %v879_v22 = vpack.c.bf16 %v847_v13, %v847_v13  ;;  %v587_v35 = vld [vmem:[#allocation2 + $0xa9] sm:$0xff] }
  0xe8   : > { %v1995_v63 = vsel %vm1856_vm3, %v1952_v48, %v1593_v56  ;;  %v940_v45 = vunpack.c.l.b16 %v363_v28  ;;  %v941_v26 = vunpack.c.l.b16 %v364_v36  ;;  %v729_v48 = vld [vmem:[#allocation2 + $0x158] sm:$0xff]  ;;  %v823_v56 = vpack.c.bf16 %v791_v41, %v791_v41 }
  0xe9   : > { %v2031_v53 = vsel %vm1889_vm4, %v1995_v63, %v1705_v46  ;;  %v3683_v50 = vpack.c.b16 %v1261_v61, %v1260_v8  ;;  %v1775_v29 = vunpack.c.l.b16 %v879_v22  ;;  %v728_v46 = vld [vmem:[#allocation2 + $0x150] sm:$0xff]  ;;  %v761_v60 = vpack.c.bf16 %v729_v48, %v729_v48 }
  0xea   : > { %2379 = vmatmul.bf16.gmra.mxu1 %v2031_v53  ;;  %v760_v1 = vpack.c.bf16 %v728_v46, %v728_v46  ;;  %v619_v63 = vpack.c.bf16 %v587_v35, %v587_v35  ;;  %v966_v53 = vpack.c.b16 %v941_v26, %v940_v45  ;;  %v1671_v6 = vunpack.c.l.b16 %v823_v56  ;;  %v589_v26 = vld [vmem:[#allocation2 + $0xc1] sm:$0xff]  ;;  %v590_v35 = vld [vmem:[#allocation2 + $0xc9] sm:$0xff] }
  0xeb   : > { %v1799_v37 = vpack.c.b16 %v1775_v29, %v1774_v27  ;;  %v881_v13 = vpack.c.bf16 %v849_v58, %v849_v58  ;;  %v764_v22 = vpack.c.bf16 %v732_v15, %v732_v15  ;;  %v365_v36 = vpack.c.bf16 %v333_v14, %v333_v14  ;;  %v336_v15 = vld [vmem:[#allocation2 + $0xc8] sm:$0xff] }
  0xec   : > { %1494 = vrot.lane.b32.xlu0 %v3664_v47, %s3220_s21  ;;  %v1356_v10 = vunpack.c.l.b16 %v619_v63  ;;  %v622_v59 = vpack.c.bf16 %v590_v35, %v590_v35  ;;  %v851_v63 = vld [vmem:[#allocation2 + $0x112] sm:$0xff] }
  0xed   : > { %1716 = vrot.lane.b32.xlu2 %v3668_v51, %s3221_s22  ;;  %1606 = vrot.lane.b32.xlu1 %v3671_v0, %s3222_s23  ;;  %v1777_v29 = vunpack.c.l.b16 %v881_v13  ;;  %v1564_v21 = vunpack.c.l.b16 %v764_v22  ;;  %v883_v57 = vpack.c.bf16 %v851_v63, %v851_v63  ;;  %v797_v13 = vld [vmem:[#allocation2 + $0x189] sm:$0xff] }
  0xee   : > { %v1067_v3 = vpop.permute.xlu0 %1066  ;;  %3023 = vmatmul.msk.bf16.gmra.mxu2 %vm212_vm0, %v1799_v37  ;;  %v1382_v28 = vpack.c.b16 %v1357_v12, %v1356_v10  ;;  %v366_v37 = vpack.c.bf16 %v334_v24, %v334_v24  ;;  %v1359_v4 = vunpack.c.l.b16 %v622_v59  ;;  %v670_v12 = vld [vmem:[#allocation2 + $0x18a] sm:$0xff] }
  0xef   : > { %v1291_v9 = vpop.permute.xlu2 %1290  ;;  %v1825_v16 = vsel %vm212_vm0, %v965_v17, %v1067_v3  ;;  %v1179_v23 = vpop.permute.xlu1 %1178  ;;  %v1670_v17 = vunpack.c.l.b16 %v822_v43  ;;  %v1560_v3 = vunpack.c.l.b16 %v760_v1  ;;  %v621_v43 = vpack.c.bf16 %v589_v26, %v589_v26 }
  0xf0   : > { %v1868_v25 = vsel %vm1856_vm3, %v1825_v16, %v1179_v23  ;;  %v765_v23 = vpack.c.bf16 %v733_v7, %v733_v7  ;;  %v943_v45 = vunpack.c.l.b16 %v366_v37  ;;  %v591_v37 = vld [vmem:[#allocation2 + $0xd9] sm:$0xff] }
  0xf1   : > { %v1906_v31 = vsel %vm1889_vm4, %v1868_v25, %v1291_v9  ;;  %v1561_v9 = vunpack.c.l.b16 %v761_v60  ;;  %v3708_v19 = vpack.c.b16 %v1671_v6, %v1670_v17  ;;  %v1358_v1 = vunpack.c.l.b16 %v621_v43  ;;  %v850_v60 = vld [vmem:[#allocation2 + $0x10a] sm:$0xff]  ;;  %v335_v6 = vld [vmem:[#allocation2 + $0xc0] sm:$0xff] }
  0xf2   : > { %2295 = vmatmul.bf16.gmra.mxu0 %v1906_v31  ;;  %v1565_v40 = vunpack.c.l.b16 %v765_v23  ;;  %v882_v5 = vpack.c.bf16 %v850_v60, %v850_v60  ;;  %v367_v10 = vpack.c.bf16 %v335_v6, %v335_v6  ;;  %v623_v26 = vpack.c.bf16 %v591_v37, %v591_v37 }
  0xf4   : > { %1086 = vrot.lane.b32.xlu0 %v3681_v32, %s3220_s21  ;;  %v1582_v48 = vpack.c.b16 %v1565_v40, %v1564_v21  ;;  %v944_v14 = vunpack.c.l.b16 %v367_v10 }
  0xf5   : > { %1308 = vrot.lane.b32.xlu2 %v3683_v50, %s3221_s22  ;;  %1198 = vrot.lane.b32.xlu1 %v3687_v20, %s3222_s23 }
  0xf6   : > { %v1483_v42 = vpop.permute.xlu0 %1482 }
  0xf7   : > { %v1707_v44 = vpop.permute.xlu2 %1706  ;;  %v1955_v38 = vsel %vm212_vm0, %v1381_v33, %v1483_v42  ;;  %v1595_v52 = vpop.permute.xlu1 %1594  ;;  %v3712_v33 = vpack.c.b16 %v1561_v9, %v1560_v3  ;;  %v1383_v9 = vpack.c.b16 %v1359_v4, %v1358_v1  ;;  %v1360_v1 = vunpack.c.l.b16 %v623_v26  ;;  %v338_v4 = vld [vmem:[#allocation2 + $0xe0] sm:$0xff] }
  0xf8   : > { %v1997_v30 = vsel %vm1856_vm3, %v1955_v38, %v1595_v52  ;;  %v942_v38 = vunpack.c.l.b16 %v365_v36  ;;  %v829_v36 = vpack.c.bf16 %v797_v13, %v797_v13  ;;  %v593_v13 = vld [vmem:[#allocation2 + $0xf1] sm:$0xff] }
  0xf9   : > { %v2034_v49 = vsel %vm1889_vm4, %v1997_v30, %v1707_v44 }
  0xfa   : > { %2384 = vmatmul.bf16.gmra.mxu1 %v2034_v49  ;;  %v967_v56 = vpack.c.b16 %v943_v45, %v942_v38 }
  0xfc   : > { %1080 = vrot.lane.b32.xlu0 %v3668_v51, %s3220_s21 }
  0xfd   : > { %1302 = vrot.lane.b32.xlu2 %v3631_v34, %s3221_s22  ;;  %1192 = vrot.lane.b32.xlu1 %v3664_v47, %s3222_s23  ;;  %v880_v34 = vpack.c.bf16 %v848_v11, %v848_v11  ;;  %v368_v11 = vpack.c.bf16 %v336_v15, %v336_v15 }
  0xfe   : > { %v1069_v8 = vpop.permute.xlu0 %1068 }
  0xff   : > { %v1293_v61 = vpop.permute.xlu2 %1292  ;;  %v1828_v51 = vsel %vm212_vm0, %v966_v53, %v1069_v8  ;;  %v1181_v16 = vpop.permute.xlu1 %1180  ;;  %v1776_v27 = vunpack.c.l.b16 %v880_v34  ;;  %v1778_v8 = vunpack.c.l.b16 %v882_v5  ;;  %v796_v34 = vld [vmem:[#allocation2 + $0x181] sm:$0xff]  ;;  %v945_v24 = vunpack.c.l.b16 %v368_v11 }
 0x100   : > { %v1870_v25 = vsel %vm1856_vm3, %v1828_v51, %v1181_v16  ;;  %v669_v51 = vld [vmem:[#allocation2 + $0x182] sm:$0xff] }
 0x101   : > { %v1909_v31 = vsel %vm1889_vm4, %v1870_v25, %v1293_v61  ;;  %v1800_v39 = vpack.c.b16 %v1777_v29, %v1776_v27  ;;  %v1779_v61 = vunpack.c.l.b16 %v883_v57  ;;  %v734_v25 = vld [vmem:[#allocation2 + $0x198] sm:$0xff]  ;;  %v735_v27 = vld [vmem:[#allocation2 + $0x1a0] sm:$0xff]  ;;  %v968_v45 = vpack.c.b16 %v945_v24, %v944_v14 }
 0x102   : > { %2300 = vmatmul.bf16.gmra.mxu0 %v1909_v31  ;;  %v701_v31 = vpack.c.bf16 %v669_v51, %v669_v51  ;;  %v767_v38 = vpack.c.bf16 %v735_v27, %v735_v27  ;;  %v625_v24 = vpack.c.bf16 %v593_v13, %v593_v13 }
 0x103   : > { %3024 = vmatmul.msk.bf16.gmra.mxu2 %vm212_vm0, %v1800_v39  ;;  %v1801_v58 = vpack.c.b16 %v1779_v61, %v1778_v8  ;;  %v592_v39 = vld [vmem:[#allocation2 + $0xe1] sm:$0xff]  ;;  %v370_v61 = vpack.c.bf16 %v338_v4, %v338_v4 }
 0x104   : > { %1496 = vrot.lane.b32.xlu0 %v3706_v18, %s3220_s21 }
 0x105   : > { %1718 = vrot.lane.b32.xlu2 %v3708_v19, %s3221_s22  ;;  %1608 = vrot.lane.b32.xlu1 %v3712_v33, %s3222_s23  ;;  %v947_v51 = vunpack.c.l.b16 %v370_v61 }
 0x106   : > { %v1485_v41 = vpop.permute.xlu0 %1484 }
 0x107   : > { %v1709_v42 = vpop.permute.xlu2 %1708  ;;  %v1958_v44 = vsel %vm212_vm0, %v1382_v28, %v1485_v41  ;;  %v1597_v46 = vpop.permute.xlu1 %1596  ;;  %v828_v28 = vpack.c.bf16 %v796_v34, %v796_v34 }
 0x108   : > { %v1999_v52 = vsel %vm1856_vm3, %v1958_v44, %v1597_v46  ;;  %v766_v44 = vpack.c.bf16 %v734_v25, %v734_v25  ;;  %v624_v46 = vpack.c.bf16 %v592_v39, %v592_v39 }
 0x109   : > { %v2037_v2 = vsel %vm1889_vm4, %v1999_v52, %v1709_v42  ;;  %v1676_v52 = vunpack.c.l.b16 %v828_v28 }
 0x10a   : > { %2389 = vmatmul.bf16.gmra.mxu1 %v2037_v2  ;;  %v1677_v2 = vunpack.c.l.b16 %v829_v36  ;;  %v1566_v59 = vunpack.c.l.b16 %v766_v44  ;;  %v1361_v60 = vunpack.c.l.b16 %v624_v46  ;;  %v1362_v44 = vunpack.c.l.b16 %v625_v24  ;;  %v857_v24 = vld [vmem:[#allocation2 + $0x15a] sm:$0xff] }
 0x10c   : > { %1500 = vrot.lane.b32.xlu0 %v3687_v20, %s3220_s21  ;;  %v3732_v20 = vpop.f32.mrf.mxu2  ;;  %v1384_v15 = vpack.c.b16 %v1361_v60, %v1360_v1 }
 0x10d   : > { %1310 = vrot.lane.b32.xlu2 %v1582_v48, %s3221_s22  ;;  %1612 = vrot.lane.b32.xlu1 %v1582_v48, %s3222_s23  ;;  %v1454_v48 = vunpack.c.l.b16 %v701_v31  ;;  %v798_v31 = vld [vmem:[#allocation2 + $0x199] sm:$0xff] }
 0x10e   : > { %v1071_v30 = vpop.permute.xlu0 %1070 }
 0x10f   : > { %v1295_v49 = vpop.permute.xlu2 %1294  ;;  %v1831_v53 = vsel %vm212_vm0, %v967_v56, %v1071_v30  ;;  %v1183_v17 = vpop.permute.xlu1 %1182  ;;  %v1567_v30 = vunpack.c.l.b16 %v767_v38 }
 0x110   : > { %v1872_v7 = vsel %vm1856_vm3, %v1831_v53, %v1183_v17  ;;  %v3756_v53 = vpack.c.b16 %v1677_v2, %v1676_v52 }
 0x111   : > { %v1912_v3 = vsel %vm1889_vm4, %v1872_v7, %v1295_v49  ;;  %v1583_v6 = vpack.c.b16 %v1567_v30, %v1566_v59 }
 0x112   : > { %2305 = vmatmul.bf16.gmra.mxu0 %v1912_v3 }
 0x113   : > { %3025 = vmatmul.msk.bf16.gmra.mxu2 %vm212_vm0, %v1801_v58 }
 0x114   : > { %1082 = vrot.lane.b32.xlu0 %v3708_v19, %s3220_s21  ;;  %v3744_v41 = vpop.f32.mrf.mxu2 }
 0x115   : > { %1304 = vrot.lane.b32.xlu2 %v3671_v0, %s3221_s22  ;;  %1194 = vrot.lane.b32.xlu1 %v3706_v18, %s3222_s23  ;;  %v702_v0 = vpack.c.bf16 %v670_v12, %v670_v12  ;;  %v3773_v12 = vld [vmem:[%s3963_s2] ss:$0 sm:$0xff] }
 0x116   : > { %v1487_v16 = vpop.permute.xlu0 %1486  ;;  %v2271_v40 = vpop.f32.mrf.mxu0 }
 0x117   : > { %v1711_v22 = vpop.permute.xlu2 %1710  ;;  %v1961_v23 = vsel %vm212_vm0, %v1383_v9, %v1487_v16  ;;  %v1599_v29 = vpop.permute.xlu1 %1598  ;;  %v1455_v35 = vunpack.c.l.b16 %v702_v0  ;;  %v594_v16 = vld [vmem:[#allocation2 + $0xf9] sm:$0xff]  ;;  %v2272_v27 = vadd.f32 %v3773_v12, %v2271_v40  ;;  %v799_v0 = vld [vmem:[#allocation2 + $0x1a1] sm:$0xff]  ;;  %v830_v40 = vpack.c.bf16 %v798_v31, %v798_v31 }
 0x118   : > { %v2001_v21 = vsel %vm1856_vm3, %v1961_v23, %v1599_v29  ;;  %v626_v25 = vpack.c.bf16 %v594_v16, %v594_v16  ;;  %v831_v46 = vpack.c.bf16 %v799_v0, %v799_v0  ;;  %v889_v0 = vpack.c.bf16 %v857_v24, %v857_v24 }
 0x119   : > { %v2040_v42 = vsel %vm1889_vm4, %v2001_v21, %v1711_v22 }
 0x11a   : > { %2394 = vmatmul.bf16.gmra.mxu1 %v2040_v42  ;;  %v1363_v38 = vunpack.c.l.b16 %v626_v25 }
 0x11c   : > { %1498 = vrot.lane.b32.xlu0 %v3645_v62, %s3220_s21  ;;  %v3754_v62 = vpack.c.b16 %v1455_v35, %v1454_v48  ;;  %v3759_v57 = vpop.f32.mrf.mxu2  ;;  %v339_v48 = vld [vmem:[#allocation2 + $0xf0] sm:$0xff]  ;;  %v340_v35 = vld [vmem:[#allocation2 + $0xf8] sm:$0xff]  ;;  %v1385_v30 = vpack.c.b16 %v1363_v38, %v1362_v44  ;;  %v1785_v44 = vunpack.c.l.b16 %v889_v0 }
 0x11d   : > { %1720 = vrot.lane.b32.xlu2 %v3641_v55, %s3221_s22  ;;  %1610 = vrot.lane.b32.xlu1 %v3683_v50, %s3222_s23  ;;  %v337_v55 = vld [vmem:[#allocation2 + $0xd8] sm:$0xff]  ;;  %v372_v1 = vpack.c.bf16 %v340_v35, %v340_v35 }
 0x11e   : > { %v1073_v43 = vpop.permute.xlu0 %1072  ;;  %v2273_v7 = vpop.f32.mrf.mxu0  ;;  %v369_v8 = vpack.c.bf16 %v337_v55, %v337_v55 }
 0x11f   : > { %v1297_v56 = vpop.permute.xlu2 %1296  ;;  %v1834_v49 = vsel %vm212_vm0, %v968_v45, %v1073_v43  ;;  %v1185_v63 = vpop.permute.xlu1 %1184  ;;  %v2274_v36 = vadd.f32 %v3773_v12, %v2273_v7  ;;  %v596_v7 = vld [vmem:[#allocation2 + $0x111] sm:$0xff] }
 0x120   : > { %v1874_v5 = vsel %vm1856_vm3, %v1834_v49, %v1185_v63  ;;  %v946_v58 = vunpack.c.l.b16 %v369_v8  ;;  %v371_v49 = vpack.c.bf16 %v339_v48, %v339_v48  ;;  %v1678_v63 = vunpack.c.l.b16 %v830_v40 }
 0x121   : > { %v1915_v17 = vsel %vm1889_vm4, %v1874_v5, %v1297_v56 }
 0x122   : > { %2310 = vmatmul.bf16.gmra.mxu0 %v1915_v17  ;;  %v948_v17 = vunpack.c.l.b16 %v371_v49 }
 0x123   : > { %3026 = vmatmul.msk.bf16.gmra.mxu2 %vm212_vm0, %v3664_v47  ;;  %v969_v47 = vpack.c.b16 %v947_v51, %v946_v58  ;;  %v628_v58 = vpack.c.bf16 %v596_v7, %v596_v7  ;;  %v859_v7 = vld [vmem:[#allocation2 + $0x172] sm:$0xff] }
 0x124   : > { %1502 = vrot.lane.b32.xlu0 %v3754_v62, %s3220_s21  ;;  %v3776_v23 = vpop.f32.mrf.mxu2 }
 0x125   : > { %1724 = vrot.lane.b32.xlu2 %v3756_v53, %s3221_s22  ;;  %1614 = vrot.lane.b32.xlu1 %v1583_v6, %s3222_s23  ;;  %s3039_s23 = sshll.u32 %s3967_s16, 7  ;;  %v949_v6 = vunpack.c.l.b16 %v372_v1 }
 0x126   : > { %v1489_v3 = vpop.permute.xlu0 %1488  ;;  %v2360_v11 = vpop.f32.mrf.mxu1  ;;  %s3794_s19 = scalar_lea.vmem %s3964_s3, %s3039_s23 }
 0x127   : > { %v1713_v9 = vpop.permute.xlu2 %1712  ;;  %v1964_v10 = vsel %vm212_vm0, %v1384_v15, %v1489_v3  ;;  %v1601_v34 = vpop.permute.xlu1 %1600  ;;  %v2361_v28 = vadd.f32 %v2360_v11, %v2272_v27  ;;  %v595_v15 = vld [vmem:[#allocation2 + $0x109] sm:$0xff] }
 0x128   : > { %v2003_v22 = vsel %vm1856_vm3, %v1964_v10, %v1601_v34  ;;  %v627_v11 = vpack.c.bf16 %v595_v15, %v595_v15  ;;  %v858_v15 = vld [vmem:[#allocation2 + $0x16a] sm:$0xff] }
 0x129   : > { %v2043_v14 = vsel %vm1889_vm4, %v2003_v22, %v1713_v9  ;;  %v2450_v43 = vadd.f32 %v3723_v54, %v2361_v28  ;;  %v1679_v54 = vunpack.c.l.b16 %v831_v46 }
 0x12a   : > { %2399 = vmatmul.bf16.gmra.mxu1 %v2043_v14  ;;  %v1364_v22 = vunpack.c.l.b16 %v627_v11  ;;  %v1365_v14 = vunpack.c.l.b16 %v628_v58 }
 0x12b   : > { %v1695_v61 = vpack.c.b16 %v1679_v54, %v1678_v63 }
 0x12c   : > { %v3786_v2 = vpop.f32.mrf.mxu2  ;;  %v1386_v40 = vpack.c.b16 %v1365_v14, %v1364_v22 }
 0x12d   : > { %1306 = vrot.lane.b32.xlu2 %v3712_v33, %s3221_s22 }
 0x12e   : > { %v2276_v29 = vpop.f32.mrf.mxu0  ;;  %v1075_v37 = vpop.permute.xlu0 %1074 }
 0x12f   : > { %v1299_v39 = vpop.permute.xlu2 %1298  ;;  %v1837_v21 = vsel %vm212_vm0, %v969_v47, %v1075_v37  ;;  %v2362_v42 = vpop.f32.mrf.mxu1  ;;  %v2277_v51 = vadd.f32 %v3773_v12, %v2276_v29  ;;  %v856_v47 = vld [vmem:[#allocation2 + $0x152] sm:$0xff] }
 0x130   : > { %v1187_v45 = vpop.permute.xlu1 %1186  ;;  %v2363_v26 = vadd.f32 %v2362_v42, %v2274_v36  ;;  %v888_v31 = vpack.c.bf16 %v856_v47, %v856_v47 }
 0x131   : > { %v1876_v52 = vsel %vm1856_vm3, %v1837_v21, %v1187_v45 }
 0x132   : > { %v2452_v56 = vadd.f32 %v3732_v20, %v2363_v26  ;;  %v1918_v59 = vsel %vm1889_vm4, %v1876_v52, %v1299_v39  ;;  %v1784_v42 = vunpack.c.l.b16 %v888_v31 }
 0x133   : > { %2315 = vmatmul.bf16.gmra.mxu0 %v1918_v59  ;;  %3027 = vmatmul.msk.bf16.gmra.mxu2 %vm212_vm0, %v3706_v18  ;;  %v970_v18 = vpack.c.b16 %v949_v6, %v948_v17  ;;  %v342_v59 = vld [vmem:[#allocation2 + $0x110] sm:$0xff] }
 0x134   : > { %v3062_v60 = vpack.c.bf16 %v2452_v56, %v2450_v43  ;;  %v3804_v9 = vpop.f32.mrf.mxu2  ;;  %v1804_v46 = vpack.c.b16 %v1785_v44, %v1784_v42  ;;  %v341_v56 = vld [vmem:[#allocation2 + $0x108] sm:$0xff]  ;;  %v374_v54 = vpack.c.bf16 %v342_v59, %v342_v59 }
 0x135   : > { %1722 = vrot.lane.b32.xlu2 %v3681_v32, %s3221_s22  ;;  %v373_v63 = vpack.c.bf16 %v341_v56, %v341_v56 }
 0x136   : > { %v1491_v55 = vpop.permute.xlu0 %1490  ;;  %3063 = vst [vmem:[%s3794_s19] sm:$0xff] %v3062_v60   ;;  %2625 = vrot.lane.b32.xlu0 %v3062_v60, %s3220_s21  ;;  %v2278_v5 = vpop.f32.mrf.mxu0  ;;  %v951_v6 = vunpack.c.l.b16 %v374_v54 }
 0x137   : > { %v1715_v20 = vpop.permute.xlu2 %1714  ;;  %v1967_v4 = vsel %vm212_vm0, %v1385_v30, %v1491_v55  ;;  %v2365_v32 = vpop.f32.mrf.mxu1  ;;  %v2279_v34 = vadd.f32 %v3773_v12, %v2278_v5  ;;  %v950_v17 = vunpack.c.l.b16 %v373_v63 }
 0x138   : > { %v1603_v8 = vpop.permute.xlu1 %1602  ;;  %v2366_v25 = vadd.f32 %v2365_v32, %v2277_v51 }
 0x139   : > { %v2005_v3 = vsel %vm1856_vm3, %v1967_v4, %v1603_v8  ;;  %v971_v24 = vpack.c.b16 %v951_v6, %v950_v17 }
 0x13a   : > { %v2046_v10 = vsel %vm1889_vm4, %v2005_v3, %v1715_v20  ;;  %v2455_v45 = vadd.f32 %v3744_v41, %v2366_v25  ;;  %v890_v3 = vpack.c.bf16 %v858_v15, %v858_v15 }
 0x13b   : > { %2404 = vmatmul.bf16.gmra.mxu1 %v2046_v10  ;;  %v891_v10 = vpack.c.bf16 %v859_v7, %v859_v7 }
 0x13c   : > { %v3812_v29 = vpop.f32.mrf.mxu2  ;;  %v1786_v22 = vunpack.c.l.b16 %v890_v3 }
 0x13d   : > { %1726 = vrot.lane.b32.xlu2 %v1695_v61, %s3221_s22  ;;  %v597_v61 = vld [vmem:[#allocation2 + $0x121] sm:$0xff]  ;;  %v1787_v14 = vunpack.c.l.b16 %v891_v10 }
 0x13e   : > { %v1077_v13 = vpop.permute.xlu0 %1076  ;;  %v629_v25 = vpack.c.bf16 %v597_v61, %v597_v61 }
 0x13f   : > { %v1301_v16 = vpop.permute.xlu2 %1300  ;;  %v1840_v27 = vsel %vm212_vm0, %v970_v18, %v1077_v13  ;;  %v2367_v36 = vpop.f32.mrf.mxu1  ;;  %v598_v18 = vld [vmem:[#allocation2 + $0x129] sm:$0xff]  ;;  %v1805_v0 = vpack.c.b16 %v1787_v14, %v1786_v22 }
 0x140   : > { %v1189_v28 = vpop.permute.xlu1 %1188  ;;  %v2368_v39 = vadd.f32 %v2367_v36, %v2279_v34  ;;  %v2281_v21 = vpop.f32.mrf.mxu0  ;;  %v630_v31 = vpack.c.bf16 %v598_v18, %v598_v18  ;;  %v603_v14 = vld [vmem:[#allocation2 + $0x169] sm:$0xff] }
 0x141   : > { %v1878_v37 = vsel %vm1856_vm3, %v1840_v27, %v1189_v28  ;;  %v2282_v55 = vadd.f32 %v3773_v12, %v2281_v21  ;;  %v1366_v21 = vunpack.c.l.b16 %v629_v25  ;;  %v604_v25 = vld [vmem:[#allocation2 + $0x171] sm:$0xff] }
 0x142   : > { %v1921_v38 = vsel %vm1889_vm4, %v1878_v37, %v1301_v16  ;;  %v2457_v26 = vadd.f32 %v3759_v57, %v2368_v39  ;;  %v1367_v42 = vunpack.c.l.b16 %v630_v31 }
 0x143   : > { %2320 = vmatmul.bf16.gmra.mxu0 %v1921_v38  ;;  %3028 = vmatmul.msk.bf16.gmra.mxu2 %vm212_vm0, %v1804_v46 }
 0x144   : > { %v3067_v48 = vpack.c.bf16 %v2457_v26, %v2455_v45  ;;  %v3822_v1 = vpop.f32.mrf.mxu2 }
 0x146   : > { %v1493_v35 = vpop.permute.xlu0 %1492  ;;  %2627 = vrot.lane.b32.xlu1 %v3067_v48, %s3220_s21  ;;  %3139 = vst [vmem:[%s3794_s19 + $0x8] sm:$0xff] %v3067_v48  }
 0x147   : > { %v1717_v52 = vpop.permute.xlu2 %1716  ;;  %v1970_v43 = vsel %vm212_vm0, %v1386_v40, %v1493_v35  ;;  %v2370_v49 = vpop.f32.mrf.mxu1  ;;  %v1387_v40 = vpack.c.b16 %v1367_v42, %v1366_v21  ;;  %v636_v21 = vpack.c.bf16 %v604_v25, %v604_v25 }
 0x148   : > { %v1605_v30 = vpop.permute.xlu1 %1604  ;;  %v2283_v57 = vpop.f32.mrf.mxu0  ;;  %v2371_v20 = vadd.f32 %v2370_v49, %v2282_v55  ;;  %v343_v49 = vld [vmem:[#allocation2 + $0x120] sm:$0xff] }
 0x149   : > { %v2007_v41 = vsel %vm1856_vm3, %v1970_v43, %v1605_v30  ;;  %v2284_v8 = vadd.f32 %v3773_v12, %v2283_v57 }
 0x14a   : > { %v2049_v60 = vsel %vm1889_vm4, %v2007_v41, %v1717_v52  ;;  %v344_v41 = vld [vmem:[#allocation2 + $0x128] sm:$0xff] }
 0x14b   : > { %2409 = vmatmul.bf16.gmra.mxu1 %v2049_v60  ;;  %v376_v17 = vpack.c.bf16 %v344_v41, %v344_v41 }
 0x14c   : > { %v3830_v16 = vpop.f32.mrf.mxu2 }
 0x14d   : > { %v953_v61 = vunpack.c.l.b16 %v376_v17 }
 0x14e   : > { %v1085_v4 = vpop.permute.xlu0 %1084 }
 0x14f   : > { %v1309_v5 = vpop.permute.xlu2 %1308  ;;  %v1852_v32 = vsel %vm212_vm0, %v3712_v33, %v1085_v4  ;;  %v2372_v58 = vpop.f32.mrf.mxu1  ;;  %v2460_v33 = vadd.f32 %v3776_v23, %v2371_v20 }
 0x150   : > { %v1197_v11 = vpop.permute.xlu1 %1196  ;;  %v2373_v34 = vadd.f32 %v2372_v58, %v2284_v8  ;;  %v2286_v13 = vpop.f32.mrf.mxu0 }
 0x151   : > { %v1886_v51 = vsel %vm1856_vm3, %v1852_v32, %v1197_v11  ;;  %v2287_v46 = vadd.f32 %v3773_v12, %v2286_v13 }
 0x152   : > { %v1933_v47 = vsel %vm1889_vm4, %v1886_v51, %v1309_v5  ;;  %v2462_v27 = vadd.f32 %v3786_v2, %v2373_v34  ;;  %v375_v5 = vpack.c.bf16 %v343_v49, %v343_v49 }
 0x153   : > { %2340 = vmatmul.bf16.vlgmr.msra.gmra.mxu3 %v1933_v47  ;;  %3029 = vmatmul.msk.bf16.gmra.mxu2 %vm212_vm0, %v1805_v0 }
 0x154   : > { %v3072_v28 = vpack.c.bf16 %v2462_v27, %v2460_v33  ;;  %v3840_v45 = vpop.f32.mrf.mxu2  ;;  %v952_v32 = vunpack.c.l.b16 %v375_v5 }
 0x156   : > { %v1079_v36 = vpop.permute.xlu0 %1078  ;;  %2629 = vrot.lane.b32.xlu2 %v3072_v28, %s3220_s21  ;;  %3140 = vst [vmem:[%s3794_s19 + $0x10] sm:$0xff] %v3072_v28   ;;  %v972_v18 = vpack.c.b16 %v953_v61, %v952_v32 }
 0x157   : > { %v1303_v37 = vpop.permute.xlu2 %1302  ;;  %v1843_v39 = vsel %vm212_vm0, %v971_v24, %v1079_v36  ;;  %v2375_v38 = vpop.f32.mrf.mxu1  ;;  %v635_v36 = vpack.c.bf16 %v603_v14, %v603_v14 }
 0x158   : > { %v1191_v44 = vpop.permute.xlu1 %1190  ;;  %v2288_v2 = vpop.f32.mrf.mxu0  ;;  %v2376_v52 = vadd.f32 %v2375_v38, %v2287_v46  ;;  %v1373_v46 = vunpack.c.l.b16 %v636_v21 }
 0x159   : > { %v1880_v23 = vsel %vm1856_vm3, %v1843_v39, %v1191_v44  ;;  %v2289_v43 = vadd.f32 %v3773_v12, %v2288_v2  ;;  %v862_v2 = vld [vmem:[#allocation2 + $0x19a] sm:$0xff] }
 0x15a   : > { %v1924_v26 = vsel %vm1889_vm4, %v1880_v23, %v1303_v37  ;;  %v2465_v20 = vadd.f32 %v3804_v9, %v2376_v52  ;;  %v1372_v23 = vunpack.c.l.b16 %v635_v36 }
 0x15b   : > { %2325 = vmatmul.bf16.gmra.mxu0 %v1924_v26  ;;  %v863_v26 = vld [vmem:[#allocation2 + $0x1a2] sm:$0xff] }
 0x15c   : > { %v3847_v54 = vpop.f32.mrf.mxu2  ;;  %v895_v52 = vpack.c.bf16 %v863_v26, %v863_v26 }
 0x15e   : > { %v1495_v48 = vpop.permute.xlu0 %1494  ;;  %v1791_v41 = vunpack.c.l.b16 %v895_v52 }
 0x15f   : > { %v1719_v35 = vpop.permute.xlu2 %1718  ;;  %v1973_v56 = vsel %vm212_vm0, %v1387_v40, %v1495_v48  ;;  %v2377_v30 = vpop.f32.mrf.mxu1  ;;  %v345_v48 = vld [vmem:[#allocation2 + $0x138] sm:$0xff] }
 0x160   : > { %v1607_v59 = vpop.permute.xlu1 %1606  ;;  %v2378_v60 = vadd.f32 %v2377_v30, %v2289_v43  ;;  %v2291_v63 = vpop.f32.mrf.mxu0 }
 0x161   : > { %v2009_v57 = vsel %vm1856_vm3, %v1973_v56, %v1607_v59 }
 0x162   : > { %v2052_v55 = vsel %vm1889_vm4, %v2009_v57, %v1719_v35  ;;  %v2467_v4 = vadd.f32 %v3812_v29, %v2378_v60  ;;  %v346_v35 = vld [vmem:[#allocation2 + $0x140] sm:$0xff] }
 0x163   : > { %2414 = vmatmul.bf16.gmra.mxu1 %v2052_v55  ;;  %3030 = vmatmul.msk.bf16.gmra.mxu2 %vm212_vm0, %v3754_v62  ;;  %v2292_v62 = vadd.f32 %v3773_v12, %v2291_v63  ;;  %v378_v60 = vpack.c.bf16 %v346_v35, %v346_v35  ;;  %v1390_v63 = vpack.c.b16 %v1373_v46, %v1372_v23 }
 0x164   : > { %v3077_v6 = vpack.c.bf16 %v2467_v4, %v2465_v20  ;;  %v3859_v11 = vpop.f32.mrf.mxu2 }
 0x166   : > { %v1087_v15 = vpop.permute.xlu0 %1086  ;;  %2631 = vrot.lane.b32.xlu0 %v3077_v6, %s3220_s21  ;;  %3141 = vst [vmem:[%s3794_s19 + $0x18] sm:$0xff] %v3077_v6   ;;  %v955_v6 = vunpack.c.l.b16 %v378_v60 }
 0x167   : > { %v1311_v7 = vpop.permute.xlu2 %1310  ;;  %v1855_v8 = vsel %vm212_vm0, %v3683_v50, %v1087_v15  ;;  %v2380_v3 = vpop.f32.mrf.mxu1 }
 0x168   : > { %v1199_v9 = vpop.permute.xlu1 %1198  ;;  %v2293_v10 = vpop.f32.mrf.mxu0  ;;  %v2381_v34 = vadd.f32 %v2380_v3, %v2292_v62  ;;  %v602_v3 = vld [vmem:[#allocation2 + $0x159] sm:$0xff] }
 0x169   : > { %v1888_v29 = vsel %vm1856_vm3, %v1855_v8, %v1199_v9  ;;  %v2294_v13 = vadd.f32 %v3773_v12, %v2293_v10  ;;  %v601_v9 = vld [vmem:[#allocation2 + $0x151] sm:$0xff] }
 0x16a   : > { %v1936_v58 = vsel %vm1889_vm4, %v1888_v29, %v1311_v7  ;;  %v2470_v37 = vadd.f32 %v3822_v1, %v2381_v34  ;;  %v894_v1 = vpack.c.bf16 %v862_v2, %v862_v2 }
 0x16b   : > { %2345 = vmatmul.bf16.gmra.mxu3 %v1936_v58 }
 0x16c   : > { %v3866_v0 = vpop.f32.mrf.mxu2  ;;  %v1790_v49 = vunpack.c.l.b16 %v894_v1 }
 0x16e   : > { %v1081_v51 = vpop.permute.xlu0 %1080  ;;  %v1807_v55 = vpack.c.b16 %v1791_v41, %v1790_v49 }
 0x16f   : > { %v1305_v50 = vpop.permute.xlu2 %1304  ;;  %v1846_v22 = vsel %vm212_vm0, %v972_v18, %v1081_v51  ;;  %v2382_v24 = vpop.f32.mrf.mxu1 }
 0x170   : > { %v1193_v47 = vpop.permute.xlu1 %1192  ;;  %v2383_v27 = vadd.f32 %v2382_v24, %v2294_v13  ;;  %v2296_v31 = vpop.f32.mrf.mxu0  ;;  %v633_v13 = vpack.c.bf16 %v601_v9, %v601_v9 }
 0x171   : > { %v1882_v33 = vsel %vm1856_vm3, %v1846_v22, %v1193_v47  ;;  %v2297_v20 = vadd.f32 %v3773_v12, %v2296_v31  ;;  %v634_v22 = vpack.c.bf16 %v602_v3, %v602_v3 }
 0x172   : > { %v1927_v28 = vsel %vm1889_vm4, %v1882_v33, %v1305_v50  ;;  %v2472_v39 = vadd.f32 %v3830_v16, %v2383_v27  ;;  %v1370_v33 = vunpack.c.l.b16 %v633_v13 }
 0x173   : > { %2330 = vmatmul.bf16.gmra.mxu0 %v1927_v28  ;;  %3031 = vmatmul.msk.bf16.gmra.mxu2 %vm212_vm0, %v1807_v55  ;;  %v1371_v27 = vunpack.c.l.b16 %v634_v22 }
 0x174   : > { %v3082_v42 = vpack.c.bf16 %v2472_v39, %v2470_v37  ;;  %v3876_v30 = vpop.f32.mrf.mxu2 }
 0x175   : > { %v1389_v37 = vpack.c.b16 %v1371_v27, %v1370_v33 }
 0x176   : > { %v1497_v44 = vpop.permute.xlu0 %1496  ;;  %3142 = vst [vmem:[%s3794_s19 + $0x20] sm:$0xff] %v3082_v42   ;;  %2633 = vrot.lane.b32.xlu1 %v3082_v42, %s3220_s21 }
 0x177   : > { %v1721_v38 = vpop.permute.xlu2 %1720  ;;  %v1976_v40 = vsel %vm212_vm0, %v3708_v19, %v1497_v44  ;;  %v2385_v43 = vpop.f32.mrf.mxu1  ;;  %v377_v19 = vpack.c.bf16 %v345_v48, %v345_v48 }
 0x178   : > { %v1609_v16 = vpop.permute.xlu1 %1608  ;;  %v2298_v59 = vpop.f32.mrf.mxu0  ;;  %v2386_v15 = vadd.f32 %v2385_v43, %v2297_v20 }
 0x179   : > { %v2011_v56 = vsel %vm1856_vm3, %v1976_v40, %v1609_v16  ;;  %v954_v17 = vunpack.c.l.b16 %v377_v19  ;;  %v2299_v7 = vadd.f32 %v3773_v12, %v2298_v59 }
 0x17a   : > { %v2055_v57 = vsel %vm1889_vm4, %v2011_v56, %v1721_v38  ;;  %v2475_v50 = vadd.f32 %v3840_v45, %v2386_v15 }
 0x17b   : > { %2419 = vmatmul.bf16.gmra.mxu1 %v2055_v57  ;;  %v973_v62 = vpack.c.b16 %v955_v6, %v954_v17 }
 0x17c   : > { %v2486_v51 = vpop.f32.mrf.mxu2 }
 0x17e   : > { %v1501_v4 = vpop.permute.xlu0 %1500 }
 0x17f   : > { %v1725_v5 = vpop.permute.xlu2 %1724  ;;  %v1982_v8 = vsel %vm212_vm0, %v1390_v63, %v1501_v4  ;;  %v2387_v61 = vpop.f32.mrf.mxu1 }
 0x180   : > { %v1613_v32 = vpop.permute.xlu1 %1612  ;;  %v2388_v10 = vadd.f32 %v2387_v61, %v2299_v7  ;;  %v2301_v58 = vpop.f32.mrf.mxu0 }
 0x181   : > { %v2015_v29 = vsel %vm1856_vm3, %v1982_v8, %v1613_v32  ;;  %v2302_v21 = vadd.f32 %v3773_v12, %v2301_v58 }
 0x182   : > { %v2061_v18 = vsel %vm1889_vm4, %v2015_v29, %v1725_v5  ;;  %v2477_v34 = vadd.f32 %v3847_v54, %v2388_v10 }
 0x183   : > { %2429 = vmatmul.bf16.vlgmr.msrb.gmra.mxu3 %v2061_v18 }
 0x184   : > { %v3087_v14 = vpack.c.bf16 %v2477_v34, %v2475_v50 }
 0x186   : > { %v1083_v47 = vpop.permute.xlu0 %1082  ;;  %3143 = vst [vmem:[%s3794_s19 + $0x28] sm:$0xff] %v3087_v14   ;;  %2635 = vrot.lane.b32.xlu2 %v3087_v14, %s3220_s21  ;;  %v2489_v39 = vpop.f32.mrf.mxu2 }
 0x187   : > { %v1307_v24 = vpop.permute.xlu2 %1306  ;;  %v1849_v25 = vsel %vm212_vm0, %v973_v62, %v1083_v47  ;;  %v2390_v28 = vpop.f32.mrf.mxu1 }
 0x188   : > { %v1195_v31 = vpop.permute.xlu1 %1194  ;;  %v2303_v45 = vpop.f32.mrf.mxu0  ;;  %v2391_v38 = vadd.f32 %v2390_v28, %v2302_v21 }
 0x189   : > { %v1884_v36 = vsel %vm1856_vm3, %v1849_v25, %v1195_v31  ;;  %v2304_v23 = vadd.f32 %v3773_v12, %v2303_v45 }
 0x18a   : > { %v1930_v54 = vsel %vm1889_vm4, %v1884_v36, %v1307_v24  ;;  %v2480_v52 = vadd.f32 %v3859_v11, %v2391_v38 }
 0x18b   : > { %2335 = vmatmul.bf16.gmra.mxu0 %v1930_v54 }
 0x18e   : > { %v1499_v42 = vpop.permute.xlu0 %1498  ;;  %v2491_v59 = vpop.f32.mrf.mxu2 }
 0x18f   : > { %v1723_v44 = vpop.permute.xlu2 %1722  ;;  %v1979_v2 = vsel %vm212_vm0, %v1389_v37, %v1499_v42  ;;  %v2392_v40 = vpop.f32.mrf.mxu1 }
 0x190   : > { %v1611_v26 = vpop.permute.xlu1 %1610  ;;  %v2393_v48 = vadd.f32 %v2392_v40, %v2304_v23  ;;  %v2306_v35 = vpop.f32.mrf.mxu0 }
 0x191   : > { %v2013_v46 = vsel %vm1856_vm3, %v1979_v2, %v1611_v26 }
 0x192   : > { %v2058_v1 = vsel %vm1889_vm4, %v2013_v46, %v1723_v44  ;;  %v2482_v16 = vadd.f32 %v3866_v0, %v2393_v48  ;;  %v2307_v0 = vadd.f32 %v3773_v12, %v2306_v35 }
 0x193   : > { %2424 = vmatmul.bf16.gmra.mxu1 %v2058_v1 }
 0x194   : > { %v3092_v43 = vpack.c.bf16 %v2482_v16, %v2480_v52 }
 0x196   : > { %v1503_v56 = vpop.permute.xlu0 %1502  ;;  %3144 = vst [vmem:[%s3794_s19 + $0x30] sm:$0xff] %v3092_v43   ;;  %2637 = vrot.lane.b32.xlu1 %v3092_v43, %s3220_s21 }
 0x197   : > { %v1985_v49 = vsel %vm212_vm0, %v3756_v53, %v1503_v56  ;;  %v1727_v41 = vpop.permute.xlu2 %1726  ;;  %v2395_v19 = vpop.f32.mrf.mxu1 }
 0x198   : > { %v1615_v57 = vpop.permute.xlu1 %1614  ;;  %v2308_v63 = vpop.f32.mrf.mxu0  ;;  %v2396_v55 = vadd.f32 %v2395_v19, %v2307_v0 }
 0x199   : > { %v2017_v60 = vsel %vm1856_vm3, %v1985_v49, %v1615_v57  ;;  %v2309_v20 = vadd.f32 %v3773_v12, %v2308_v63  ;;  %v2494_v53 = vpop.f32.mrf.mxu2 }
 0x19a   : > { %v2064_v11 = vsel %vm1889_vm4, %v2017_v60, %v1727_v41  ;;  %v2485_v6 = vadd.f32 %v3876_v30, %v2396_v55 }
 0x19b   : > { %2434 = vmatmul.bf16.gmra.mxu3 %v2064_v11 }
 0x19f   : > { %v2397_v4 = vpop.f32.mrf.mxu1 }
 0x1a0   : > { %v2398_v5 = vadd.f32 %v2397_v4, %v2309_v20  ;;  %v2311_v17 = vpop.f32.mrf.mxu0 }
 0x1a1   : > { %v2496_v61 = vpop.f32.mrf.mxu2  ;;  %v2312_v9 = vadd.f32 %v3773_v12, %v2311_v17 }
 0x1a2   : > { %v2487_v15 = vadd.f32 %v2486_v51, %v2398_v5 }
 0x1a4   : > { %v3097_v7 = vpack.c.bf16 %v2487_v15, %v2485_v6 }
 0x1a6   : > { %3145 = vst [vmem:[%s3794_s19 + $0x38] sm:$0xff] %v3097_v7  }
 0x1a7   : > { %v2400_v8 = vpop.f32.mrf.mxu1 }
 0x1a8   : > { %v2313_v32 = vpop.f32.mrf.mxu0  ;;  %v2401_v3 = vadd.f32 %v2400_v8, %v2312_v9 }
 0x1a9   : > { %v2314_v29 = vadd.f32 %v3773_v12, %v2313_v32  ;;  %v2499_v34 = vpop.f32.mrf.mxu2 }
 0x1aa   : > { %v2490_v62 = vadd.f32 %v2489_v39, %v2401_v3 }
 0x1af   : > { %v2402_v10 = vpop.f32.mrf.mxu1 }
 0x1b0   : > { %v2403_v58 = vadd.f32 %v2402_v10, %v2314_v29  ;;  %v2316_v18 = vpop.f32.mrf.mxu0 }
 0x1b1   : > { %v2317_v22 = vadd.f32 %v3773_v12, %v2316_v18  ;;  %v2501_v14 = vpop.f32.mrf.mxu2 }
 0x1b2   : > { %v2492_v50 = vadd.f32 %v2491_v59, %v2403_v58 }
 0x1b4   : > { %v3102_v13 = vpack.c.bf16 %v2492_v50, %v2490_v62 }
 0x1b6   : > { %3146 = vst [vmem:[%s3794_s19 + $0x40] sm:$0xff] %v3102_v13   ;;  %2641 = vrot.lane.b32.xlu0 %v3102_v13, %s3220_s21 }
 0x1b8   : > { %v2405_v30 = vpop.f32.mrf.mxu1  ;;  %v2318_v51 = vpop.f32.mrf.mxu0 }
 0x1b9   : > { %v2406_v47 = vadd.f32 %v2405_v30, %v2317_v22  ;;  %v2319_v24 = vadd.f32 %v3773_v12, %v2318_v51  ;;  %v2504_v54 = vpop.f32.mrf.mxu2 }
 0x1bb   : > { %v2495_v31 = vadd.f32 %v2494_v53, %v2406_v47 }
 0x1be   : > { %2639 = vrot.lane.b32.xlu0 %v3097_v7, %s3220_s21 }
 0x1c0   : > { %v2407_v25 = vpop.f32.mrf.mxu1  ;;  %v2321_v27 = vpop.f32.mrf.mxu0 }
 0x1c1   : > { %v2408_v33 = vadd.f32 %v2407_v25, %v2319_v24  ;;  %v2322_v39 = vadd.f32 %v3773_v12, %v2321_v27  ;;  %v2506_v23 = vpop.f32.mrf.mxu2 }
 0x1c3   : > { %v2497_v28 = vadd.f32 %v2496_v61, %v2408_v33 }
 0x1c5   : > { %v3107_v36 = vpack.c.bf16 %v2497_v28, %v2495_v31 }
 0x1c7   : > { %3147 = vst [vmem:[%s3794_s19 + $0x48] sm:$0xff] %v3107_v36   ;;  %2643 = vrot.lane.b32.xlu2 %v3107_v36, %s3220_s21 }
 0x1c8   : > { %v2410_v45 = vpop.f32.mrf.mxu1  ;;  %v2323_v37 = vpop.f32.mrf.mxu0 }
 0x1c9   : > { %v2411_v21 = vadd.f32 %v2410_v45, %v2322_v39  ;;  %v2324_v42 = vadd.f32 %v3773_v12, %v2323_v37  ;;  %v2509_v48 = vpop.f32.mrf.mxu2 }
 0x1cb   : > { %v2500_v2 = vadd.f32 %v2499_v34, %v2411_v21 }
 0x1d0   : > { %v2412_v44 = vpop.f32.mrf.mxu1 }
 0x1d1   : > { %v2413_v38 = vadd.f32 %v2412_v44, %v2324_v42  ;;  %v2511_v43 = vpop.f32.mrf.mxu2 }
 0x1d3   : > { %v2502_v26 = vadd.f32 %v2501_v14, %v2413_v38 }
 0x1d5   : > { %v3112_v40 = vpack.c.bf16 %v2502_v26, %v2500_v2 }
 0x1d6   : > { %v2341_v1 = vpop.f32.mrf.mxu3 }
 0x1d7   : > { %3148 = vst [vmem:[%s3794_s19 + $0x50] sm:$0xff] %v3112_v40   ;;  %2645 = vrot.lane.b32.xlu1 %v3112_v40, %s3220_s21  ;;  %v2342_v58 = vadd.f32 %v3773_v12, %v2341_v1 }
 0x1d8   : > { %v2326_v46 = vpop.f32.mrf.mxu0 }
 0x1d9   : > { %v2327_v16 = vadd.f32 %v3773_v12, %v2326_v46  ;;  %v2514_v11 = vpop.f32.mrf.mxu2  ;;  %v2626_v46 = vpop.permute.xlu0 %2625 }
 0x1de   : > { %v2343_v60 = vpop.f32.mrf.mxu3 }
 0x1df   : > { %v2344_v18 = vadd.f32 %v3773_v12, %v2343_v60 }
 0x1e0   : > { %v2415_v35 = vpop.f32.mrf.mxu1  ;;  %v2328_v52 = vpop.f32.mrf.mxu0 }
 0x1e1   : > { %v2329_v56 = vadd.f32 %v3773_v12, %v2328_v52  ;;  %v2416_v59 = vadd.f32 %v2415_v35, %v2327_v16  ;;  %v2516_v4 = vpop.f32.mrf.mxu2  ;;  %v2630_v35 = vpop.permute.xlu2 %2629 }
 0x1e2   : > { %v2628_v52 = vpop.permute.xlu1 %2627 }
 0x1e3   : > { %v2505_v57 = vadd.f32 %v2504_v54, %v2416_v59 }
 0x1e8   : > { %v2417_v49 = vpop.f32.mrf.mxu1 }
 0x1e9   : > { %v2418_v41 = vadd.f32 %v2417_v49, %v2329_v56  ;;  %v2519_v9 = vpop.f32.mrf.mxu2  ;;  %v2636_v16 = vpop.permute.xlu2 %2635 }
 0x1eb   : > { %v2507_v19 = vadd.f32 %v2506_v23, %v2418_v41 }
 0x1ed   : > { %v3117_v63 = vpack.c.bf16 %v2507_v19, %v2505_v57 }
 0x1ee   : > { %v2346_v55 = vpop.f32.mrf.mxu3 }
 0x1ef   : > { %3149 = vst [vmem:[%s3794_s19 + $0x58] sm:$0xff] %v3117_v63   ;;  %2647 = vrot.lane.b32.xlu2 %v3117_v63, %s3220_s21  ;;  %v2347_v39 = vadd.f32 %v3773_v12, %v2346_v55 }
 0x1f0   : > { %v2331_v0 = vpop.f32.mrf.mxu0 }
 0x1f1   : > { %v2332_v5 = vadd.f32 %v3773_v12, %v2331_v0  ;;  %v2521_v34 = vpop.f32.mrf.mxu2 }
 0x1f6   : > { %v2348_v17 = vpop.f32.mrf.mxu3 }
 0x1f7   : > { %v2349_v21 = vadd.f32 %v3773_v12, %v2348_v17 }
 0x1f8   : > { %v2420_v20 = vpop.f32.mrf.mxu1  ;;  %v2333_v53 = vpop.f32.mrf.mxu0 }
 0x1f9   : > { %v2334_v6 = vadd.f32 %v3773_v12, %v2333_v53  ;;  %v2421_v15 = vadd.f32 %v2420_v20, %v2332_v5  ;;  %v2524_v45 = vpop.f32.mrf.mxu2 }
 0x1fb   : > { %v2510_v32 = vadd.f32 %v2509_v48, %v2421_v15  ;;  %v2632_v48 = vpop.permute.xlu0 %2631 }
 0x200   : > { %v2422_v7 = vpop.f32.mrf.mxu1 }
 0x201   : > { %v2423_v8 = vadd.f32 %v2422_v7, %v2334_v6  ;;  %v2526_v38 = vpop.f32.mrf.mxu2 }
 0x203   : > { %v2512_v61 = vadd.f32 %v2511_v43, %v2423_v8  ;;  %v2634_v43 = vpop.permute.xlu1 %2633 }
 0x205   : > { %v3122_v3 = vpack.c.bf16 %v2512_v61, %v2510_v32 }
 0x206   : > { %v2430_v29 = vpop.f32.mrf.mxu3 }
 0x207   : > { %3150 = vst [vmem:[%s3794_s19 + $0x60] sm:$0xff] %v3122_v3   ;;  %2649 = vrot.lane.b32.xlu0 %v3122_v3, %s3220_s21  ;;  %v2431_v62 = vadd.f32 %v2430_v29, %v2342_v58 }
 0x208   : > { %v2336_v10 = vpop.f32.mrf.mxu0 }
 0x209   : > { %v2520_v51 = vadd.f32 %v2519_v9, %v2431_v62  ;;  %v2337_v24 = vadd.f32 %v3773_v12, %v2336_v10 }
 0x20e   : > { %v2432_v50 = vpop.f32.mrf.mxu3 }
 0x20f   : > { %v2433_v13 = vadd.f32 %v2432_v50, %v2344_v18 }
 0x210   : > { %v2425_v30 = vpop.f32.mrf.mxu1  ;;  %v2338_v47 = vpop.f32.mrf.mxu0 }
 0x211   : > { %v2522_v22 = vadd.f32 %v2521_v34, %v2433_v13  ;;  %v2339_v25 = vadd.f32 %v3773_v12, %v2338_v47  ;;  %v2426_v33 = vadd.f32 %v2425_v30, %v2337_v24  ;;  %v2638_v12 = vpop.permute.xlu1 %2637 }
 0x213   : > { %v3132_v14 = vpack.c.bf16 %v2522_v22, %v2520_v51  ;;  %v2515_v28 = vadd.f32 %v2514_v11, %v2426_v33 }
 0x215   : > { %3152 = vst [vmem:[%s3794_s19 + $0x70] sm:$0xff] %v3132_v14   ;;  %2653 = vrot.lane.b32.xlu2 %v3132_v14, %s3220_s21 }
 0x218   : > { %v2427_v27 = vpop.f32.mrf.mxu1 }
 0x219   : > { %v2428_v31 = vadd.f32 %v2427_v27, %v2339_v25 }
 0x21b   : > { %v2517_v36 = vadd.f32 %v2516_v4, %v2428_v31 }
 0x21d   : > { %v3127_v54 = vpack.c.bf16 %v2517_v36, %v2515_v28 }
 0x21e   : > { %v2435_v37 = vpop.f32.mrf.mxu3 }
 0x21f   : > { %3151 = vst [vmem:[%s3794_s19 + $0x68] sm:$0xff] %v3127_v54   ;;  %2651 = vrot.lane.b32.xlu1 %v3127_v54, %s3220_s21  ;;  %v2436_v42 = vadd.f32 %v2435_v37, %v2347_v39 }
 0x221   : > { %v2525_v2 = vadd.f32 %v2524_v45, %v2436_v42  ;;  %v2644_v56 = vpop.permute.xlu2 %2643 }
 0x226   : > { %v2437_v44 = vpop.f32.mrf.mxu3 }
 0x227   : > { %v2438_v23 = vadd.f32 %v2437_v44, %v2349_v21 }
 0x228   : > { %v2642_v1 = vpop.permute.xlu0 %2641 }
 0x229   : > { %v2527_v26 = vadd.f32 %v2526_v38, %v2438_v23 }
 0x22b   : > { %v3137_v40 = vpack.c.bf16 %v2527_v26, %v2525_v2 }
 0x22d   : > { %3153 = vst [vmem:[%s3794_s19 + $0x78] sm:$0xff] %v3137_v40   ;;  %2655 = vrot.lane.b32.xlu0 %v3137_v40, %s3220_s21  ;;  %s3040_s21 = sshll.u32 %s3967_s16, 6 }
 0x22e   : > { %s210_s25 = scalar_lea.vmem %s3965_s4, %s3040_s21 }
 0x230   : > { %v2640_v41 = vpop.permute.xlu0 %2639 }
 0x249   : > { %v2646_v59 = vpop.permute.xlu1 %2645  ;;  %v2648_v49 = vpop.permute.xlu2 %2647 }
 0x254   : > { %3182 = vxpose.binary.xlu1.c.b16.start [1/16] (narrow) %v2642_v1, %v2626_v46, 32 }
 0x264   : > { %3183 = vxpose.binary.xlu1.c.b16.cont [2/16] (narrow) %v2644_v56, %v2628_v52, 32 }
 0x26f   : > { %v2654_v60 = vpop.permute.xlu2 %2653 }
 0x274   : > { %3184 = vxpose.binary.xlu1.c.b16.cont [3/16] (narrow) %v2646_v59, %v2630_v35, 32 }
 0x279   : > { %v2650_v57 = vpop.permute.xlu0 %2649 }
 0x284   : > { %3185 = vxpose.binary.xlu1.c.b16.cont [4/16] (narrow) %v2648_v49, %v2632_v48, 32 }
 0x291   : > { %v2652_v19 = vpop.permute.xlu1 %2651 }
 0x294   : > { %3186 = vxpose.binary.xlu1.c.b16.cont [5/16] (narrow) %v2650_v57, %v2634_v43, 32 }
 0x29f   : > { %v2656_v63 = vpop.permute.xlu0 %2655 }
 0x2a4   : > { %3187 = vxpose.binary.xlu1.c.b16.cont [6/16] (narrow) %v2652_v19, %v2636_v16, 32 }
 0x2b4   : > { %3188 = vxpose.binary.xlu1.c.b16.cont [7/16] (narrow) %v2654_v60, %v2638_v12, 32 }
 0x2c4   : > { %3189 = vxpose.binary.xlu1.c.b16.end [8/16] (narrow) %v2656_v63, %v2640_v41, 32 }
 0x300   : > { %v3190_v11 = vpop.trf.xlu1 }
 0x308   : > { %v3191_v0 = vpop.trf.xlu1 }
 0x310   : > { %v3192_v55 = vpop.trf.xlu1 }
 0x311   : > { %2711 = vmatpush.bf16.xpose.msra.mxu3 %v3192_v55 }
 0x318   : > { %v3193_v20 = vpop.trf.xlu1 }
 0x319   : > { %2712 = vmatpush.bf16.xpose.msra.mxu3 %v3190_v11 }
 0x320   : > { %2713 = vmatmul.bf16.vlgmr.msra.gmra.mxu3 %v3190_v11 }
 0x321   : > { %2730 = vmatpush.bf16.xpose.msrb.mxu3 %v3193_v20 }
 0x329   : > { %2731 = vmatpush.bf16.xpose.msrb.mxu3 %v3191_v0 }
 0x330   : > { %2718 = vmatmul.bf16.gmra.mxu3 %v3192_v55 }
 0x331   : > { %2805 = vmatpush.bf16.msra.mxu3 %v3192_v55 }
 0x335   : > { %2806 = vmatpush.bf16.msra.mxu3 %v3190_v11 }
 0x340   : > { %2732 = vmatmul.bf16.vlgmr.msrb.gmra.mxu3 %v3191_v0 }
 0x341   : > { %2824 = vmatpush.bf16.msrb.mxu3 %v3193_v20 }
 0x345   : > { %2825 = vmatpush.bf16.msrb.mxu3 %v3191_v0 }
 0x350   : > { %2737 = vmatmul.bf16.gmra.mxu3 %v3193_v20 }
 0x3a3   : > { %v2714_v4 = vpop.f32.mrf.mxu3 }
 0x3ab   : > { %v2716_v53 = vpop.f32.mrf.mxu3 }
 0x3b3   : > { %v2719_v5 = vpop.f32.mrf.mxu3 }
 0x3bb   : > { %v2721_v17 = vpop.f32.mrf.mxu3 }
 0x3c3   : > { %v2733_v6 = vpop.f32.mrf.mxu3 }
 0x3c4   : > { %v2734_v15 = vadd.f32 %v2733_v6, %v2714_v4 }
 0x3c6   : > { %v2743_v7 = vmul.f32 0.0625, %v2734_v15 }
 0x3c8   : > { %v2747_v8 = vsel %vm212_vm0, %v2743_v7, -inf }
 0x3c9   : > { %2748 = vmax.xlane.f32.xlu2 %v2747_v8 }
 0x3cb   : > { %v2735_v32 = vpop.f32.mrf.mxu3 }
 0x3cc   : > { %v2736_v61 = vadd.f32 %v2735_v32, %v2716_v53 }
 0x3ce   : > { %v2744_v9 = vmul.f32 0.0625, %v2736_v61 }
 0x3d0   : > { %v2750_v3 = vsel %vm212_vm0, %v2744_v9, -inf }
 0x3d1   : > { %2751 = vmax.xlane.f32.xlu0 %v2750_v3 }
 0x3d3   : > { %v2738_v29 = vpop.f32.mrf.mxu3 }
 0x3d4   : > { %v2739_v10 = vadd.f32 %v2738_v29, %v2719_v5 }
 0x3d6   : > { %v2745_v58 = vmul.f32 0.0625, %v2739_v10 }
 0x3d8   : > { %v2753_v18 = vsel %vm212_vm0, %v2745_v58, -inf }
 0x3d9   : > { %2754 = vmax.xlane.f32.xlu2 %v2753_v18 }
 0x3db   : > { %v2740_v62 = vpop.f32.mrf.mxu3 }
 0x3dc   : > { %v2741_v50 = vadd.f32 %v2740_v62, %v2721_v17 }
 0x3de   : > { %v2746_v34 = vmul.f32 0.0625, %v2741_v50 }
 0x3e0   : > { %v2756_v13 = vsel %vm212_vm0, %v2746_v34, -inf }
 0x3e1   : > { %2757 = vmax.xlane.f32.xlu2 %v2756_v13 }
 0x43c   : > { %v2749_v30 = vpop.xlane.xlu2 %2748 }
 0x43d   : > { %v2759_v51 = vsub.f32 %v2743_v7, %v2749_v30 }
 0x43f   : > { %v2763_v22 = vmul.f32 1.442695, %v2759_v51 }
 0x441   : > { %3195 = vpow2.f32 %v2763_v22 }
 0x444   : > { %v2752_v14 = vpop.xlane.xlu0 %2751 }
 0x445   : > { %v2760_v47 = vsub.f32 %v2744_v9, %v2752_v14 }
 0x447   : > { %v3196_v24 = vpop.eup %3195  ;;  %v2765_v25 = vmul.f32 1.442695, %v2760_v47 }
 0x448   : > { %v2771_v33 = vsel %vm212_vm0, %v3196_v24, 0.0 }
 0x449   : > { %3197 = vpow2.f32 %v2765_v25  ;;  %2772 = vadd.xlane.f32.xlu0 %v2771_v33 }
 0x44c   : > { %v2755_v27 = vpop.xlane.xlu2 %2754 }
 0x44d   : > { %v2761_v31 = vsub.f32 %v2745_v58, %v2755_v27 }
 0x44f   : > { %v3198_v28 = vpop.eup %3197  ;;  %v2767_v36 = vmul.f32 1.442695, %v2761_v31 }
 0x450   : > { %v2774_v45 = vsel %vm212_vm0, %v3198_v28, 0.0 }
 0x451   : > { %3199 = vpow2.f32 %v2767_v36  ;;  %2775 = vadd.xlane.f32.xlu2 %v2774_v45 }
 0x454   : > { %v2758_v54 = vpop.xlane.xlu2 %2757 }
 0x455   : > { %v2762_v37 = vsub.f32 %v2746_v34, %v2758_v54 }
 0x457   : > { %v3200_v39 = vpop.eup %3199  ;;  %v2769_v21 = vmul.f32 1.442695, %v2762_v37 }
 0x458   : > { %v2777_v42 = vsel %vm212_vm0, %v3200_v39, 0.0 }
 0x459   : > { %3201 = vpow2.f32 %v2769_v21  ;;  %2778 = vadd.xlane.f32.xlu0 %v2777_v42 }
 0x45f   : > { %v3202_v44 = vpop.eup %3201 }
 0x460   : > { %v2780_v38 = vsel %vm212_vm0, %v3202_v44, 0.0 }
 0x461   : > { %2781 = vadd.xlane.f32.xlu2 %v2780_v38 }
 0x4bc   : > { %v2773_v23 = vpop.xlane.xlu0 %2772 }
 0x4bd   : > { %3203 = vrcp.f32 %v2773_v23 }
 0x4c3   : > { %v3204_v26 = vpop.eup %3203 }
 0x4c4   : > { %v2776_v2 = vpop.xlane.xlu2 %2775  ;;  %v2787_v46 = vmul.f32 %v3204_v26, %v3196_v24 }
 0x4c5   : > { %3205 = vrcp.f32 %v2776_v2 }
 0x4cb   : > { %v3206_v40 = vpop.eup %3205 }
 0x4cc   : > { %v2788_v48 = vmul.f32 %v3206_v40, %v3198_v28  ;;  %v2779_v1 = vpop.xlane.xlu0 %2778 }
 0x4cd   : > { %3207 = vrcp.f32 %v2779_v1 }
 0x4ce   : > { %v2791_v35 = vpack.c.bf16 %v2788_v48, %v2787_v46 }
 0x4d0   : > { %3032 = vmatmul.msk.bf16.vlgmr.msra.gmra.mxu3 %vm212_vm0, %v2791_v35 }
 0x4d3   : > { %v3208_v16 = vpop.eup %3207 }
 0x4d4   : > { %v2782_v52 = vpop.xlane.xlu2 %2781  ;;  %v2789_v56 = vmul.f32 %v3208_v16, %v3200_v39 }
 0x4d5   : > { %3209 = vrcp.f32 %v2782_v52 }
 0x4db   : > { %v3210_v43 = vpop.eup %3209 }
 0x4dc   : > { %v2790_v12 = vmul.f32 %v3210_v43, %v3202_v44 }
 0x4de   : > { %v2792_v59 = vpack.c.bf16 %v2790_v12, %v2789_v56 }
 0x4e0   : > { %3033 = vmatmul.msk.bf16.gmra.mxu3 %vm212_vm0, %v2792_v59 }
 0x4f0   : > { %3034 = vmatmul.msk.bf16.vlgmr.msrb.gmra.mxu3 %vm212_vm0, %v2791_v35 }
 0x500   : > { %3035 = vmatmul.msk.bf16.gmra.mxu3 %vm212_vm0, %v2792_v59 }
 0x553   : > { %v2808_v49 = vpop.f32.mrf.mxu3 }
 0x554   : > { %2837 = vst [vmem:[%s210_s25] sm:$0xff] %v2808_v49 }
 0x55b   : > { %v2810_v41 = vpop.f32.mrf.mxu3 }
 0x55c   : > { %2839 = vst [vmem:[%s210_s25 + $0x10] sm:$0xff] %v2810_v41 }
 0x563   : > { %v2813_v57 = vpop.f32.mrf.mxu3 }
 0x564   : > { %2841 = vst [vmem:[%s210_s25 + $0x20] sm:$0xff] %v2813_v57 }
 0x56b   : > { %v2815_v19 = vpop.f32.mrf.mxu3 }
 0x56c   : > { %2843 = vst [vmem:[%s210_s25 + $0x30] sm:$0xff] %v2815_v19 }
 0x573   : > { %v2827_v60 = vpop.f32.mrf.mxu3 }
 0x574   : > { %2838 = vst [vmem:[%s210_s25 + $0x8] sm:$0xff] %v2827_v60 }
 0x57b   : > { %v2829_v63 = vpop.f32.mrf.mxu3 }
 0x57c   : > { %2840 = vst [vmem:[%s210_s25 + $0x18] sm:$0xff] %v2829_v63 }
 0x583   : > { %v2832_v11 = vpop.f32.mrf.mxu3 }
 0x584   : > { %2842 = vst [vmem:[%s210_s25 + $0x28] sm:$0xff] %v2832_v11 }
 0x58b   : > { %v2834_v0 = vpop.f32.mrf.mxu3 }
 0x58c   : > { %2844 = vst [vmem:[%s210_s25 + $0x38] sm:$0xff] %v2834_v0 }
 0x58d PF: > { %s15_s15 = sadd.s32 1, %s3217_s15  }
 0x58e   : > { %p12_p4 = scmp.ge.s32.totalorder %s15_s15, 4  }
 0x590   :  { %14 = sbr.rel (!%p12_p4) target bundleno = 1 (0x1), region = 77 }

</bundles_post_ra>
